<compile_context>
chip_gen: v5e
topology: v5e:2x2
jax: 0.10.0
libtpu: 0.0.40
codegen_flags: <defaults>
</compile_context>

<pallas_src>
import functools

import jax
import jax.numpy as jnp
from jax.experimental import pallas as pl
from jax.experimental.pallas import tpu as pltpu

F32 = jnp.float32
BF16 = jnp.bfloat16


# ------------------------------- Pallas kernel -------------------------------

def _branch_block_kernel(x_ref, wcat_ref, scat_ref, bcat_ref,
                         w3_ref, s3_ref, b3_ref, o_ref, tpad_ref,
                         *, residual, c_half, n_half):
    H, W, C = x_ref.shape[1], x_ref.shape[2], x_ref.shape[3]
    x = x_ref[0]                                     # (H, W, C), f32
    x2 = x.reshape(H * W, C)

    # --- fused branch1 + branch2[0] 1x1 convs (+ folded BN + ReLU) ----------
    # One MXU matmul for both branches: wcat = [W_b1 | W_b2a], bf16 operands,
    # f32 accumulation and epilogue.
    y = jnp.dot(x2.astype(BF16), wcat_ref[...],
                preferred_element_type=jnp.float32)   # (H*W, 2*c_half)
    y = jnp.maximum(y * scat_ref[...] + bcat_ref[...], 0.0)
    out1 = y[:, :c_half]                              # branch1 output
    t = y[:, c_half:]                                 # branch2 intermediate

    # --- keep the intermediate resident in VMEM, zero-padded (halo = 1) -----
    tpad_ref[...] = jnp.zeros(tpad_ref.shape, tpad_ref.dtype)
    tpad_ref[1:H + 1, 1:W + 1, :] = t.reshape(H, W, c_half).astype(BF16)

    # --- in-kernel 3x3 conv: 9 shifted MXU matmuls accumulated in f32 -------
    acc = jnp.zeros((H * W, n_half), jnp.float32)
    for i in range(3):
        for j in range(3):
            patch = tpad_ref[i:i + H, j:j + W, :].reshape(H * W, c_half)
            acc = acc + jnp.dot(patch, w3_ref[i, j],
                                preferred_element_type=jnp.float32)
    out2 = jnp.maximum(acc * s3_ref[...] + b3_ref[...], 0.0)

    # --- channel concat (torch.cat dim=1 in NCHW) + residual, one store -----
    cat = jnp.concatenate([out1.reshape(H, W, c_half),
                           out2.reshape(H, W, n_half)], axis=-1)
    if residual:
        cat = x + cat
    o_ref[0] = cat


# ------------------------------- wrapper --------------------------------------

def branch_block_fwd(x_nchw, params, residual=True):
    """BranchBlock forward.  x_nchw: (B, inp, H, W) -> (B, C_out, H, W)."""
    x = jnp.transpose(x_nchw, (0, 2, 3, 1)).astype(F32)      # NCHW -> NHWC
    B, H, W, C = x.shape
    c_half = params["wcat"].shape[1] // 2
    n_half = params["w3"].shape[-1]
    c_out = c_half + n_half
    if residual and c_out != C:
        raise ValueError("residual add requires inp == inp//2 + oup//2")

    kernel = functools.partial(_branch_block_kernel, residual=residual,
                               c_half=c_half, n_half=n_half)
    out = pl.pallas_call(
        kernel,
        out_shape=jax.ShapeDtypeStruct((B, H, W, c_out), F32),
        grid=(B,),
        in_specs=[
            pl.BlockSpec((1, H, W, C), lambda b: (b, 0, 0, 0)),          # x
            pl.BlockSpec((C, 2 * c_half), lambda b: (0, 0)),             # wcat
            pl.BlockSpec((1, 2 * c_half), lambda b: (0, 0)),             # scat
            pl.BlockSpec((1, 2 * c_half), lambda b: (0, 0)),             # bcat
            pl.BlockSpec((3, 3, c_half, n_half), lambda b: (0, 0, 0, 0)),  # w3
            pl.BlockSpec((1, n_half), lambda b: (0, 0)),                 # s3
            pl.BlockSpec((1, n_half), lambda b: (0, 0)),                 # b3
        ],
        out_specs=pl.BlockSpec((1, H, W, c_out), lambda b: (b, 0, 0, 0)),
        scratch_shapes=[pltpu.VMEM((H + 2, W + 2, c_half), BF16)],
        compiler_params=pltpu.CompilerParams(
            dimension_semantics=("parallel",),
            vmem_limit_bytes=32 * 1024 * 1024,
        ),
    )(x, params["wcat"], params["scat"], params["bcat"],
      params["w3"], params["s3"], params["b3"])
    return jnp.transpose(out, (0, 3, 1, 2))                  # NHWC -> NCHW


# --------------------------- parameters (BN folded) ---------------------------

def _bn_fold(key, cout, conv_bias, eps=1e-5):
    k1, k2, k3, k4 = jax.random.split(key, 4)
    gamma = 1.0 + 0.1 * jax.random.normal(k1, (cout,), F32)
    beta = 0.05 * jax.random.normal(k2, (cout,), F32)
    mean = 0.05 * jax.random.normal(k3, (cout,), F32)
    var = 1.0 + 0.1 * jnp.abs(jax.random.normal(k4, (cout,), F32))
    scale = gamma / jnp.sqrt(var + eps)
    bias = (conv_bias - mean) * scale + beta
    return scale, bias


def make_branch_params(key, inp, oup):
    """Random BranchBlock parameters with BatchNorm folded into scale/bias."""
    c_half = inp // 2
    n_half = oup // 2
    ks = jax.random.split(key, 9)
    # branch1: Conv2d(inp, inp//2, 1) + BN(oup//2) + ReLU
    w1 = jax.random.normal(ks[0], (inp, c_half), F32) / jnp.sqrt(float(inp))
    cb1 = 0.02 * jax.random.normal(ks[1], (c_half,), F32)
    s1, b1 = _bn_fold(ks[2], c_half, cb1)
    # branch2[0]: Conv2d(inp, inp//2, 1) + BN(inp//2) + ReLU
    w2a = jax.random.normal(ks[3], (inp, c_half), F32) / jnp.sqrt(float(inp))
    cb2a = 0.02 * jax.random.normal(ks[4], (c_half,), F32)
    s2a, b2a = _bn_fold(ks[5], c_half, cb2a)
    # branch2[1]: Conv2d(inp//2, oup//2, 3, padding=1) + BN(oup//2) + ReLU
    w3 = jax.random.normal(ks[6], (3, 3, c_half, n_half), F32) / jnp.sqrt(9.0 * c_half)
    cb3 = 0.02 * jax.random.normal(ks[7], (n_half,), F32)
    s3, b3 = _bn_fold(ks[8], n_half, cb3)
    return {
        "wcat": jnp.concatenate([w1, w2a], axis=1).astype(BF16),   # (inp, inp)
        "scat": jnp.concatenate([s1, s2a]).reshape(1, 2 * c_half),
        "bcat": jnp.concatenate([b1, b2a]).reshape(1, 2 * c_half),
        "w3": w3.astype(BF16),                                     # (3,3,c/2,o/2)
        "s3": s3.reshape(1, n_half),
        "b3": b3.reshape(1, n_half),
    }


# ------------------------------ pure-JAX reference ----------------------------

def branch_block_reference(x_nchw, params, residual=True):
    x = jnp.transpose(x_nchw, (0, 2, 3, 1)).astype(F32)
    B, H, W, C = x.shape
    c_half = params["wcat"].shape[1] // 2
    n_half = params["w3"].shape[-1]
    wcat = params["wcat"].astype(F32)
    w3 = params["w3"].astype(F32)
    xq = x.astype(BF16).astype(F32)          # match the kernel's MXU-input cast
    y = jnp.maximum(xq.reshape(-1, C) @ wcat * params["scat"] + params["bcat"], 0.0)
    out1 = y[:, :c_half].reshape(B, H, W, c_half)
    t = y[:, c_half:].reshape(B, H, W, c_half).astype(BF16).astype(F32)
    tp = jnp.pad(t, ((0, 0), (1, 1), (1, 1), (0, 0)))
    acc = jnp.zeros((B, H, W, n_half), F32)
    for i in range(3):
        for j in range(3):
            acc = acc + jnp.einsum("bhwc,cn->bhwn",
                                   tp[:, i:i + H, j:j + W, :], w3[i, j])
    out2 = jnp.maximum(acc * params["s3"] + params["b3"], 0.0)
    cat = jnp.concatenate([out1, out2], axis=-1)
    out = x + cat if residual else cat
    return jnp.transpose(out, (0, 3, 1, 2))


# ---------------------------------- main --------------------------------------

if __name__ == "__main__":
    B, C, H, W = 2, 32, 16, 16               # inp == oup (required for residual)
    key = jax.random.PRNGKey(0)
    kx, kp = jax.random.split(key)
    x = jax.random.normal(kx, (B, C, H, W), dtype=F32)
    params = make_branch_params(kp, C, C)

    fwd = jax.jit(functools.partial(branch_block_fwd, residual=True))
    out = jax.block_until_ready(fwd(x, params))

    assert out.shape == (B, C, H, W), out.shape
    assert bool(jnp.all(jnp.isfinite(out)))

    ref = branch_block_reference(x, params, residual=True)
    max_err = float(jnp.max(jnp.abs(out - ref)))
    assert max_err < 2e-3, f"max abs error vs reference: {max_err}"

    print("KERNEL_OK")
</pallas_src>

<mosaic_0001>
module attributes {stable_mosaic.version = 11 : i64} {
  func.func @_branch_block_kernel(%arg0: i32, %arg1: memref<1x16x16x32xf32, #tpu.memory_space<vmem>>, %arg2: memref<32x32xbf16, #tpu.memory_space<vmem>>, %arg3: memref<1x32xf32, #tpu.memory_space<vmem>>, %arg4: memref<1x32xf32, #tpu.memory_space<vmem>>, %arg5: memref<3x3x16x16xbf16, #tpu.memory_space<vmem>>, %arg6: memref<1x16xf32, #tpu.memory_space<vmem>>, %arg7: memref<1x16xf32, #tpu.memory_space<vmem>>, %arg8: memref<1x16x16x32xf32, #tpu.memory_space<vmem>>, %arg9: memref<18x18x16xbf16, #tpu.memory_space<vmem>>) attributes {dimension_semantics = [#tpu.dimension_semantics<parallel>], iteration_bounds = array<i64: 2>, scalar_prefetch = 0 : i64, scratch_operands = 1 : i64, tpu.core_type = #tpu.core_type<tc>, window_params = [{transform_indices = @transform_0, window_bounds = array<i64: 1, 16, 16, 32>}, {pipeline_mode = #tpu.pipeline_mode<synchronous>, transform_indices = @transform_1, window_bounds = array<i64: 32, 32>}, {pipeline_mode = #tpu.pipeline_mode<synchronous>, transform_indices = @transform_2, window_bounds = array<i64: 1, 32>}, {pipeline_mode = #tpu.pipeline_mode<synchronous>, transform_indices = @transform_3, window_bounds = array<i64: 1, 32>}, {pipeline_mode = #tpu.pipeline_mode<synchronous>, transform_indices = @transform_4, window_bounds = array<i64: 3, 3, 16, 16>}, {pipeline_mode = #tpu.pipeline_mode<synchronous>, transform_indices = @transform_5, window_bounds = array<i64: 1, 16>}, {pipeline_mode = #tpu.pipeline_mode<synchronous>, transform_indices = @transform_6, window_bounds = array<i64: 1, 16>}, {transform_indices = @transform_7, window_bounds = array<i64: 1, 16, 16, 32>}]} {
    %c0 = arith.constant 0 : index
    %c0_0 = arith.constant 0 : index
    %c0_1 = arith.constant 0 : index
    %c0_2 = arith.constant 0 : index
    %0 = vector.load %arg1[%c0, %c0_0, %c0_1, %c0_2] : memref<1x16x16x32xf32, #tpu.memory_space<vmem>>, vector<1x16x16x32xf32>
    %1 = vector.shape_cast %0 : vector<1x16x16x32xf32> to vector<16x16x32xf32>
    %2 = vector.shape_cast %1 : vector<16x16x32xf32> to vector<256x32xf32>
    %3 = arith.truncf %2 : vector<256x32xf32> to vector<256x32xbf16>
    %c0_3 = arith.constant 0 : index
    %c0_4 = arith.constant 0 : index
    %4 = vector.load %arg2[%c0_3, %c0_4] : memref<32x32xbf16, #tpu.memory_space<vmem>>, vector<32x32xbf16>
    %cst = arith.constant dense<0.000000e+00> : vector<256x32xf32>
    %5 = tpu.matmul %3, %4, %cst {dimension_numbers = #tpu.dot_dimension_numbers<[1], [0], [0], [1], [0, 0, 1, 1], [], []>} : vector<256x32xbf16>, vector<32x32xbf16>, vector<256x32xf32> -> vector<256x32xf32>
    %c0_5 = arith.constant 0 : index
    %c0_6 = arith.constant 0 : index
    %6 = vector.load %arg3[%c0_5, %c0_6] : memref<1x32xf32, #tpu.memory_space<vmem>>, vector<1x32xf32>
    %7 = vector.broadcast %6 : vector<1x32xf32> to vector<256x32xf32>
    %8 = arith.mulf %5, %7 : vector<256x32xf32>
    %c0_7 = arith.constant 0 : index
    %c0_8 = arith.constant 0 : index
    %9 = vector.load %arg4[%c0_7, %c0_8] : memref<1x32xf32, #tpu.memory_space<vmem>>, vector<1x32xf32>
    %10 = vector.broadcast %9 : vector<1x32xf32> to vector<256x32xf32>
    %11 = arith.addf %8, %10 : vector<256x32xf32>
    %cst_9 = arith.constant 0.000000e+00 : f32
    %12 = vector.broadcast %cst_9 : f32 to vector<256x32xf32>
    %13 = arith.maximumf %11, %12 : vector<256x32xf32>
    %14 = vector.extract_strided_slice %13 {offsets = [0, 0], sizes = [256, 16], strides = [1, 1]} : vector<256x32xf32> to vector<256x16xf32>
    %15 = vector.extract_strided_slice %13 {offsets = [0, 16], sizes = [256, 16], strides = [1, 1]} : vector<256x32xf32> to vector<256x16xf32>
    %cst_10 = arith.constant 0.000000e+00 : bf16
    %16 = vector.broadcast %cst_10 : bf16 to vector<18x18x16xbf16>
    %c0_11 = arith.constant 0 : index
    %c0_12 = arith.constant 0 : index
    %c0_13 = arith.constant 0 : index
    %17 = vector.load %arg9[%c0_11, %c0_12, %c0_13] : memref<18x18x16xbf16, #tpu.memory_space<vmem>>, vector<18x18x16xbf16>
    tpu.vector_store %arg9[%c0_11, %c0_12, %c0_13], %16 {strides = array<i32>} : memref<18x18x16xbf16, #tpu.memory_space<vmem>>, vector<18x18x16xbf16>,
    %18 = vector.shape_cast %15 : vector<256x16xf32> to vector<16x16x16xf32>
    %19 = arith.truncf %18 : vector<16x16x16xf32> to vector<16x16x16xbf16>
    %c1 = arith.constant 1 : index
    %c1_14 = arith.constant 1 : index
    %c0_15 = arith.constant 0 : index
    %20 = vector.load %arg9[%c1, %c1_14, %c0_15] : memref<18x18x16xbf16, #tpu.memory_space<vmem>>, vector<16x16x16xbf16>
    tpu.vector_store %arg9[%c1, %c1_14, %c0_15], %19 {strides = array<i32>} : memref<18x18x16xbf16, #tpu.memory_space<vmem>>, vector<16x16x16xbf16>,
    %cst_16 = arith.constant 0.000000e+00 : f32
    %21 = vector.broadcast %cst_16 : f32 to vector<256x16xf32>
    %c0_17 = arith.constant 0 : index
    %c0_18 = arith.constant 0 : index
    %c0_19 = arith.constant 0 : index
    %22 = vector.load %arg9[%c0_17, %c0_18, %c0_19] : memref<18x18x16xbf16, #tpu.memory_space<vmem>>, vector<16x16x16xbf16>
    %23 = vector.shape_cast %22 : vector<16x16x16xbf16> to vector<256x16xbf16>
    %c0_20 = arith.constant 0 : index
    %c0_21 = arith.constant 0 : index
    %c0_22 = arith.constant 0 : index
    %c0_23 = arith.constant 0 : index
    %24 = vector.load %arg5[%c0_20, %c0_21, %c0_22, %c0_23] : memref<3x3x16x16xbf16, #tpu.memory_space<vmem>>, vector<1x1x16x16xbf16>
    %25 = vector.shape_cast %24 : vector<1x1x16x16xbf16> to vector<16x16xbf16>
    %cst_24 = arith.constant dense<0.000000e+00> : vector<256x16xf32>
    %26 = tpu.matmul %23, %25, %cst_24 {dimension_numbers = #tpu.dot_dimension_numbers<[1], [0], [0], [1], [0, 0, 1, 1], [], []>} : vector<256x16xbf16>, vector<16x16xbf16>, vector<256x16xf32> -> vector<256x16xf32>
    %27 = arith.addf %21, %26 : vector<256x16xf32>
    %c0_25 = arith.constant 0 : index
    %c1_26 = arith.constant 1 : index
    %c0_27 = arith.constant 0 : index
    %28 = vector.load %arg9[%c0_25, %c1_26, %c0_27] : memref<18x18x16xbf16, #tpu.memory_space<vmem>>, vector<16x16x16xbf16>
    %29 = vector.shape_cast %28 : vector<16x16x16xbf16> to vector<256x16xbf16>
    %c0_28 = arith.constant 0 : index
    %c1_29 = arith.constant 1 : index
    %c0_30 = arith.constant 0 : index
    %c0_31 = arith.constant 0 : index
    %30 = vector.load %arg5[%c0_28, %c1_29, %c0_30, %c0_31] : memref<3x3x16x16xbf16, #tpu.memory_space<vmem>>, vector<1x1x16x16xbf16>
    %31 = vector.shape_cast %30 : vector<1x1x16x16xbf16> to vector<16x16xbf16>
    %cst_32 = arith.constant dense<0.000000e+00> : vector<256x16xf32>
    %32 = tpu.matmul %29, %31, %cst_32 {dimension_numbers = #tpu.dot_dimension_numbers<[1], [0], [0], [1], [0, 0, 1, 1], [], []>} : vector<256x16xbf16>, vector<16x16xbf16>, vector<256x16xf32> -> vector<256x16xf32>
    %33 = arith.addf %27, %32 : vector<256x16xf32>
    %c0_33 = arith.constant 0 : index
    %c2 = arith.constant 2 : index
    %c0_34 = arith.constant 0 : index
    %34 = vector.load %arg9[%c0_33, %c2, %c0_34] : memref<18x18x16xbf16, #tpu.memory_space<vmem>>, vector<16x16x16xbf16>
    %35 = vector.shape_cast %34 : vector<16x16x16xbf16> to vector<256x16xbf16>
    %c0_35 = arith.constant 0 : index
    %c2_36 = arith.constant 2 : index
    %c0_37 = arith.constant 0 : index
    %c0_38 = arith.constant 0 : index
    %36 = vector.load %arg5[%c0_35, %c2_36, %c0_37, %c0_38] : memref<3x3x16x16xbf16, #tpu.memory_space<vmem>>, vector<1x1x16x16xbf16>
    %37 = vector.shape_cast %36 : vector<1x1x16x16xbf16> to vector<16x16xbf16>
    %cst_39 = arith.constant dense<0.000000e+00> : vector<256x16xf32>
    %38 = tpu.matmul %35, %37, %cst_39 {dimension_numbers = #tpu.dot_dimension_numbers<[1], [0], [0], [1], [0, 0, 1, 1], [], []>} : vector<256x16xbf16>, vector<16x16xbf16>, vector<256x16xf32> -> vector<256x16xf32>
    %39 = arith.addf %33, %38 : vector<256x16xf32>
    %c1_40 = arith.constant 1 : index
    %c0_41 = arith.constant 0 : index
    %c0_42 = arith.constant 0 : index
    %40 = vector.load %arg9[%c1_40, %c0_41, %c0_42] : memref<18x18x16xbf16, #tpu.memory_space<vmem>>, vector<16x16x16xbf16>
    %41 = vector.shape_cast %40 : vector<16x16x16xbf16> to vector<256x16xbf16>
    %c1_43 = arith.constant 1 : index
    %c0_44 = arith.constant 0 : index
    %c0_45 = arith.constant 0 : index
    %c0_46 = arith.constant 0 : index
    %42 = vector.load %arg5[%c1_43, %c0_44, %c0_45, %c0_46] : memref<3x3x16x16xbf16, #tpu.memory_space<vmem>>, vector<1x1x16x16xbf16>
    %43 = vector.shape_cast %42 : vector<1x1x16x16xbf16> to vector<16x16xbf16>
    %cst_47 = arith.constant dense<0.000000e+00> : vector<256x16xf32>
    %44 = tpu.matmul %41, %43, %cst_47 {dimension_numbers = #tpu.dot_dimension_numbers<[1], [0], [0], [1], [0, 0, 1, 1], [], []>} : vector<256x16xbf16>, vector<16x16xbf16>, vector<256x16xf32> -> vector<256x16xf32>
    %45 = arith.addf %39, %44 : vector<256x16xf32>
    %c1_48 = arith.constant 1 : index
    %c1_49 = arith.constant 1 : index
    %c0_50 = arith.constant 0 : index
    %46 = vector.load %arg9[%c1_48, %c1_49, %c0_50] : memref<18x18x16xbf16, #tpu.memory_space<vmem>>, vector<16x16x16xbf16>
    %47 = vector.shape_cast %46 : vector<16x16x16xbf16> to vector<256x16xbf16>
    %c1_51 = arith.constant 1 : index
    %c1_52 = arith.constant 1 : index
    %c0_53 = arith.constant 0 : index
    %c0_54 = arith.constant 0 : index
    %48 = vector.load %arg5[%c1_51, %c1_52, %c0_53, %c0_54] : memref<3x3x16x16xbf16, #tpu.memory_space<vmem>>, vector<1x1x16x16xbf16>
    %49 = vector.shape_cast %48 : vector<1x1x16x16xbf16> to vector<16x16xbf16>
    %cst_55 = arith.constant dense<0.000000e+00> : vector<256x16xf32>
    %50 = tpu.matmul %47, %49, %cst_55 {dimension_numbers = #tpu.dot_dimension_numbers<[1], [0], [0], [1], [0, 0, 1, 1], [], []>} : vector<256x16xbf16>, vector<16x16xbf16>, vector<256x16xf32> -> vector<256x16xf32>
    %51 = arith.addf %45, %50 : vector<256x16xf32>
    %c1_56 = arith.constant 1 : index
    %c2_57 = arith.constant 2 : index
    %c0_58 = arith.constant 0 : index
    %52 = vector.load %arg9[%c1_56, %c2_57, %c0_58] : memref<18x18x16xbf16, #tpu.memory_space<vmem>>, vector<16x16x16xbf16>
    %53 = vector.shape_cast %52 : vector<16x16x16xbf16> to vector<256x16xbf16>
    %c1_59 = arith.constant 1 : index
    %c2_60 = arith.constant 2 : index
    %c0_61 = arith.constant 0 : index
    %c0_62 = arith.constant 0 : index
    %54 = vector.load %arg5[%c1_59, %c2_60, %c0_61, %c0_62] : memref<3x3x16x16xbf16, #tpu.memory_space<vmem>>, vector<1x1x16x16xbf16>
    %55 = vector.shape_cast %54 : vector<1x1x16x16xbf16> to vector<16x16xbf16>
    %cst_63 = arith.constant dense<0.000000e+00> : vector<256x16xf32>
    %56 = tpu.matmul %53, %55, %cst_63 {dimension_numbers = #tpu.dot_dimension_numbers<[1], [0], [0], [1], [0, 0, 1, 1], [], []>} : vector<256x16xbf16>, vector<16x16xbf16>, vector<256x16xf32> -> vector<256x16xf32>
    %57 = arith.addf %51, %56 : vector<256x16xf32>
    %c2_64 = arith.constant 2 : index
    %c0_65 = arith.constant 0 : index
    %c0_66 = arith.constant 0 : index
    %58 = vector.load %arg9[%c2_64, %c0_65, %c0_66] : memref<18x18x16xbf16, #tpu.memory_space<vmem>>, vector<16x16x16xbf16>
    %59 = vector.shape_cast %58 : vector<16x16x16xbf16> to vector<256x16xbf16>
    %c2_67 = arith.constant 2 : index
    %c0_68 = arith.constant 0 : index
    %c0_69 = arith.constant 0 : index
    %c0_70 = arith.constant 0 : index
    %60 = vector.load %arg5[%c2_67, %c0_68, %c0_69, %c0_70] : memref<3x3x16x16xbf16, #tpu.memory_space<vmem>>, vector<1x1x16x16xbf16>
    %61 = vector.shape_cast %60 : vector<1x1x16x16xbf16> to vector<16x16xbf16>
    %cst_71 = arith.constant dense<0.000000e+00> : vector<256x16xf32>
    %62 = tpu.matmul %59, %61, %cst_71 {dimension_numbers = #tpu.dot_dimension_numbers<[1], [0], [0], [1], [0, 0, 1, 1], [], []>} : vector<256x16xbf16>, vector<16x16xbf16>, vector<256x16xf32> -> vector<256x16xf32>
    %63 = arith.addf %57, %62 : vector<256x16xf32>
    %c2_72 = arith.constant 2 : index
    %c1_73 = arith.constant 1 : index
    %c0_74 = arith.constant 0 : index
    %64 = vector.load %arg9[%c2_72, %c1_73, %c0_74] : memref<18x18x16xbf16, #tpu.memory_space<vmem>>, vector<16x16x16xbf16>
    %65 = vector.shape_cast %64 : vector<16x16x16xbf16> to vector<256x16xbf16>
    %c2_75 = arith.constant 2 : index
    %c1_76 = arith.constant 1 : index
    %c0_77 = arith.constant 0 : index
    %c0_78 = arith.constant 0 : index
    %66 = vector.load %arg5[%c2_75, %c1_76, %c0_77, %c0_78] : memref<3x3x16x16xbf16, #tpu.memory_space<vmem>>, vector<1x1x16x16xbf16>
    %67 = vector.shape_cast %66 : vector<1x1x16x16xbf16> to vector<16x16xbf16>
    %cst_79 = arith.constant dense<0.000000e+00> : vector<256x16xf32>
    %68 = tpu.matmul %65, %67, %cst_79 {dimension_numbers = #tpu.dot_dimension_numbers<[1], [0], [0], [1], [0, 0, 1, 1], [], []>} : vector<256x16xbf16>, vector<16x16xbf16>, vector<256x16xf32> -> vector<256x16xf32>
    %69 = arith.addf %63, %68 : vector<256x16xf32>
    %c2_80 = arith.constant 2 : index
    %c2_81 = arith.constant 2 : index
    %c0_82 = arith.constant 0 : index
    %70 = vector.load %arg9[%c2_80, %c2_81, %c0_82] : memref<18x18x16xbf16, #tpu.memory_space<vmem>>, vector<16x16x16xbf16>
    %71 = vector.shape_cast %70 : vector<16x16x16xbf16> to vector<256x16xbf16>
    %c2_83 = arith.constant 2 : index
    %c2_84 = arith.constant 2 : index
    %c0_85 = arith.constant 0 : index
    %c0_86 = arith.constant 0 : index
    %72 = vector.load %arg5[%c2_83, %c2_84, %c0_85, %c0_86] : memref<3x3x16x16xbf16, #tpu.memory_space<vmem>>, vector<1x1x16x16xbf16>
    %73 = vector.shape_cast %72 : vector<1x1x16x16xbf16> to vector<16x16xbf16>
    %cst_87 = arith.constant dense<0.000000e+00> : vector<256x16xf32>
    %74 = tpu.matmul %71, %73, %cst_87 {dimension_numbers = #tpu.dot_dimension_numbers<[1], [0], [0], [1], [0, 0, 1, 1], [], []>} : vector<256x16xbf16>, vector<16x16xbf16>, vector<256x16xf32> -> vector<256x16xf32>
    %75 = arith.addf %69, %74 : vector<256x16xf32>
    %c0_88 = arith.constant 0 : index
    %c0_89 = arith.constant 0 : index
    %76 = vector.load %arg6[%c0_88, %c0_89] : memref<1x16xf32, #tpu.memory_space<vmem>>, vector<1x16xf32>
    %77 = vector.broadcast %76 : vector<1x16xf32> to vector<256x16xf32>
    %78 = arith.mulf %75, %77 : vector<256x16xf32>
    %c0_90 = arith.constant 0 : index
    %c0_91 = arith.constant 0 : index
    %79 = vector.load %arg7[%c0_90, %c0_91] : memref<1x16xf32, #tpu.memory_space<vmem>>, vector<1x16xf32>
    %80 = vector.broadcast %79 : vector<1x16xf32> to vector<256x16xf32>
    %81 = arith.addf %78, %80 : vector<256x16xf32>
    %cst_92 = arith.constant 0.000000e+00 : f32
    %82 = vector.broadcast %cst_92 : f32 to vector<256x16xf32>
    %83 = arith.maximumf %81, %82 : vector<256x16xf32>
    %84 = vector.shape_cast %14 : vector<256x16xf32> to vector<16x16x16xf32>
    %85 = vector.shape_cast %83 : vector<256x16xf32> to vector<16x16x16xf32>
    %86 = tpu.concatenate %84, %85 in 2 : vector<16x16x16xf32>, vector<16x16x16xf32> -> vector<16x16x32xf32>
    %87 = arith.addf %1, %86 : vector<16x16x32xf32>
    %c0_93 = arith.constant 0 : index
    %c0_94 = arith.constant 0 : index
    %c0_95 = arith.constant 0 : index
    %c0_96 = arith.constant 0 : index
    %88 = vector.load %arg8[%c0_93, %c0_94, %c0_95, %c0_96] : memref<1x16x16x32xf32, #tpu.memory_space<vmem>>, vector<1x16x16x32xf32>
    %89 = vector.shape_cast %88 : vector<1x16x16x32xf32> to vector<16x16x32xf32>
    %90 = vector.shape_cast %87 : vector<16x16x32xf32> to vector<1x16x16x32xf32>
    tpu.vector_store %arg8[%c0_93, %c0_94, %c0_95, %c0_96], %90 {strides = array<i32>} : memref<1x16x16x32xf32, #tpu.memory_space<vmem>>, vector<1x16x16x32xf32>,
    return
  }
  func.func @transform_0(%arg0: i32) -> (i32, i32, i32, i32) {
    %c0_i32 = arith.constant 0 : i32
    %c0_i32_0 = arith.constant 0 : i32
    %c0_i32_1 = arith.constant 0 : i32
    %c0_i32_2 = arith.constant 0 : i32
    return %arg0, %c0_i32, %c0_i32_0, %c0_i32_1 : i32, i32, i32, i32
  }
  func.func @transform_1(%arg0: i32) -> (i32, i32) {
    %c0_i32 = arith.constant 0 : i32
    %c0_i32_0 = arith.constant 0 : i32
    %c0_i32_1 = arith.constant 0 : i32
    return %c0_i32, %c0_i32_0 : i32, i32
  }
  func.func @transform_2(%arg0: i32) -> (i32, i32) {
    %c0_i32 = arith.constant 0 : i32
    %c0_i32_0 = arith.constant 0 : i32
    %c0_i32_1 = arith.constant 0 : i32
    return %c0_i32, %c0_i32_0 : i32, i32
  }
  func.func @transform_3(%arg0: i32) -> (i32, i32) {
    %c0_i32 = arith.constant 0 : i32
    %c0_i32_0 = arith.constant 0 : i32
    %c0_i32_1 = arith.constant 0 : i32
    return %c0_i32, %c0_i32_0 : i32, i32
  }
  func.func @transform_4(%arg0: i32) -> (i32, i32, i32, i32) {
    %c0_i32 = arith.constant 0 : i32
    %c0_i32_0 = arith.constant 0 : i32
    %c0_i32_1 = arith.constant 0 : i32
    %c0_i32_2 = arith.constant 0 : i32
    %c0_i32_3 = arith.constant 0 : i32
    return %c0_i32, %c0_i32_0, %c0_i32_1, %c0_i32_2 : i32, i32, i32, i32
  }
  func.func @transform_5(%arg0: i32) -> (i32, i32) {
    %c0_i32 = arith.constant 0 : i32
    %c0_i32_0 = arith.constant 0 : i32
    %c0_i32_1 = arith.constant 0 : i32
    return %c0_i32, %c0_i32_0 : i32, i32
  }
  func.func @transform_6(%arg0: i32) -> (i32, i32) {
    %c0_i32 = arith.constant 0 : i32
    %c0_i32_0 = arith.constant 0 : i32
    %c0_i32_1 = arith.constant 0 : i32
    return %c0_i32, %c0_i32_0 : i32, i32
  }
  func.func @transform_7(%arg0: i32) -> (i32, i32, i32, i32) {
    %c0_i32 = arith.constant 0 : i32
    %c0_i32_0 = arith.constant 0 : i32
    %c0_i32_1 = arith.constant 0 : i32
    %c0_i32_2 = arith.constant 0 : i32
    return %arg0, %c0_i32, %c0_i32_0, %c0_i32_1 : i32, i32, i32, i32
  }
}

</mosaic_0001>

<bundles_post_ra>
// kernel: branch_block_fwd.1
= control target key start
LH: loop header
LB: loop body
LE: loop exit
PB: predicated region body
PF: predicated region fallthrough
CT: control target
= control target key end

     0   :  { %s8881_s0 = inlined_call_operand.hbm [shape: f32[2,16,16,32], index: 0, kind: input, shape index: {}]   ;;  %s8882_s1 = inlined_call_operand.hbm [shape: bf16[32,32], index: 1, kind: input, shape index: {}]   ;;  %s8883_s2 = inlined_call_operand.vmem [shape: f32[1,32], index: 2, kind: input, shape index: {}]   ;;  %s8884_s3 = inlined_call_operand.vmem [shape: f32[1,32], index: 3, kind: input, shape index: {}]   ;;  %s8885_s4 = inlined_call_operand.hbm [shape: bf16[3,3,16,16], index: 4, kind: input, shape index: {}]   ;;  %s8886_s5 = inlined_call_operand.vmem [shape: f32[1,16], index: 5, kind: input, shape index: {}]   ;;  %s8887_s6 = inlined_call_operand.hbm [shape: f32[1,16], index: 6, kind: input, shape index: {}]   ;;  %s8888_s7 = inlined_call_operand.hbm [shape: f32[2,16,16,32], index: 7, kind: output, shape index: {}]  }
   0x1   :  { %8921 = sst [smem:[#allocation88_spill]] %s8882_s1 }
   0x2   :  { %12 = vsyncpa [#allocation4], 0 }
   0x3   :  { %14 = vsyncpa [#allocation4 + $0x1], 0 }
   0x4   :  { %15 = vsyncpa [#allocation7], 0 }
   0x5   :  { %16 = vsyncpa [#allocation10], 0 }
   0x6   :  { %17 = vsyncpa [#allocation5], 0 }
   0x7   :  { %19 = vsyncpa [#allocation5 + $0x1], 0  ;;  %s6619_s24 = smov 0   ;;  %s6621_s25 = smov 0  }
   0x8   :  { %s6623_s26 = smov 0   ;;  %s6625_s27 = smov 0  }
   0x9 LB: > { %s6640_s28 = sadd.s32 4294967295, %s6565_s27   ;;  %s5670_s29 = sadd.s32 4294967294, %s6565_s27   ;;  %s6565_s27 = sphi %s6625_s27, %s9095_s27   ;;  %s6561_s26 = sphi %s6623_s26, %s9094_s26   ;;  %s6557_s25 = sphi %s6621_s25, %s9093_s25   ;;  %s6553_s24 = sphi %s6619_s24, %s9092_s24  }
   0xa   : > { %p45_p0 = scmp.ne.s32.totalorder %s6557_s25, %s6553_s24  ;;  %p46_p1 = scmp.eq.s32.totalorder %s6640_s28, 0 }
   0xb   : > { %p195_p2 = scmp.eq.s32.totalorder %s6640_s28, 1  ;;  %p201_p3 = scmp.eq.s32.totalorder %s5670_s29, 1 }
   0xc   : > { %p6649_p4 = por %p46_p1, %p45_p0  ;;  %p5671_p5 = scmp.ge.s32.totalorder %s6565_s27, 1 }
   0xd   : > { %p6654_p6 = por %p201_p3, %p45_p0  ;;  %p208_p7 = scmp.lt.s32.totalorder %s6565_s27, 3 }
   0xe   : > { %s8924_s1 = sld [smem:[#allocation88_spill]]  ;;  %s6567_s13 = smov [#allocation6]  }
   0xf   : > { %p6662_p8 = pnand %p5671_p5, %p208_p7  ;;  %s221_s14 = sshll.u32 %s6567_s13, 4  ;;  %s222_s14 = int_to_ptr.vmem [resolvable:$true] %s221_s14 }
  0x10   : > { %s239_s18 = sshll.u32 %s8885_s4, 4  ;;  %s6568_s19 = smov 64   ;;  %s240_s18 = int_to_ptr.hbm [resolvable:$true] %s239_s18 }
  0x11   : > { %p6213_p9 = pneg %p6662_p8  ;;  %s6569_s20 = smov 4  }
  0x12   : > { %s6570_s21 = smov [#allocation8]   ;;  %s257_s9 = sshll.u32 %s8887_s6, 4  ;;  %s258_s9 = int_to_ptr.hbm [resolvable:$true] %s257_s9 }
  0x13   : > { %p6670_p10 = pnand %p6213_p9, %p46_p1  ;;  %s241_s22 = sshll.u32 %s6570_s21, 4  ;;  %s242_s22 = int_to_ptr.vmem [resolvable:$true] %s241_s22 }
  0x14   : > { %s219_s11 = sshll.u32 %s8924_s1, 4  ;;  %s6571_s10 = smov [#allocation9]   ;;  %s220_s11 = int_to_ptr.hbm [resolvable:$true] %s219_s11 }
  0x15   : > { %6216 = dma.hbm_to_vmem [thread:$0]  (!%p6670_p10), %s220_s11, 256, %s222_s14, [#allocation7], %s6568_s19, %s6568_s19, %s6569_s20  }
  0x16   : > { %6219 = dma.hbm_to_vmem [thread:$0]  (!%p6670_p10), %s240_s18, 1152, %s242_s22, [#allocation7], %s6568_s19, %s6568_s19, %s6569_s20  }
  0x17   : > { %s259_s13 = sshll.u32 %s6571_s10, 4  ;;  %s6686_s11 = sadd.s32 1, %s6565_s27   ;;  %s260_s13 = int_to_ptr.vmem [resolvable:$true] %s259_s13 }
  0x18   : > { %6222 = dma.hbm_to_vmem [thread:$0]  (!%p6670_p10), %s258_s9, 16, %s260_s13, [#allocation10]  }
  0x19   : > { %s29_s14 = ssub.s32 %s6565_s27, %s6686_s11  ;;  %s32_s16 = sadd.s32 1, %s6561_s26 }
  0x1a   : > { %p30_p12 = scmp.eq.s32.totalorder %s29_s14, 0  ;;  %p39_p13 = scmp.ne.s32.totalorder %s6561_s26, %s6557_s25 }
  0x1b   : > { %p40_p0 = scmp.eq.s32.totalorder %s6565_s27, 0  ;;  %p6234_p3 = scmp.lt.s32.totalorder %s6565_s27, 2 }
  0x1c   : > { %s6698_s17 = scalar_select %p30_p12, %s6561_s26, %s32_s16  }
  0x1d   : > { %p41_p5 = por %p40_p0, %p39_p13  ;;  %p6702_p7 = por %p195_p2, %p39_p13 }
  0x1e   : > { %s270_s19 = sand.u32 1, %s6561_s26   ;;  %s6134_s20 = sshll.u32 %s6565_s27, 8 }
  0x1f   : > { %s5676_s15 = sshll.u32 %s270_s19, 8  ;;  %s279_s23 = scalar_lea.hbm %s8881_s0, %s6134_s20 }
  0x20   : > { %s280_s29 = sshll.u32 %s279_s23, 4  ;;  %s274_s9 = scalar_lea.vmem [#allocation3], %s5676_s15  ;;  %s281_s29 = int_to_ptr.hbm [resolvable:$true] %s280_s29 }
  0x21   : > { %s282_s10 = sshll.u32 %s274_s9, 4  ;;  %p6713_p9 = pnand %p6234_p3, %p41_p5  ;;  %s283_s10 = int_to_ptr.vmem [resolvable:$true] %s282_s10 }
  0x22   : > { %s271_s14 = scalar_lea.sflag [#allocation4], %s270_s19  ;;  %s6461_s16 = sshra.s32 %s281_s29, 4  ;;  %s6462_s16 = int_to_ptr.hbm [resolvable:$true] %s6461_s16 }
  0x23   : > { %s6463_s1 = scalar_lea.hbm %s6462_s16, 256  ;;  %p6465_p10 = pneg %p6713_p9 }
  0x24   : > { %p6464_p2 = scmp.ne.s32.totalorder %s6462_s16, %s6463_s1  ;;  %s6468_s21 = scalar_lea.hbm %s8881_s0, 512 }
  0x25   : > { %p6469_p0 = scmp.lt.s32.totalorder %s6462_s16, %s8881_s0  ;;  %p6470_p3 = scmp.lt.s32.totalorder %s6468_s21, %s6463_s1 }
  0x26   : > { %p6466_p12 = pnand %p6465_p10, %p6464_p2 }
  0x27   : > { %p6471_p5 = por %p6470_p3, %p6469_p0 }
  0x28   : > { %p6467_p13 = pneg %p6466_p12 }
  0x2a   : > { %p6472_p11 = pnand %p6471_p5, %p6467_p13 }
  0x2c   : > { %6475 = shalt.err (!%p6472_p11)
}
  0x2d   : > { %s6572_s19 = smov 128   ;;  %s6573_s9 = smov 8  }
  0x2e   : > { %6226 = dma.hbm_to_vmem [thread:$0]  (!%p6713_p9), %s281_s29, 4096, %s283_s10, %s271_s14, %s6572_s19, %s6572_s19, %s6573_s9  }
  0x2f   : > { %294 = sbr.rel (%p6662_p8) target bundleno = 1368 (0x558), region = 48 }
  0x34   : > { %s6730_s20 = sand.u32 1, %s6557_s25  }
  0x35   : > { %s5680_s16 = sshll.u32 %s6730_s20, 8  ;;  %s297_s1 = scalar_lea.sflag [#allocation4], %s6730_s20 }
  0x36   : > { %s6736_s15 = scalar_lea.vmem [#allocation3], %s5680_s16 }
  0x37   : > { %6536 = dma.done.wait (%p6649_p4), %s297_s1, 4096  }
  0x38   : > { %6538 = vsyncadd (%p6649_p4), %s297_s1, 4294963200 }
  0x39   : > { %6540 = dma.done.wait (%p46_p1), [#allocation7], 1408  }
  0x3a   : > { %6542 = vsyncadd (%p46_p1), [#allocation7], 4294965888 }
  0x3b   : > { %6544 = dma.done.wait (%p46_p1), [#allocation10], 16  }
  0x3c   : > { %6546 = vsyncadd (%p46_p1), [#allocation10], 4294967280  ;;  %v6136_v0 = vld [vmem:[#allocation6 + $0x8] sm:$0xff]  ;;  %v6135_v1 = vld [vmem:[#allocation6] sm:$0xff]  ;;  %vm412_vm0 = vcmask 261120   ;;  %s6574_s13 = smov 112  }
  0x3d   : > { %467 = vmatpush.bf16.msra.mxu0 %v6136_v0  ;;  %v348_v2 = vld [vmem:[%s6736_s15] sm:$0xff]  ;;  %v349_v3 = vld [vmem:[%s6736_s15 + $0x8] sm:$0xff]  ;;  %v350_v5 = vld [vmem:[%s6736_s15 + $0x10] sm:$0xff]  ;;  %vm742_vm1 = vsmask.f32 256  ;;  %vm657_vm4 = vcmask 122880  }
  0x3e   : > { %v380_v4 = vpack.c.bf16 %v349_v3, %v348_v2  ;;  %v351_v6 = vld [vmem:[%s6736_s15 + $0x18] sm:$0xff]  ;;  %v352_v8 = vld [vmem:[%s6736_s15 + $0x20] sm:$0xff]  ;;  %v353_v9 = vld [vmem:[%s6736_s15 + $0x28] sm:$0xff]  ;;  %vm743_vm2 = vsmask.f32 4368  ;;  %vm654_vm5 = vcmask 125952  }
  0x3f   : > { %v381_v7 = vpack.c.bf16 %v351_v6, %v350_v5  ;;  %v382_v10 = vpack.c.bf16 %v353_v9, %v352_v8  ;;  %v354_v11 = vld [vmem:[%s6736_s15 + $0x30] sm:$0xff]  ;;  %v355_v12 = vld [vmem:[%s6736_s15 + $0x38] sm:$0xff]  ;;  %v356_v14 = vld [vmem:[%s6736_s15 + $0x40] sm:$0xff]  ;;  %v6575_v9 = vmov 0   ;;  %vm1329_vm6 = vsmask.f32 3328 }
  0x40   : > { %v383_v13 = vpack.c.bf16 %v355_v12, %v354_v11  ;;  %v357_v15 = vld [vmem:[%s6736_s15 + $0x48] sm:$0xff]  ;;  %v358_v17 = vld [vmem:[%s6736_s15 + $0x50] sm:$0xff]  ;;  %v359_v18 = vld [vmem:[%s6736_s15 + $0x58] sm:$0xff]  ;;  %661 = vst.msk [vmem:[#allocation2 + $0x14] sm:$0x1] %vm657_vm4, %v6575_v9  ;;  %vm1773_vm10 = vcmask 130048  }
  0x41   : > { %468 = vmatpush.bf16.msra.mxu0 %v6135_v1  ;;  %v384_v16 = vpack.c.bf16 %v357_v15, %v356_v14  ;;  %v385_v19 = vpack.c.bf16 %v359_v18, %v358_v17  ;;  %v360_v20 = vld [vmem:[%s6736_s15 + $0x60] sm:$0xff]  ;;  %v361_v21 = vld [vmem:[%s6736_s15 + $0x68] sm:$0xff]  ;;  %v362_v23 = vld [vmem:[%s6736_s15 + $0x70] sm:$0xff]  ;;  %658 = vst.msk [vmem:[#allocation2 + $0x8] sm:$0x1] %vm657_vm4, %v6575_v9  ;;  %vm2182_vm13 = vcmask 1042432  }
  0x42   : > { %v386_v22 = vpack.c.bf16 %v361_v21, %v360_v20  ;;  %v363_v24 = vld [vmem:[%s6736_s15 + $0x78] sm:$0xff]  ;;  %v364_v26 = vld [vmem:[%s6736_s15 + $0x80] sm:$0xff]  ;;  %v365_v27 = vld [vmem:[%s6736_s15 + $0x88] sm:$0xff]  ;;  %664 = vst.msk [vmem:[#allocation2 + $0x20] sm:$0x1] %vm657_vm4, %v6575_v9  ;;  %vm2183_vm14 = vcmask 1046532  }
  0x43   : > { %v387_v25 = vpack.c.bf16 %v363_v24, %v362_v23  ;;  %v6779_v28 = vld [vmem:[%s8883_s2] ss:$0 sm:$0xff]  ;;  %v388_v30 = vpack.c.bf16 %v365_v27, %v364_v26  ;;  %v366_v42 = vld [vmem:[%s6736_s15 + $0x90] sm:$0xff]  ;;  %v367_v43 = vld [vmem:[%s6736_s15 + $0x98] sm:$0xff]  ;;  %667 = vst.msk [vmem:[#allocation2 + $0x2c] sm:$0x1] %vm657_vm4, %v6575_v9 }
  0x44   : > { %5693 = vmatmul.msk.bf16.vlgmr.msra.gmra.mxu0 %vm412_vm0, %v380_v4  ;;  %v6784_v29 = vld [vmem:[%s8884_s3] ss:$0 sm:$0xff]  ;;  %v389_v46 = vpack.c.bf16 %v367_v43, %v366_v42  ;;  %vm6806_vm3 = vmor %vm742_vm1, %vm743_vm2  ;;  %v368_v58 = vld [vmem:[%s6736_s15 + $0xa0] sm:$0xff]  ;;  %670 = vst.msk [vmem:[#allocation2 + $0x38] sm:$0x1] %vm657_vm4, %v6575_v9  ;;  %s6576_s10 = smov 16  }
  0x45   : > { %v369_v59 = vld [vmem:[%s6736_s15 + $0xa8] sm:$0xff]  ;;  %v370_v63 = vld [vmem:[%s6736_s15 + $0xb0] sm:$0xff]  ;;  %v371_v0 = vld [vmem:[%s6736_s15 + $0xb8] sm:$0xff]  ;;  %673 = vst.msk [vmem:[#allocation2 + $0x44] sm:$0x1] %vm657_vm4, %v6575_v9  ;;  %s6194_s21 = sshll.u32 %s6640_s28, 8 }
  0x46   : > { %v390_v60 = vpack.c.bf16 %v369_v59, %v368_v58  ;;  %v391_v1 = vpack.c.bf16 %v371_v0, %v370_v63  ;;  %v372_v4 = vld [vmem:[%s6736_s15 + $0xc0] sm:$0xff]  ;;  %v373_v5 = vld [vmem:[%s6736_s15 + $0xc8] sm:$0xff]  ;;  %v375_v11 = vld [vmem:[%s6736_s15 + $0xd8] sm:$0xff]  ;;  %676 = vst.msk [vmem:[#allocation2 + $0x50] sm:$0x1] %vm657_vm4, %v6575_v9  ;;  %s5564_s19 = scalar_lea.hbm %s8888_s7, %s6194_s21  ;;  %s5553_s28 = scalar_lea.sflag [#allocation5], %s6730_s20 }
  0x47   : > { %v392_v6 = vpack.c.bf16 %v373_v5, %v372_v4  ;;  %679 = vst.msk [vmem:[#allocation2 + $0x5c] sm:$0x1] %vm657_vm4, %v6575_v9  ;;  %v376_v15 = vld [vmem:[%s6736_s15 + $0xe0] sm:$0xff]  ;;  %v6153_v18 = vld [vmem:[#allocation8] sm:$0xff]  ;;  %vm1330_vm7 = vsmask.f32 7440  ;;  %vm6944_vm9 = vmand %vm657_vm4, %vm742_vm1 }
  0x48   : > { %682 = vst.msk [vmem:[#allocation2 + $0x68] sm:$0x1] %vm657_vm4, %v6575_v9  ;;  %2052 = vmatpush.bf16.msrb.mxu0 %v6153_v18  ;;  %6196 = vmatpush.bf16.msra.mxu2 %v6153_v18  ;;  %vm6923_vm8 = vmor %vm1329_vm6, %vm1330_vm7  ;;  %vm1163_vm11 = vsmask.f32 7938  ;;  %s5567_s1 = sshll.u32 %s5564_s19, 4  ;;  %s5568_s1 = int_to_ptr.hbm [resolvable:$true] %s5567_s1 }
  0x49   : > { %685 = vst.msk [vmem:[#allocation2 + $0x74] sm:$0x1] %vm657_vm4, %v6575_v9  ;;  %vm7006_vm12 = vmand %vm654_vm5, %vm1163_vm11  ;;  %s6505_s30 = sshra.s32 %s5568_s1, 4  ;;  %s6506_s30 = int_to_ptr.hbm [resolvable:$true] %s6505_s30 }
  0x4a   : > { %688 = vst.msk [vmem:[#allocation2 + $0x80] sm:$0x1] %vm657_vm4, %v6575_v9  ;;  %vm7083_vm15 = vmor %vm2182_vm13, %vm2183_vm14  ;;  %s6507_s12 = scalar_lea.hbm %s6506_s30, 256  ;;  %p6512_p11 = scmp.lt.s32.totalorder %s6506_s30, %s8888_s7 }
  0x4b   : > { %691 = vst.msk [vmem:[#allocation2 + $0x8c] sm:$0x1] %vm657_vm4, %v6575_v9  ;;  %p6508_p1 = scmp.ne.s32.totalorder %s6506_s30, %s6507_s12 }
  0x4c   : > { %694 = vst.msk [vmem:[#allocation2 + $0x98] sm:$0x1] %vm657_vm4, %v6575_v9 }
  0x4d   : > { %697 = vst.msk [vmem:[#allocation2 + $0xa4] sm:$0x1] %vm657_vm4, %v6575_v9  ;;  %p6509_p4 = pnand %p6508_p1, %p6702_p7 }
  0x4e   : > { %700 = vst.msk [vmem:[#allocation2 + $0xb0] sm:$0x1] %vm657_vm4, %v6575_v9 }
  0x4f   : > { %703 = vst.msk [vmem:[#allocation2 + $0xbc] sm:$0x1] %vm657_vm4, %v6575_v9  ;;  %p6510_p8 = pneg %p6509_p4 }
  0x50   : > { %706 = vst.msk [vmem:[#allocation2 + $0xc8] sm:$0x1] %vm657_vm4, %v6575_v9 }
  0x51   : > { %709 = vst.msk [vmem:[#allocation2 + $0xd4] sm:$0x1] %vm657_vm4, %v6575_v9 }
  0x52   : > { %659 = vst.msk [vmem:[#allocation2 + $0xc] sm:$0xf] %vm654_vm5, %v6575_v9 }
  0x53   : > { %655 = vst.msk [vmem:[#allocation2] sm:$0xf] %vm654_vm5, %v6575_v9 }
  0x54   : > { %5694 = vmatmul.msk.bf16.gmra.mxu0 %vm412_vm0, %v381_v7  ;;  %656 = vst.msk [vmem:[#allocation2 + $0x4] sm:$0xf] %vm654_vm5, %v6575_v9 }
  0x55   : > { %660 = vst.msk [vmem:[#allocation2 + $0x10] sm:$0xf] %vm654_vm5, %v6575_v9 }
  0x56   : > { %662 = vst.msk [vmem:[#allocation2 + $0x18] sm:$0xf] %vm654_vm5, %v6575_v9 }
  0x57   : > { %663 = vst.msk [vmem:[#allocation2 + $0x1c] sm:$0xf] %vm654_vm5, %v6575_v9 }
  0x58   : > { %665 = vst.msk [vmem:[#allocation2 + $0x24] sm:$0xf] %vm654_vm5, %v6575_v9 }
  0x59   : > { %666 = vst.msk [vmem:[#allocation2 + $0x28] sm:$0xf] %vm654_vm5, %v6575_v9 }
  0x5a   : > { %668 = vst.msk [vmem:[#allocation2 + $0x30] sm:$0xf] %vm654_vm5, %v6575_v9 }
  0x5b   : > { %669 = vst.msk [vmem:[#allocation2 + $0x34] sm:$0xf] %vm654_vm5, %v6575_v9  ;;  %v1280_v24 = vld [vmem:[#allocation2 + $0x4] sm:$0xf] }
  0x5c   : > { %671 = vst.msk [vmem:[#allocation2 + $0x3c] sm:$0xf] %vm654_vm5, %v6575_v9 }
  0x5d   : > { %672 = vst.msk [vmem:[#allocation2 + $0x40] sm:$0xf] %vm654_vm5, %v6575_v9 }
  0x5e   : > { %674 = vst.msk [vmem:[#allocation2 + $0x48] sm:$0xf] %vm654_vm5, %v6575_v9 }
  0x5f   : > { %675 = vst.msk [vmem:[#allocation2 + $0x4c] sm:$0xf] %vm654_vm5, %v6575_v9 }
  0x60   : > { %677 = vst.msk [vmem:[#allocation2 + $0x54] sm:$0xf] %vm654_vm5, %v6575_v9 }
  0x61   : > { %678 = vst.msk [vmem:[#allocation2 + $0x58] sm:$0xf] %vm654_vm5, %v6575_v9 }
  0x62   : > { %680 = vst.msk [vmem:[#allocation2 + $0x60] sm:$0xf] %vm654_vm5, %v6575_v9 }
  0x63   : > { %681 = vst.msk [vmem:[#allocation2 + $0x64] sm:$0xf] %vm654_vm5, %v6575_v9 }
  0x64   : > { %5695 = vmatmul.msk.bf16.gmra.mxu0 %vm412_vm0, %v382_v10  ;;  %v374_v10 = vld [vmem:[%s6736_s15 + $0xd0] sm:$0xff]  ;;  %683 = vst.msk [vmem:[#allocation2 + $0x6c] sm:$0xf] %vm654_vm5, %v6575_v9 }
  0x65   : > { %v393_v12 = vpack.c.bf16 %v375_v11, %v374_v10  ;;  %684 = vst.msk [vmem:[#allocation2 + $0x70] sm:$0xf] %vm654_vm5, %v6575_v9 }
  0x66   : > { %686 = vst.msk [vmem:[#allocation2 + $0x78] sm:$0xf] %vm654_vm5, %v6575_v9 }
  0x67   : > { %687 = vst.msk [vmem:[#allocation2 + $0x7c] sm:$0xf] %vm654_vm5, %v6575_v9 }
  0x68   : > { %689 = vst.msk [vmem:[#allocation2 + $0x84] sm:$0xf] %vm654_vm5, %v6575_v9 }
  0x69   : > { %690 = vst.msk [vmem:[#allocation2 + $0x88] sm:$0xf] %vm654_vm5, %v6575_v9 }
  0x6a   : > { %692 = vst.msk [vmem:[#allocation2 + $0x90] sm:$0xf] %vm654_vm5, %v6575_v9 }
  0x6b   : > { %693 = vst.msk [vmem:[#allocation2 + $0x94] sm:$0xf] %vm654_vm5, %v6575_v9 }
  0x6c   : > { %695 = vst.msk [vmem:[#allocation2 + $0x9c] sm:$0xf] %vm654_vm5, %v6575_v9 }
  0x6d   : > { %696 = vst.msk [vmem:[#allocation2 + $0xa0] sm:$0xf] %vm654_vm5, %v6575_v9 }
  0x6e   : > { %698 = vst.msk [vmem:[#allocation2 + $0xa8] sm:$0xf] %vm654_vm5, %v6575_v9 }
  0x6f   : > { %699 = vst.msk [vmem:[#allocation2 + $0xac] sm:$0xf] %vm654_vm5, %v6575_v9 }
  0x70   : > { %701 = vst.msk [vmem:[#allocation2 + $0xb4] sm:$0xf] %vm654_vm5, %v6575_v9 }
  0x71   : > { %702 = vst.msk [vmem:[#allocation2 + $0xb8] sm:$0xf] %vm654_vm5, %v6575_v9 }
  0x72   : > { %704 = vst.msk [vmem:[#allocation2 + $0xc0] sm:$0xf] %vm654_vm5, %v6575_v9 }
  0x73   : > { %705 = vst.msk [vmem:[#allocation2 + $0xc4] sm:$0xf] %vm654_vm5, %v6575_v9 }
  0x74   : > { %5696 = vmatmul.msk.bf16.gmra.mxu0 %vm412_vm0, %v383_v13  ;;  %707 = vst.msk [vmem:[#allocation2 + $0xcc] sm:$0xf] %vm654_vm5, %v6575_v9 }
  0x75   : > { %708 = vst.msk [vmem:[#allocation2 + $0xd0] sm:$0xf] %vm654_vm5, %v6575_v9 }
  0x84   : > { %5697 = vmatmul.msk.bf16.gmra.mxu0 %vm412_vm0, %v384_v16  ;;  %v377_v16 = vld [vmem:[%s6736_s15 + $0xe8] sm:$0xff] }
  0x85   : > { %v394_v17 = vpack.c.bf16 %v377_v16, %v376_v15 }
  0x94   : > { %5698 = vmatmul.msk.bf16.gmra.mxu0 %vm412_vm0, %v385_v19 }
  0xa4   : > { %5699 = vmatmul.msk.bf16.gmra.mxu0 %vm412_vm0, %v386_v22  ;;  %v1279_v22 = vld [vmem:[#allocation2] sm:$0xf] }
  0xa5   : > { %v1333_v26 = vshrl.u32 %v1279_v22, 16  ;;  %v1336_v27 = vshll.u32 %v1279_v22, 16 }
  0xb4   : > { %5700 = vmatmul.msk.bf16.gmra.mxu0 %vm412_vm0, %v387_v25  ;;  %v1313_v25 = vld [vmem:[#allocation2 + $0x8] sm:$0x1] }
  0xc1   : > { %v470_v31 = vpop.f32.mrf.mxu0 }
  0xc2   : > { %v554_v32 = vmul.f32 %v6779_v28, %v470_v31  ;;  %v1342_v31 = vshll.u32 %v1280_v24, 16 }
  0xc4   : > { %v590_v33 = vadd.f32 %v6784_v29, %v554_v32  ;;  %5701 = vmatmul.msk.bf16.gmra.mxu0 %vm412_vm0, %v388_v30  ;;  %v1346_v32 = vshrl.u32 %v1280_v24, 16 }
  0xc6   : > { %v6789_v34 = vmax.f32 %v590_v33, 0.0  ;;  %v1348_v42 = vrot.slane %v1346_v32, 4 }
  0xc8   : > { %8929 = vst [vmem:[#allocation16_spill] sm:$0xff] %v6789_v34  ;;  %v710_v35 = vpack.c.bf16 %v6789_v34, %v6789_v34 }
  0xc9   : > { %v472_v36 = vpop.f32.mrf.mxu0 }
  0xca   : > { %v555_v37 = vmul.f32 %v6779_v28, %v472_v36  ;;  %v746_v38 = vshrl.u32 %v710_v35, 16  ;;  %v749_v41 = vshll.u32 %v710_v35, 16  ;;  %v1335_v35 = vrot.slane %v1333_v26, 4 }
  0xcb   : > { %v1338_v36 = vrot.slane %v1336_v27, 5 }
  0xcc   : > { %v591_v39 = vadd.f32 %v6784_v29, %v555_v37  ;;  %v748_v40 = vrot.slane %v746_v38, 7  ;;  %v1352_v37 = vshll.u32 %v1313_v25, 16 }
  0xce   : > { %v6797_v44 = vmax.f32 %v591_v39, 0.0  ;;  %v751_v45 = vor.u32 %v749_v41, %v748_v40  ;;  %v752_v53 = vrot.slane %v748_v40, 4  ;;  %v1339_v40 = vor.u32 %v1338_v36, %v1335_v35 }
  0xcf   : > { %v1344_v41 = vrot.slane %v1342_v31, 5 }
  0xd0   : > { %8930 = vst [vmem:[#allocation17_spill] sm:$0xff] %v6797_v44  ;;  %1017 = vrot.lane.b32.xlu1 %v751_v45, %s6574_s13  ;;  %v711_v47 = vpack.c.bf16 %v6797_v44, %v6797_v44 }
  0xd1   : > { %v6802_v48 = vpop.f32.mrf.mxu0 }
  0xd2   : > { %v754_v49 = vshrl.u32 %v711_v47, 16  ;;  %v757_v51 = vshll.u32 %v711_v47, 16  ;;  %v6154_v47 = vld [vmem:[#allocation8 + $0x8] sm:$0xff] }
  0xd3   : > { %1829 = vmatpush.bf16.msra.mxu1 %v6154_v47  ;;  %6195 = vmatpush.bf16.msra.mxu3 %v6154_v47 }
  0xd4   : > { %5702 = vmatmul.msk.bf16.gmra.mxu0 %vm412_vm0, %v389_v46  ;;  %v756_v50 = vrot.slane %v754_v49, 7 }
  0xd6   : > { %v761_v54 = vrot.slane %v756_v50, 4  ;;  %v759_v55 = vor.u32 %v757_v51, %v756_v50  ;;  %v378_v50 = vld [vmem:[%s6736_s15 + $0xf0] sm:$0xff]  ;;  %v379_v51 = vld [vmem:[%s6736_s15 + $0xf8] sm:$0xff] }
  0xd7   : > { %v395_v4 = vpack.c.bf16 %v379_v51, %v378_v50 }
  0xd8   : > { %1021 = vrot.lane.b32.xlu2 %v761_v54, %s6574_s13  ;;  %v760_v56 = vsel %vm6806_vm3, %v752_v53, %v759_v55  ;;  %v1340_v53 = vrot.slane %v1339_v40, 4  ;;  %v1349_v54 = vor.u32 %v1348_v42, %v1344_v41  ;;  %v1354_v55 = vrot.slane %v1352_v37, 5 }
  0xd9   : > { %1019 = vrot.lane.b32.xlu1 %v760_v56, %s6574_s13  ;;  %v6814_v57 = vpop.f32.mrf.mxu0 }
  0xda   : > { %v1345_v59 = vsel %vm6923_vm8, %v1340_v53, %v1344_v41  ;;  %v557_v36 = vmul.f32 %v6779_v28, %v6814_v57  ;;  %v1165_v41 = vld [vmem:[#allocation2 + $0xc] sm:$0xf]  ;;  %v6137_v57 = vld [vmem:[#allocation2] sm:$0xff] }
  0xdb   : > { %v1719_v5 = vunpack.c.l.b16 %v1345_v59 }
  0xe1   : > { %v6818_v61 = vpop.f32.mrf.mxu0 }
  0xe4   : > { %5703 = vmatmul.msk.bf16.gmra.mxu0 %vm412_vm0, %v390_v60  ;;  %v1350_v60 = vrot.slane %v1349_v54, 4 }
  0xe6   : > { %v1355_v10 = vsel %vm6923_vm8, %v1350_v60, %v1354_v55 }
  0xe7   : > { %v1720_v16 = vunpack.c.l.b16 %v1355_v10 }
  0xe9   : > { %v6821_v62 = vpop.f32.mrf.mxu0 }
  0xf1   : > { %v6825_v2 = vpop.f32.mrf.mxu0 }
  0xf4   : > { %5704 = vmatmul.msk.bf16.gmra.mxu0 %vm412_vm0, %v391_v1  ;;  %v1171_v1 = vld [vmem:[#allocation2 + $0x14] sm:$0x1] }
  0xf9   : > { %v6828_v3 = vpop.f32.mrf.mxu0 }
 0x101   : > { %v6832_v7 = vpop.f32.mrf.mxu0 }
 0x104   : > { %5705 = vmatmul.msk.bf16.gmra.mxu0 %vm412_vm0, %v392_v6 }
 0x109   : > { %v6835_v8 = vpop.f32.mrf.mxu0 }
 0x111   : > { %v6851_v13 = vpop.f32.mrf.mxu0 }
 0x114   : > { %5706 = vmatmul.msk.bf16.gmra.mxu0 %vm412_vm0, %v393_v12 }
 0x119   : > { %v6870_v14 = vpop.f32.mrf.mxu0 }
 0x121   : > { %v500_v19 = vpop.f32.mrf.mxu0 }
 0x122   : > { %v566_v20 = vmul.f32 %v6779_v28, %v500_v19 }
 0x124   : > { %v602_v21 = vadd.f32 %v6784_v29, %v566_v20  ;;  %5707 = vmatmul.msk.bf16.gmra.mxu0 %vm412_vm0, %v394_v17 }
 0x126   : > { %v6903_v23 = vmax.f32 %v602_v21, 0.0  ;;  %v1751_v21 = vpack.c.b16 %v1720_v16, %v1719_v5 }
 0x128   : > { %8933 = vst [vmem:[#allocation18_spill] sm:$0xff] %v6903_v23  ;;  %v722_v30 = vpack.c.bf16 %v6903_v23, %v6903_v23  ;;  %5713 = vmatmul.msk.bf16.vlgmr.msra.gmra.mxu1 %vm1773_vm10, %v1751_v21 }
 0x129   : > { %v502_v33 = vpop.f32.mrf.mxu0 }
 0x12a   : > { %v567_v38 = vmul.f32 %v6779_v28, %v502_v33  ;;  %v848_v39 = vshrl.u32 %v722_v30, 16  ;;  %v851_v46 = vshll.u32 %v722_v30, 16 }
 0x12c   : > { %v603_v43 = vadd.f32 %v6784_v29, %v567_v38  ;;  %v850_v45 = vrot.slane %v848_v39, 7  ;;  %v556_v39 = vmul.f32 %v6779_v28, %v6802_v48 }
 0x12e   : > { %v6931_v56 = vmax.f32 %v603_v43, 0.0  ;;  %v853_v58 = vor.u32 %v851_v46, %v850_v45  ;;  %v854_v22 = vrot.slane %v850_v45, 4  ;;  %v593_v43 = vadd.f32 %v6784_v29, %v557_v36 }
 0x12f   : > { %v592_v50 = vadd.f32 %v6784_v29, %v556_v39 }
 0x130   : > { %8936 = vst [vmem:[#allocation19_spill] sm:$0xff] %v6931_v56  ;;  %v723_v63 = vpack.c.bf16 %v6931_v56, %v6931_v56  ;;  %1053 = vrot.lane.b32.xlu0 %v853_v58, %s6574_s13  ;;  %v7024_v53 = vmax.f32 %v593_v43, 0.0 }
 0x131   : > { %v505_v6 = vpop.f32.mrf.mxu0  ;;  %v7030_v55 = vmax.f32 %v592_v50, 0.0 }
 0x132   : > { %v856_v11 = vshrl.u32 %v723_v63, 16  ;;  %v568_v12 = vmul.f32 %v6779_v28, %v505_v6  ;;  %v1022_v15 = vpop.permute.xlu2 %1021  ;;  %v859_v20 = vshll.u32 %v723_v63, 16  ;;  %8943 = vst [vmem:[#allocation22_spill] sm:$0xff] %v7024_v53  ;;  %v7036_v60 = vpack.c.bf16 %v7024_v53, %v7024_v53 }
 0x133   : > { %v1172_v17 = vsel %vm6944_vm9, %v1022_v15, %v1171_v1  ;;  %8945 = vst [vmem:[#allocation24_spill] sm:$0xff] %v7030_v55  ;;  %v7041_v10 = vpack.c.bf16 %v7030_v55, %v7030_v55 }
 0x134   : > { %v604_v18 = vadd.f32 %v6784_v29, %v568_v12  ;;  %1173 = vst [vmem:[#allocation2 + $0x14] sm:$0x1] %v1172_v17  ;;  %5708 = vmatmul.msk.bf16.gmra.mxu0 %vm412_vm0, %v395_v4  ;;  %v6963_v19 = vrot.slane %v856_v11, 7 }
 0x135   : > { %v766_v36 = vshll.u32 %v7041_v10, 16 }
 0x136   : > { %v6967_v24 = vmax.f32 %v604_v18, 0.0  ;;  %v861_v25 = vor.u32 %v859_v20, %v6963_v19  ;;  %v771_v18 = vshrl.u32 %v7036_v60, 16 }
 0x138   : > { %8939 = vst [vmem:[#allocation20_spill] sm:$0xff] %v6967_v24  ;;  %v724_v26 = vpack.c.bf16 %v6967_v24, %v6967_v24  ;;  %v862_v27 = vsel %vm6806_vm3, %v854_v22, %v861_v25  ;;  %v559_v22 = vmul.f32 %v6779_v28, %v6821_v62  ;;  %v7060_v39 = vrot.slane %v771_v18, 7 }
 0x139   : > { %1055 = vrot.lane.b32.xlu0 %v862_v27, %s6574_s13  ;;  %v507_v30 = vpop.f32.mrf.mxu0 }
 0x13a   : > { %v865_v31 = vshrl.u32 %v724_v26, 16  ;;  %v569_v32 = vmul.f32 %v6779_v28, %v507_v30  ;;  %v868_v35 = vshll.u32 %v724_v26, 16  ;;  %v763_v26 = vshrl.u32 %v7041_v10, 16 }
 0x13b   : > { %v1314_v50 = vld [vmem:[#allocation2 + $0x14] sm:$0x1]  ;;  %v774_v10 = vshll.u32 %v7036_v60, 16 }
 0x13c   : > { %v6989_v33 = vrot.slane %v865_v31, 7  ;;  %v605_v38 = vadd.f32 %v6784_v29, %v569_v32 }
 0x13d   : > { %v776_v60 = vor.u32 %v774_v10, %v7060_v39 }
 0x13e   : > { %v870_v37 = vor.u32 %v868_v35, %v6989_v33  ;;  %v7017_v46 = vmax.f32 %v605_v38, 0.0 }
 0x140   : > { %8942 = vst [vmem:[#allocation21_spill] sm:$0xff] %v7017_v46  ;;  %v725_v54 = vpack.c.bf16 %v7017_v46, %v7017_v46 }
 0x141   : > { %1059 = vrot.lane.b32.xlu0 %v870_v37, %s6574_s13  ;;  %v510_v42 = vpop.f32.mrf.mxu0  ;;  %v558_v37 = vmul.f32 %v6779_v28, %v6818_v61  ;;  %v871_v61 = vrot.slane %v6989_v33, 4 }
 0x142   : > { %v570_v48 = vmul.f32 %v6779_v28, %v510_v42  ;;  %v1018_v45 = vpop.permute.xlu1 %1017  ;;  %v873_v4 = vshrl.u32 %v725_v54, 16  ;;  %v876_v31 = vshll.u32 %v725_v54, 16 }
 0x143   : > { %v1166_v47 = vsel %vm7006_vm12, %v1018_v45, %v1165_v41  ;;  %v595_v41 = vadd.f32 %v6784_v29, %v559_v22  ;;  %v594_v18 = vadd.f32 %v6784_v29, %v558_v37  ;;  %v2197_v37 = vrot.slane %v1314_v50, 5 }
 0x144   : > { %v606_v51 = vadd.f32 %v6784_v29, %v570_v48  ;;  %1167 = vst [vmem:[#allocation2 + $0xc] sm:$0xf] %v1166_v47  ;;  %5797 = vmatmul.msk.bf16.vlgmr.msrb.gmra.mxu0 %vm1773_vm10, %v6137_v57  ;;  %v7050_v25 = vrot.slane %v873_v4, 7 }
 0x146   : > { %v7026_v9 = vmax.f32 %v606_v51, 0.0  ;;  %v878_v42 = vor.u32 %v876_v31, %v7050_v25 }
 0x148   : > { %8944 = vst [vmem:[#allocation23_spill] sm:$0xff] %v7026_v9  ;;  %v726_v58 = vpack.c.bf16 %v7026_v9, %v7026_v9 }
 0x149   : > { %v512_v59 = vpop.f32.mrf.mxu0 }
 0x14a   : > { %v571_v63 = vmul.f32 %v6779_v28, %v512_v59  ;;  %v882_v1 = vshrl.u32 %v726_v58, 16  ;;  %v885_v15 = vshll.u32 %v726_v58, 16 }
 0x14b   : > { %v1020_v5 = vpop.permute.xlu1 %1019  ;;  %v1281_v6 = vld [vmem:[#allocation2 + $0xc] sm:$0xf] }
 0x14c   : > { %v607_v11 = vadd.f32 %v6784_v29, %v571_v63  ;;  %1168 = vst.msk [vmem:[#allocation2 + $0x10] sm:$0xf] %vm654_vm5, %v1020_v5  ;;  %v884_v12 = vrot.slane %v882_v1, 7  ;;  %v1357_v16 = vshrl.u32 %v1281_v6, 16  ;;  %v1360_v17 = vshll.u32 %v1281_v6, 16 }
 0x14d   : > { %v879_v6 = vsel %vm6806_vm3, %v871_v61, %v878_v42 }
 0x14e   : > { %v7046_v20 = vmax.f32 %v607_v11, 0.0  ;;  %v887_v21 = vor.u32 %v885_v15, %v884_v12  ;;  %v1359_v32 = vrot.slane %v1357_v16, 4  ;;  %v1362_v35 = vrot.slane %v1360_v17, 5  ;;  %v2135_v16 = vld [vmem:[#allocation2 + $0xc] sm:$0xe] }
 0x14f   : > { %v888_v58 = vrot.slane %v884_v12, 4  ;;  %v1376_v15 = vshll.u32 %v1314_v50, 16  ;;  %v765_v17 = vrot.slane %v763_v26, 7 }
 0x150   : > { %8946 = vst [vmem:[#allocation25_spill] sm:$0xff] %v7046_v20  ;;  %v727_v27 = vpack.c.bf16 %v7046_v20, %v7046_v20  ;;  %1065 = vrot.lane.b32.xlu2 %v887_v21, %s6574_s13  ;;  %v1363_v59 = vor.u32 %v1362_v35, %v1359_v32  ;;  %v7077_v21 = vmax.f32 %v595_v41, 0.0  ;;  %v5814_v35 = vrot.slane %v2135_v16, 9 }
 0x151   : > { %v515_v30 = vpop.f32.mrf.mxu0  ;;  %v1378_v41 = vrot.slane %v1376_v15, 5 }
 0x152   : > { %v572_v62 = vmul.f32 %v6779_v28, %v515_v30  ;;  %v890_v38 = vshrl.u32 %v727_v27, 16  ;;  %v893_v43 = vshll.u32 %v727_v27, 16  ;;  %8948 = vst [vmem:[#allocation27_spill] sm:$0xff] %v7077_v21  ;;  %v1364_v27 = vrot.slane %v1363_v59, 4 }
 0x153   : > { %v6138_v57 = vld [vmem:[#allocation2 + $0xc] sm:$0xff] }
 0x154   : > { %v1282_v48 = vld [vmem:[#allocation2 + $0x10] sm:$0xf]  ;;  %v608_v45 = vadd.f32 %v6784_v29, %v572_v62  ;;  %v892_v47 = vrot.slane %v890_v38, 7  ;;  %5798 = vmatmul.msk.bf16.gmra.mxu0 %vm1773_vm10, %v6138_v57 }
 0x155   : > { %v1366_v51 = vshll.u32 %v1282_v48, 16  ;;  %v1370_v54 = vshrl.u32 %v1282_v48, 16  ;;  %v2194_v12 = vrot.slane %v1282_v48, 5  ;;  %v768_v48 = vor.u32 %v766_v36, %v765_v17 }
 0x156   : > { %v7067_v63 = vmax.f32 %v608_v45, 0.0  ;;  %v897_v1 = vrot.slane %v892_v47, 4  ;;  %v895_v4 = vor.u32 %v893_v43, %v892_v47  ;;  %v769_v43 = vrot.slane %v765_v17, 4 }
 0x157   : > { %v1368_v5 = vrot.slane %v1366_v51, 5  ;;  %v1372_v11 = vrot.slane %v1370_v54, 4  ;;  %v2196_v57 = vrot.slane %v2194_v12, 4  ;;  %v2195_v45 = vsel %vm7083_vm15, %v5814_v35, %v2194_v12 }
 0x158   : > { %8947 = vst [vmem:[#allocation26_spill] sm:$0xff] %v7067_v63  ;;  %1061 = vrot.lane.b32.xlu2 %v879_v6, %s6574_s13  ;;  %1069 = vrot.lane.b32.xlu0 %v897_v1, %s6574_s13  ;;  %v896_v33 = vsel %vm6806_vm3, %v888_v58, %v895_v4  ;;  %v728_v31 = vpack.c.bf16 %v7067_v63, %v7067_v63  ;;  %v7095_v47 = vmax.f32 %v594_v18, 0.0  ;;  %v778_v51 = vrot.slane %v7060_v39, 4 }
 0x159   : > { %1067 = vrot.lane.b32.xlu1 %v896_v33, %s6574_s13  ;;  %v517_v22 = vpop.f32.mrf.mxu0  ;;  %v1373_v30 = vor.u32 %v1372_v11, %v1368_v5  ;;  %v1369_v62 = vsel %vm6923_vm8, %v1364_v27, %v1368_v5  ;;  %v2198_v54 = vsel %vm7083_vm15, %v2196_v57, %v2197_v37  ;;  %v715_v36 = vpack.c.bf16 %v7077_v21, %v7077_v21 }
 0x15a   : > { %v573_v32 = vmul.f32 %v6779_v28, %v517_v22  ;;  %8951 = vst [vmem:[#allocation28_spill] sm:$0xff] %v7095_v47  ;;  %v1721_v58 = vunpack.c.l.b16 %v1369_v62  ;;  %v899_v1 = vshrl.u32 %v728_v31, 16  ;;  %v777_v4 = vsel %vm6806_vm3, %v769_v43, %v776_v60 }
 0x15b   : > { %v1374_v38 = vrot.slane %v1373_v30, 4  ;;  %v2302_v5 = vunpack.c.l.b16 %v2195_v45  ;;  %v2303_v6 = vunpack.c.l.b16 %v2198_v54  ;;  %v714_v11 = vpack.c.bf16 %v7095_v47, %v7095_v47 }
 0x15c   : > { %v609_v42 = vadd.f32 %v6784_v29, %v573_v32  ;;  %v901_v33 = vrot.slane %v899_v1, 7  ;;  %v902_v12 = vshll.u32 %v728_v31, 16  ;;  %v788_v22 = vshrl.u32 %v715_v36, 16 }
 0x15d   : > { %v1379_v50 = vsel %vm6923_vm8, %v1374_v38, %v1378_v41  ;;  %v7115_v16 = vpack.c.b16 %v2303_v6, %v2302_v5  ;;  %v561_v60 = vmul.f32 %v6779_v28, %v6828_v3  ;;  %v560_v35 = vmul.f32 %v6779_v28, %v6825_v2 }
 0x15e   : > { %v7102_v61 = vmax.f32 %v609_v42, 0.0  ;;  %v1722_v59 = vunpack.c.l.b16 %v1379_v50  ;;  %v780_v37 = vshrl.u32 %v714_v11, 16  ;;  %v905_v41 = vrot.slane %v901_v33, 4 }
 0x15f   : > { %v904_v42 = vor.u32 %v902_v12, %v901_v33  ;;  %v597_v31 = vadd.f32 %v6784_v29, %v561_v60  ;;  %v790_v43 = vrot.slane %v788_v22, 7  ;;  %v791_v54 = vshll.u32 %v715_v36, 16 }
 0x160   : > { %8952 = vst [vmem:[#allocation29_spill] sm:$0xff] %v7102_v61  ;;  %v729_v39 = vpack.c.bf16 %v7102_v61, %v7102_v61  ;;  %1025 = vrot.lane.b32.xlu2 %v777_v4, %s6574_s13  ;;  %1027 = vrot.lane.b32.xlu0 %v778_v51, %s6574_s13  ;;  %v1752_v10 = vpack.c.b16 %v1722_v59, %v1721_v58  ;;  %v782_v50 = vrot.slane %v780_v37, 7  ;;  %v783_v5 = vshll.u32 %v714_v11, 16 }
 0x161   : > { %1023 = vrot.lane.b32.xlu1 %v768_v48, %s6574_s13  ;;  %v520_v15 = vpop.f32.mrf.mxu0  ;;  %v596_v48 = vadd.f32 %v6784_v29, %v560_v35  ;;  %v7136_v58 = vmax.f32 %v597_v31, 0.0  ;;  %v793_v1 = vor.u32 %v791_v54, %v790_v43 }
 0x162   : > { %5714 = vmatmul.msk.bf16.gmra.mxu1 %vm1773_vm10, %v1752_v10  ;;  %v574_v17 = vmul.f32 %v6779_v28, %v520_v15  ;;  %v907_v18 = vshrl.u32 %v729_v39, 16  ;;  %v910_v32 = vshll.u32 %v729_v39, 16  ;;  %v795_v39 = vrot.slane %v790_v43, 4 }
 0x163   : > { %8954 = vst [vmem:[#allocation31_spill] sm:$0xff] %v7136_v58  ;;  %v7139_v4 = vmax.f32 %v596_v48, 0.0  ;;  %v786_v10 = vrot.slane %v782_v50, 4 }
 0x164   : > { %v610_v27 = vadd.f32 %v6784_v29, %v574_v17  ;;  %v909_v30 = vrot.slane %v907_v18, 7  ;;  %v785_v17 = vor.u32 %v783_v5, %v782_v50  ;;  %v717_v18 = vpack.c.bf16 %v7136_v58, %v7136_v58 }
 0x165   : > { %8955 = vst [vmem:[#allocation32_spill] sm:$0xff] %v7139_v4  ;;  %v794_v33 = vsel %vm6806_vm3, %v786_v10, %v793_v1  ;;  %v716_v11 = vpack.c.bf16 %v7139_v4, %v7139_v4 }
 0x166   : > { %v7124_v62 = vmax.f32 %v610_v27, 0.0  ;;  %v914_v38 = vrot.slane %v909_v30, 4  ;;  %v912_v57 = vor.u32 %v910_v32, %v909_v30  ;;  %v563_v30 = vmul.f32 %v6779_v28, %v6835_v8 }
 0x167   : > { %v808_v5 = vshll.u32 %v717_v18, 16 }
 0x168   : > { %8953 = vst [vmem:[#allocation30_spill] sm:$0xff] %v7124_v62  ;;  %1075 = vrot.lane.b32.xlu0 %v914_v38, %s6574_s13  ;;  %v913_v3 = vsel %vm6806_vm3, %v905_v41, %v912_v57  ;;  %v730_v45 = vpack.c.bf16 %v7124_v62, %v7124_v62  ;;  %v805_v41 = vshrl.u32 %v717_v18, 16  ;;  %v562_v57 = vmul.f32 %v6779_v28, %v6832_v7 }
 0x169   : > { %1071 = vrot.lane.b32.xlu1 %v904_v42, %s6574_s13  ;;  %1073 = vrot.lane.b32.xlu2 %v913_v3, %s6574_s13  ;;  %v522_v2 = vpop.f32.mrf.mxu0  ;;  %v797_v42 = vshrl.u32 %v716_v11, 16 }
 0x16a   : > { %v575_v51 = vmul.f32 %v6779_v28, %v522_v2  ;;  %v916_v15 = vshrl.u32 %v730_v45, 16  ;;  %v919_v32 = vshll.u32 %v730_v45, 16  ;;  %v599_v2 = vadd.f32 %v6784_v29, %v563_v30 }
 0x16b   : > { %v807_v45 = vrot.slane %v805_v41, 7  ;;  %v598_v50 = vadd.f32 %v6784_v29, %v562_v57  ;;  %v799_v1 = vrot.slane %v797_v42, 7 }
 0x16c   : > { %v611_v59 = vadd.f32 %v6784_v29, %v575_v51  ;;  %v918_v27 = vrot.slane %v916_v15, 7 }
 0x16d   : > { %v810_v15 = vor.u32 %v808_v5, %v807_v45 }
 0x16e   : > { %v7141_v6 = vmax.f32 %v611_v59, 0.0  ;;  %v922_v43 = vrot.slane %v918_v27, 4  ;;  %v921_v51 = vor.u32 %v919_v32, %v918_v27 }
 0x170   : > { %8956 = vst [vmem:[#allocation33_spill] sm:$0xff] %v7141_v6  ;;  %v731_v36 = vpack.c.bf16 %v7141_v6, %v7141_v6  ;;  %1033 = vrot.lane.b32.xlu0 %v795_v39, %s6574_s13  ;;  %v7172_v39 = vmax.f32 %v599_v2, 0.0 }
 0x171   : > { %1029 = vrot.lane.b32.xlu1 %v785_v17, %s6574_s13  ;;  %1031 = vrot.lane.b32.xlu2 %v794_v33, %s6574_s13  ;;  %v525_v12 = vpop.f32.mrf.mxu0  ;;  %v7175_v17 = vmax.f32 %v598_v50, 0.0 }
 0x172   : > { %v576_v22 = vmul.f32 %v6779_v28, %v525_v12  ;;  %v924_v60 = vshrl.u32 %v731_v36, 16  ;;  %v927_v38 = vshll.u32 %v731_v36, 16  ;;  %8958 = vst [vmem:[#allocation35_spill] sm:$0xff] %v7172_v39  ;;  %v800_v36 = vshll.u32 %v716_v11, 16 }
 0x173   : > { %8959 = vst [vmem:[#allocation36_spill] sm:$0xff] %v7175_v17  ;;  %v812_v12 = vrot.slane %v807_v45, 4  ;;  %v719_v27 = vpack.c.bf16 %v7172_v39, %v7172_v39  ;;  %v718_v11 = vpack.c.bf16 %v7175_v17, %v7175_v17 }
 0x174   : > { %v612_v35 = vadd.f32 %v6784_v29, %v576_v22  ;;  %v926_v37 = vrot.slane %v924_v60, 7  ;;  %v803_v22 = vrot.slane %v799_v1, 4  ;;  %v802_v30 = vor.u32 %v800_v36, %v799_v1 }
 0x175   : > { %v822_v42 = vshrl.u32 %v719_v27, 16 }
 0x176   : > { %v7160_v31 = vmax.f32 %v612_v35, 0.0  ;;  %v931_v3 = vrot.slane %v926_v37, 4  ;;  %v929_v48 = vor.u32 %v927_v38, %v926_v37  ;;  %v811_v32 = vsel %vm6806_vm3, %v803_v22, %v810_v15 }
 0x177   : > { %v824_v5 = vrot.slane %v822_v42, 7  ;;  %v825_v22 = vshll.u32 %v719_v27, 16 }
 0x178   : > { %8957 = vst [vmem:[#allocation34_spill] sm:$0xff] %v7160_v31  ;;  %1081 = vrot.lane.b32.xlu0 %v931_v3, %s6574_s13  ;;  %v930_v8 = vsel %vm6806_vm3, %v922_v43, %v929_v48  ;;  %v732_v54 = vpack.c.bf16 %v7160_v31, %v7160_v31  ;;  %v565_v3 = vmul.f32 %v6779_v28, %v6870_v14  ;;  %v1185_v31 = vld [vmem:[#allocation2 + $0x2c] sm:$0x1] }
 0x179   : > { %1077 = vrot.lane.b32.xlu1 %v921_v51, %s6574_s13  ;;  %1079 = vrot.lane.b32.xlu2 %v930_v8, %s6574_s13  ;;  %v527_v7 = vpop.f32.mrf.mxu0  ;;  %v564_v51 = vmul.f32 %v6779_v28, %v6851_v13  ;;  %v814_v8 = vshrl.u32 %v718_v11, 16 }
 0x17a   : > { %v577_v59 = vmul.f32 %v6779_v28, %v527_v7  ;;  %v933_v60 = vshrl.u32 %v732_v54, 16  ;;  %v936_v57 = vshll.u32 %v732_v54, 16  ;;  %v601_v54 = vadd.f32 %v6784_v29, %v565_v3 }
 0x17c   : > { %v613_v10 = vadd.f32 %v6784_v29, %v577_v59  ;;  %v935_v41 = vrot.slane %v933_v60, 7  ;;  %v7208_v60 = vmax.f32 %v601_v54, 0.0 }
 0x17e   : > { %v7177_v33 = vmax.f32 %v613_v10, 0.0  ;;  %v939_v7 = vrot.slane %v935_v41, 4  ;;  %v938_v1 = vor.u32 %v936_v57, %v935_v41  ;;  %v600_v10 = vadd.f32 %v6784_v29, %v564_v51  ;;  %8962 = vst [vmem:[#allocation39_spill] sm:$0xff] %v7208_v60 }
 0x17f   : > { %v721_v3 = vpack.c.bf16 %v7208_v60, %v7208_v60 }
 0x180   : > { %8960 = vst [vmem:[#allocation37_spill] sm:$0xff] %v7177_v33  ;;  %v733_v18 = vpack.c.bf16 %v7177_v33, %v7177_v33  ;;  %1039 = vrot.lane.b32.xlu0 %v812_v12, %s6574_s13  ;;  %v816_v12 = vrot.slane %v814_v8, 7 }
 0x181   : > { %1035 = vrot.lane.b32.xlu1 %v802_v30, %s6574_s13  ;;  %1037 = vrot.lane.b32.xlu2 %v811_v32, %s6574_s13  ;;  %v530_v35 = vpop.f32.mrf.mxu0  ;;  %v7211_v32 = vmax.f32 %v600_v10, 0.0  ;;  %v839_v54 = vshrl.u32 %v721_v3, 16 }
 0x182   : > { %v578_v37 = vmul.f32 %v6779_v28, %v530_v35  ;;  %v941_v38 = vshrl.u32 %v733_v18, 16  ;;  %v944_v2 = vshll.u32 %v733_v18, 16  ;;  %v827_v18 = vor.u32 %v825_v22, %v824_v5 }
 0x183   : > { %8963 = vst [vmem:[#allocation40_spill] sm:$0xff] %v7211_v32  ;;  %v817_v35 = vshll.u32 %v718_v11, 16  ;;  %v820_v41 = vrot.slane %v816_v12, 4  ;;  %v720_v11 = vpack.c.bf16 %v7211_v32, %v7211_v32 }
 0x184   : > { %v614_v43 = vadd.f32 %v6784_v29, %v578_v37  ;;  %v943_v48 = vrot.slane %v941_v38, 7  ;;  %v829_v38 = vrot.slane %v824_v5, 4 }
 0x185   : > { %v819_v42 = vor.u32 %v817_v35, %v816_v12 }
 0x186   : > { %v7196_v45 = vmax.f32 %v614_v43, 0.0  ;;  %v948_v50 = vrot.slane %v943_v48, 4  ;;  %v946_v59 = vor.u32 %v944_v2, %v943_v48  ;;  %v828_v43 = vsel %vm6806_vm3, %v820_v41, %v827_v18 }
 0x187   : > { %v842_v41 = vshll.u32 %v721_v3, 16 }
 0x188   : > { %8961 = vst [vmem:[#allocation38_spill] sm:$0xff] %v7196_v45  ;;  %1087 = vrot.lane.b32.xlu0 %v948_v50, %s6574_s13  ;;  %v947_v14 = vsel %vm6806_vm3, %v939_v7, %v946_v59  ;;  %v734_v15 = vpack.c.bf16 %v7196_v45, %v7196_v45 }
 0x189   : > { %1083 = vrot.lane.b32.xlu1 %v938_v1, %s6574_s13  ;;  %1085 = vrot.lane.b32.xlu2 %v947_v14, %s6574_s13  ;;  %v532_v13 = vpop.f32.mrf.mxu0  ;;  %v831_v14 = vshrl.u32 %v720_v11, 16 }
 0x18a   : > { %v579_v36 = vmul.f32 %v6779_v28, %v532_v13  ;;  %v950_v57 = vshrl.u32 %v734_v15, 16  ;;  %v953_v50 = vshll.u32 %v734_v15, 16 }
 0x18c   : > { %v615_v30 = vadd.f32 %v6784_v29, %v579_v36  ;;  %v952_v8 = vrot.slane %v950_v57, 7 }
 0x18e   : > { %v7213_v37 = vmax.f32 %v615_v30, 0.0  ;;  %v956_v13 = vrot.slane %v952_v8, 4  ;;  %v955_v12 = vor.u32 %v953_v50, %v952_v8  ;;  %v841_v30 = vrot.slane %v839_v54, 7 }
 0x190   : > { %8964 = vst [vmem:[#allocation41_spill] sm:$0xff] %v7213_v37  ;;  %v735_v27 = vpack.c.bf16 %v7213_v37, %v7213_v37  ;;  %1045 = vrot.lane.b32.xlu0 %v829_v38, %s6574_s13  ;;  %v833_v38 = vrot.slane %v831_v14, 7 }
 0x191   : > { %1041 = vrot.lane.b32.xlu1 %v819_v42, %s6574_s13  ;;  %1043 = vrot.lane.b32.xlu2 %v828_v43, %s6574_s13  ;;  %v535_v48 = vpop.f32.mrf.mxu0  ;;  %v844_v42 = vor.u32 %v842_v41, %v841_v30  ;;  %v6173_v41 = vld [vmem:[#allocation8 + $0x20] sm:$0xff] }
 0x192   : > { %v580_v2 = vmul.f32 %v6779_v28, %v535_v48  ;;  %v958_v51 = vshrl.u32 %v735_v27, 16  ;;  %v961_v1 = vshll.u32 %v735_v27, 16  ;;  %v834_v27 = vshll.u32 %v720_v11, 16  ;;  %3357 = vmatpush.bf16.msrb.mxu2 %v6173_v41 }
 0x193   : > { %v846_v48 = vrot.slane %v841_v30, 4 }
 0x194   : > { %v616_v7 = vadd.f32 %v6784_v29, %v580_v2  ;;  %v960_v59 = vrot.slane %v958_v51, 7  ;;  %v837_v2 = vrot.slane %v833_v38, 4  ;;  %v836_v8 = vor.u32 %v834_v27, %v833_v38  ;;  %v6287_v27 = vld [vmem:[%s8883_s2] ss:$0 sm:$0xff] }
 0x196   : > { %v7228_v5 = vmax.f32 %v616_v7, 0.0  ;;  %v965_v10 = vrot.slane %v960_v59, 4  ;;  %v963_v36 = vor.u32 %v961_v1, %v960_v59  ;;  %v845_v7 = vsel %vm6806_vm3, %v837_v2, %v844_v42  ;;  %v1209_v59 = vld [vmem:[#allocation2 + $0x54] sm:$0xf]  ;;  %v1223_v42 = vld [vmem:[#allocation2 + $0x6c] sm:$0xf] }
 0x198   : > { %8965 = vst [vmem:[#allocation42_spill] sm:$0xff] %v7228_v5  ;;  %1093 = vrot.lane.b32.xlu0 %v965_v10, %s6574_s13  ;;  %v964_v22 = vsel %vm6806_vm3, %v956_v13, %v963_v36  ;;  %v736_v18 = vpack.c.bf16 %v7228_v5, %v7228_v5 }
 0x199   : > { %1089 = vrot.lane.b32.xlu1 %v955_v12, %s6574_s13  ;;  %1091 = vrot.lane.b32.xlu2 %v964_v22, %s6574_s13  ;;  %v537_v15 = vpop.f32.mrf.mxu0 }
 0x19a   : > { %v581_v35 = vmul.f32 %v6779_v28, %v537_v15  ;;  %v967_v51 = vshrl.u32 %v736_v18, 16  ;;  %v970_v13 = vshll.u32 %v736_v18, 16 }
 0x19c   : > { %v617_v57 = vadd.f32 %v6784_v29, %v581_v35  ;;  %v969_v14 = vrot.slane %v967_v51, 7 }
 0x19e   : > { %v7239_v43 = vmax.f32 %v617_v57, 0.0  ;;  %v973_v35 = vrot.slane %v969_v14, 4  ;;  %v972_v57 = vor.u32 %v970_v13, %v969_v14  ;;  %v6172_v14 = vld [vmem:[#allocation8 + $0x18] sm:$0xff] }
 0x19f   : > { %2699 = vmatpush.bf16.msrb.mxu1 %v6172_v14 }
 0x1a0   : > { %8966 = vst [vmem:[#allocation43_spill] sm:$0xff] %v7239_v43  ;;  %v737_v50 = vpack.c.bf16 %v7239_v43, %v7239_v43  ;;  %1051 = vrot.lane.b32.xlu0 %v846_v48, %s6574_s13 }
 0x1a1   : > { %1047 = vrot.lane.b32.xlu1 %v836_v8, %s6574_s13  ;;  %1049 = vrot.lane.b32.xlu2 %v845_v7, %s6574_s13  ;;  %v540_v3 = vpop.f32.mrf.mxu0 }
 0x1a2   : > { %v582_v11 = vmul.f32 %v6779_v28, %v540_v3  ;;  %v1054_v1 = vpop.permute.xlu0 %1053  ;;  %v975_v54 = vshrl.u32 %v737_v50, 16  ;;  %v978_v22 = vshll.u32 %v737_v50, 16 }
 0x1a3   : > { %v1210_v10 = vsel %vm7006_vm12, %v1054_v1, %v1209_v59  ;;  %v6288_v59 = vld [vmem:[%s8884_s3] ss:$0 sm:$0xff] }
 0x1a4   : > { %v618_v36 = vadd.f32 %v6784_v29, %v582_v11  ;;  %1211 = vst [vmem:[#allocation2 + $0x54] sm:$0xf] %v1210_v10  ;;  %v977_v12 = vrot.slane %v975_v54, 7  ;;  %v863_v10 = vrot.slane %v6963_v19, 4 }
 0x1a6   : > { %v7252_v30 = vmax.f32 %v618_v36, 0.0  ;;  %v982_v15 = vrot.slane %v977_v12, 4  ;;  %v980_v38 = vor.u32 %v978_v22, %v977_v12  ;;  %v1216_v36 = vld [vmem:[#allocation2 + $0x60] sm:$0xf] }
 0x1a8   : > { %8967 = vst [vmem:[#allocation44_spill] sm:$0xff] %v7252_v30  ;;  %v738_v28 = vpack.c.bf16 %v7252_v30, %v7252_v30  ;;  %1099 = vrot.lane.b32.xlu0 %v982_v15, %s6574_s13  ;;  %v981_v18 = vsel %vm6806_vm3, %v973_v35, %v980_v38 }
 0x1a9   : > { %1095 = vrot.lane.b32.xlu1 %v972_v57, %s6574_s13  ;;  %1097 = vrot.lane.b32.xlu2 %v981_v18, %s6574_s13  ;;  %v542_v29 = vpop.f32.mrf.mxu0 }
 0x1aa   : > { %v583_v48 = vmul.f32 %v6287_v27, %v542_v29  ;;  %v1066_v2 = vpop.permute.xlu2 %1065  ;;  %v984_v51 = vshrl.u32 %v738_v28, 16  ;;  %v987_v8 = vshll.u32 %v738_v28, 16  ;;  %v880_v29 = vrot.slane %v7050_v25, 4  ;;  %v1831_v25 = vpop.f32.mrf.mxu1 }
 0x1ab   : > { %v1224_v50 = vsel %vm7006_vm12, %v1066_v2, %v1223_v42  ;;  %v1056_v7 = vpop.permute.xlu0 %1055 }
 0x1ac   : > { %v619_v3 = vadd.f32 %v6288_v59, %v583_v48  ;;  %1225 = vst [vmem:[#allocation2 + $0x6c] sm:$0xf] %v1224_v50  ;;  %v986_v11 = vrot.slane %v984_v51, 7  ;;  %v7292_v51 = vld [vmem:[#allocation2 + $0x10] sm:$0xf] }
 0x1ad   : > { %1212 = vst.msk [vmem:[#allocation2 + $0x58] sm:$0xf] %vm654_vm5, %v1056_v7  ;;  %v3471_v7 = vld [vmem:[#allocation2 + $0xc] sm:$0xe] }
 0x1ae   : > { %v7270_v1 = vmax.f32 %v619_v3, 0.0  ;;  %v989_v54 = vor.u32 %v987_v8, %v986_v11  ;;  %v990_v18 = vrot.slane %v986_v11, 4  ;;  %v3537_v8 = vrot.slane %v7292_v51, 5  ;;  %v6155_v3 = vld [vmem:[#allocation8 + $0x10] sm:$0xff] }
 0x1af   : > { %2409 = vmatpush.bf16.msrb.mxu3 %v6155_v3 }
 0x1b0   : > { %8968 = vst [vmem:[#allocation45_spill] sm:$0xff] %v7270_v1  ;;  %v739_v13 = vpack.c.bf16 %v7270_v1, %v7270_v1 }
 0x1b1   : > { %1057 = vrot.lane.b32.xlu1 %v863_v10, %s6574_s13  ;;  %1101 = vrot.lane.b32.xlu2 %v989_v54, %s6574_s13  ;;  %v7277_v12 = vpop.f32.mrf.mxu0  ;;  %v7297_v54 = vld [vmem:[#allocation2 + $0x14] sm:$0x1]  ;;  %v3539_v10 = vrot.slane %v3537_v8, 4 }
 0x1b2   : > { %v1062_v22 = vpop.permute.xlu2 %1061  ;;  %v992_v15 = vshrl.u32 %v739_v13, 16  ;;  %v995_v57 = vshll.u32 %v739_v13, 16  ;;  %v5953_v13 = vrot.slane %v3471_v7, 9  ;;  %v1174_v7 = vld [vmem:[#allocation2 + $0x18] sm:$0xf] }
 0x1b3   : > { %1219 = vst.msk [vmem:[#allocation2 + $0x64] sm:$0xf] %vm654_vm5, %v1062_v22  ;;  %v1060_v35 = vpop.permute.xlu0 %1059 }
 0x1b4   : > { %v1217_v38 = vsel %vm7006_vm12, %v1060_v35, %v1216_v36  ;;  %v6144_v19 = vld [vmem:[#allocation2 + $0x54] sm:$0xff]  ;;  %v994_v41 = vrot.slane %v992_v15, 7  ;;  %v3540_v36 = vrot.slane %v7297_v54, 5  ;;  %v3538_v22 = vsel %vm7083_vm15, %v5953_v13, %v3537_v8  ;;  %v1178_v8 = vld [vmem:[#allocation2 + $0x20] sm:$0x1] }
 0x1b5   : > { %1218 = vst [vmem:[#allocation2 + $0x60] sm:$0xf] %v1217_v38  ;;  %5804 = vmatmul.msk.bf16.vlgmr.msra.gmra.mxu2 %vm1773_vm10, %v6144_v19  ;;  %v1227_v15 = vld [vmem:[#allocation2 + $0x74] sm:$0x1]  ;;  %v1297_v38 = vld [vmem:[#allocation2 + $0x6c] sm:$0xf]  ;;  %v3650_v19 = vunpack.c.l.b16 %v3538_v22 }
 0x1b6   : > { %v999_v28 = vrot.slane %v994_v41, 4  ;;  %v997_v42 = vor.u32 %v995_v57, %v994_v41  ;;  %v3541_v35 = vsel %vm7083_vm15, %v3539_v10, %v3540_v36 }
 0x1b7   : > { %v3651_v41 = vunpack.c.l.b16 %v3541_v35 }
 0x1b8   : > { %v998_v27 = vsel %vm6806_vm3, %v990_v18, %v997_v42 }
 0x1b9   : > { %1063 = vrot.lane.b32.xlu2 %v880_v29, %s6574_s13  ;;  %1105 = vrot.lane.b32.xlu1 %v999_v28, %s6574_s13  ;;  %v7288_v48 = vpop.f32.mrf.mxu0  ;;  %v7308_v29 = vpack.c.b16 %v3651_v41, %v3650_v19  ;;  %v7320_v41 = vpop.f32.mrf.mxu1 }
 0x1ba   : > { %1103 = vrot.lane.b32.xlu0 %v998_v27, %s6574_s13  ;;  %v1026_v2 = vpop.permute.xlu2 %1025  ;;  %v1549_v27 = vshrl.u32 %v1297_v38, 16 }
 0x1bb   : > { %1177 = vst.msk [vmem:[#allocation2 + $0x1c] sm:$0xf] %vm654_vm5, %v1026_v2  ;;  %v1552_v2 = vshll.u32 %v1297_v38, 16 }
 0x1bc   : > { %v6145_v14 = vld [vmem:[#allocation2 + $0x60] sm:$0xff] }
 0x1c1   : > { %v2054_v50 = vpop.f32.mrf.mxu0 }
 0x1c2   : > { %v7295_v59 = vadd.f32 %v2054_v50, %v1831_v25  ;;  %v1551_v50 = vrot.slane %v1549_v27, 4  ;;  %v1554_v25 = vrot.slane %v1552_v2, 5 }
 0x1c3   : > { %v1074_v11 = vpop.permute.xlu2 %1073 }
 0x1c4   : > { %1233 = vst.msk [vmem:[#allocation2 + $0x7c] sm:$0xf] %vm654_vm5, %v1074_v11  ;;  %v7312_v11 = vld [vmem:[#allocation2 + $0x1c] sm:$0xf]  ;;  %v1555_v38 = vor.u32 %v1554_v25, %v1551_v50  ;;  %v1234_v50 = vld [vmem:[#allocation2 + $0x80] sm:$0x1] }
 0x1c5   : > { %5805 = vmatmul.msk.bf16.gmra.mxu2 %vm1773_vm10, %v6145_v14  ;;  %v1230_v25 = vld [vmem:[#allocation2 + $0x78] sm:$0xf] }
 0x1c9   : > { %v7318_v19 = vpop.f32.mrf.mxu0 }
 0x1ca   : > { %v1070_v57 = vpop.permute.xlu0 %1069 }
 0x1cb   : > { %v1228_v28 = vsel %vm6944_vm9, %v1070_v57, %v1227_v15  ;;  %v1068_v18 = vpop.permute.xlu1 %1067  ;;  %v1032_v42 = vpop.permute.xlu2 %1031 }
 0x1cc   : > { %1229 = vst [vmem:[#allocation2 + $0x74] sm:$0x1] %v1228_v28 }
 0x1cd   : > { %1226 = vst.msk [vmem:[#allocation2 + $0x70] sm:$0xf] %vm654_vm5, %v1068_v18  ;;  %v1390_v18 = vshll.u32 %v7312_v11, 16 }
 0x1ce   : > { %1184 = vst.msk [vmem:[#allocation2 + $0x28] sm:$0xf] %vm654_vm5, %v1032_v42  ;;  %v1394_v42 = vshrl.u32 %v7312_v11, 16 }
 0x1d2   : > { %v1028_v3 = vpop.permute.xlu0 %1027 }
 0x1d3   : > { %v1179_v14 = vsel %vm6944_vm9, %v1028_v3, %v1178_v8  ;;  %v1024_v10 = vpop.permute.xlu1 %1023  ;;  %v1080_v13 = vpop.permute.xlu2 %1079  ;;  %v1322_v36 = vld [vmem:[#allocation2 + $0x74] sm:$0x1]  ;;  %v1556_v3 = vrot.slane %v1555_v38, 4 }
 0x1d4   : > { %1180 = vst [vmem:[#allocation2 + $0x20] sm:$0x1] %v1179_v14  ;;  %v1175_v22 = vsel %vm7006_vm12, %v1024_v10, %v1174_v7  ;;  %v6146_v15 = vld [vmem:[#allocation2 + $0x6c] sm:$0xff]  ;;  %v1568_v8 = vshll.u32 %v1322_v36, 16  ;;  %v1300_v7 = vld [vmem:[#allocation2 + $0x7c] sm:$0xf] }
 0x1d5   : > { %v1298_v35 = vld [vmem:[#allocation2 + $0x70] sm:$0xf]  ;;  %1176 = vst [vmem:[#allocation2 + $0x18] sm:$0xf] %v1175_v22  ;;  %5806 = vmatmul.msk.bf16.gmra.mxu2 %vm1773_vm10, %v6146_v15  ;;  %v1392_v10 = vrot.slane %v1390_v18, 5  ;;  %v1396_v22 = vrot.slane %v1394_v42, 4 }
 0x1d6   : > { %v1558_v57 = vshll.u32 %v1298_v35, 16  ;;  %v1562_v28 = vshrl.u32 %v1298_v35, 16  ;;  %1240 = vst.msk [vmem:[#allocation2 + $0x88] sm:$0xf] %vm654_vm5, %v1080_v13  ;;  %v1582_v35 = vshll.u32 %v1300_v7, 16  ;;  %v1586_v43 = vshrl.u32 %v1300_v7, 16 }
 0x1d7   : > { %v1570_v36 = vrot.slane %v1568_v8, 5  ;;  %v1397_v45 = vor.u32 %v1396_v22, %v1392_v10  ;;  %v2059_v8 = vpop.f32.mrf.mxu0  ;;  %v1181_v22 = vld [vmem:[#allocation2 + $0x24] sm:$0xf] }
 0x1d8   : > { %v1560_v27 = vrot.slane %v1558_v57, 5  ;;  %v1564_v2 = vrot.slane %v1562_v28, 4  ;;  %v7341_v6 = vrot.slane %v1582_v35, 5 }
 0x1da   : > { %v1565_v14 = vor.u32 %v1564_v2, %v1560_v27  ;;  %v1076_v30 = vpop.permute.xlu0 %1075  ;;  %v1561_v15 = vsel %vm6923_vm8, %v1556_v3, %v1560_v27 }
 0x1db   : > { %v1235_v1 = vsel %vm6944_vm9, %v1076_v30, %v1234_v50  ;;  %v1072_v37 = vpop.permute.xlu1 %1071  ;;  %v1038_v13 = vpop.permute.xlu2 %1037  ;;  %v7330_v28 = vld [vmem:[#allocation2 + $0x20] sm:$0x1]  ;;  %v1737_v27 = vunpack.c.l.b16 %v1561_v15 }
 0x1dc   : > { %v1566_v57 = vrot.slane %v1565_v14, 4  ;;  %1236 = vst [vmem:[#allocation2 + $0x80] sm:$0x1] %v1235_v1  ;;  %v1231_v38 = vsel %vm7006_vm12, %v1072_v37, %v1230_v25  ;;  %v6139_v18 = vld [vmem:[#allocation2 + $0x18] sm:$0xff]  ;;  %v1400_v2 = vshll.u32 %v7330_v28, 16 }
 0x1dd   : > { %v1283_v42 = vld [vmem:[#allocation2 + $0x18] sm:$0xf]  ;;  %1232 = vst [vmem:[#allocation2 + $0x78] sm:$0xf] %v1231_v38  ;;  %5799 = vmatmul.msk.bf16.gmra.mxu0 %vm1773_vm10, %v6139_v18 }
 0x1de   : > { %v1571_v30 = vsel %vm6923_vm8, %v1566_v57, %v1570_v36  ;;  %v1381_v7 = vshrl.u32 %v1283_v42, 16  ;;  %v1384_v50 = vshll.u32 %v1283_v42, 16  ;;  %1191 = vst.msk [vmem:[#allocation2 + $0x34] sm:$0xf] %vm654_vm5, %v1038_v13  ;;  %v1402_v14 = vrot.slane %v1400_v2, 5 }
 0x1df   : > { %v1738_v1 = vunpack.c.l.b16 %v1571_v30  ;;  %v1836_v3 = vpop.f32.mrf.mxu1  ;;  %v1588_v57 = vrot.slane %v1586_v43, 4  ;;  %v7343_v36 = vld [vmem:[#allocation2 + $0x28] sm:$0xf]  ;;  %v1398_v42 = vrot.slane %v1397_v45, 4 }
 0x1e0   : > { %v1383_v37 = vrot.slane %v1381_v7, 4  ;;  %v1386_v25 = vrot.slane %v1384_v50, 5  ;;  %v7339_v5 = vadd.f32 %v2059_v8, %v1836_v3  ;;  %v1414_v43 = vshll.u32 %v7343_v36, 16 }
 0x1e1   : > { %v1760_v38 = vpack.c.b16 %v1738_v1, %v1737_v27  ;;  %v1403_v50 = vsel %vm6923_vm8, %v1398_v42, %v1402_v14  ;;  %v1589_v8 = vor.u32 %v1588_v57, %v7341_v6  ;;  %v1418_v14 = vshrl.u32 %v7343_v36, 16 }
 0x1e2   : > { %v1387_v13 = vor.u32 %v1386_v25, %v1383_v37  ;;  %v1034_v15 = vpop.permute.xlu0 %1033  ;;  %v7360_v33 = vrot.slane %v1414_v43, 5 }
 0x1e3   : > { %5722 = vmatmul.msk.bf16.vlgmr.msra.gmra.mxu3 %vm1773_vm10, %v1760_v38  ;;  %v1186_v18 = vsel %vm6944_vm9, %v1034_v15, %v1185_v31  ;;  %v1030_v30 = vpop.permute.xlu1 %1029  ;;  %v1086_v2 = vpop.permute.xlu2 %1085  ;;  %v1323_v35 = vld [vmem:[#allocation2 + $0x80] sm:$0x1]  ;;  %v1420_v61 = vrot.slane %v1418_v14, 4 }
 0x1e4   : > { %v1388_v7 = vrot.slane %v1387_v13, 4  ;;  %1187 = vst [vmem:[#allocation2 + $0x2c] sm:$0x1] %v1186_v18  ;;  %v1182_v27 = vsel %vm7006_vm12, %v1030_v30, %v1181_v22  ;;  %v6147_v45 = vld [vmem:[#allocation2 + $0x78] sm:$0xff]  ;;  %v1592_v3 = vshll.u32 %v1323_v35, 16  ;;  %v1724_v13 = vunpack.c.l.b16 %v1403_v50 }
 0x1e5   : > { %v1299_v1 = vld [vmem:[#allocation2 + $0x78] sm:$0xf]  ;;  %1183 = vst [vmem:[#allocation2 + $0x24] sm:$0xf] %v1182_v27  ;;  %5807 = vmatmul.msk.bf16.gmra.mxu2 %vm1773_vm10, %v6147_v45  ;;  %v2201_v22 = vrot.slane %v7312_v11, 5  ;;  %v2204_v11 = vrot.slane %v7330_v28, 5 }
 0x1e6   : > { %v1393_v31 = vsel %vm6923_vm8, %v1388_v7, %v1392_v10  ;;  %v1573_v37 = vshrl.u32 %v1299_v1, 16  ;;  %v1576_v25 = vshll.u32 %v1299_v1, 16  ;;  %1247 = vst.msk [vmem:[#allocation2 + $0x94] sm:$0xf] %vm654_vm5, %v1086_v2  ;;  %v1594_v57 = vrot.slane %v1592_v3, 5 }
 0x1e7   : > { %v1723_v38 = vunpack.c.l.b16 %v1393_v31  ;;  %v1302_v18 = vld [vmem:[#allocation2 + $0x88] sm:$0xf]  ;;  %v1241_v35 = vld [vmem:[#allocation2 + $0x8c] sm:$0x1]  ;;  %v2136_v27 = vld [vmem:[#allocation2 + $0x18] sm:$0xe] }
 0x1e8   : > { %v1575_v42 = vrot.slane %v1573_v37, 4  ;;  %v1578_v15 = vrot.slane %v1576_v25, 5  ;;  %v1237_v10 = vld [vmem:[#allocation2 + $0x84] sm:$0xf]  ;;  %v1590_v1 = vrot.slane %v1589_v8, 4  ;;  %v1606_v45 = vshll.u32 %v1302_v18, 16 }
 0x1e9   : > { %v1753_v30 = vpack.c.b16 %v1724_v13, %v1723_v38  ;;  %v1610_v50 = vshrl.u32 %v1302_v18, 16  ;;  %v2203_v31 = vrot.slane %v2201_v22, 4  ;;  %v5815_v14 = vrot.slane %v2136_v27, 9 }
 0x1ea   : > { %v1579_v7 = vor.u32 %v1578_v15, %v1575_v42  ;;  %v1082_v2 = vpop.permute.xlu0 %1081  ;;  %v1595_v8 = vsel %vm6923_vm8, %v1590_v1, %v1594_v57  ;;  %v1421_v27 = vor.u32 %v1420_v61, %v7360_v33  ;;  %v1188_v61 = vld [vmem:[#allocation2 + $0x30] sm:$0xf] }
 0x1eb   : > { %5715 = vmatmul.msk.bf16.gmra.mxu1 %vm1773_vm10, %v1753_v30  ;;  %v1242_v3 = vsel %vm6944_vm9, %v1082_v2, %v1241_v35  ;;  %v1078_v37 = vpop.permute.xlu1 %1077  ;;  %v1044_v25 = vpop.permute.xlu2 %1043  ;;  %v7368_v43 = vld [vmem:[#allocation2 + $0x2c] sm:$0x1]  ;;  %v2205_v18 = vsel %vm7083_vm15, %v2203_v31, %v2204_v11  ;;  %v2202_v31 = vsel %vm7083_vm15, %v5815_v14, %v2201_v22 }
 0x1ec   : > { %v1580_v38 = vrot.slane %v1579_v7, 4  ;;  %1243 = vst [vmem:[#allocation2 + $0x8c] sm:$0x1] %v1242_v3  ;;  %v1238_v13 = vsel %vm7006_vm12, %v1078_v37, %v1237_v10  ;;  %v6140_v42 = vld [vmem:[#allocation2 + $0x24] sm:$0xff]  ;;  %v1424_v28 = vshll.u32 %v7368_v43, 16  ;;  %v1740_v7 = vunpack.c.l.b16 %v1595_v8 }
 0x1ed   : > { %v1285_v15 = vld [vmem:[#allocation2 + $0x24] sm:$0xf]  ;;  %1239 = vst [vmem:[#allocation2 + $0x84] sm:$0xf] %v1238_v13  ;;  %5800 = vmatmul.msk.bf16.gmra.mxu0 %vm1773_vm10, %v6140_v42  ;;  %v1192_v37 = vld [vmem:[#allocation2 + $0x38] sm:$0x1]  ;;  %v2304_v8 = vunpack.c.l.b16 %v2202_v31 }
 0x1ee   : > { %v1585_v30 = vsel %vm6923_vm8, %v1580_v38, %v7341_v6  ;;  %v1405_v57 = vshrl.u32 %v1285_v15, 16  ;;  %v1408_v35 = vshll.u32 %v1285_v15, 16  ;;  %1198 = vst.msk [vmem:[#allocation2 + $0x40] sm:$0xf] %vm654_vm5, %v1044_v25  ;;  %v1426_v3 = vrot.slane %v1424_v28, 5 }
 0x1ef   : > { %v1739_v10 = vunpack.c.l.b16 %v1585_v30  ;;  %v7383_v13 = vrot.slane %v1606_v45, 5  ;;  %v1612_v6 = vrot.slane %v1610_v50, 4  ;;  %v7385_v38 = vld [vmem:[#allocation2 + $0x34] sm:$0xf]  ;;  %v1422_v25 = vrot.slane %v1421_v27, 4 }
 0x1f0   : > { %v1407_v1 = vrot.slane %v1405_v57, 4  ;;  %v1410_v2 = vrot.slane %v1408_v35, 5  ;;  %v1438_v50 = vshll.u32 %v7385_v38, 16  ;;  %v2215_v23 = vrot.slane %v7385_v38, 5 }
 0x1f1   : > { %v1761_v11 = vpack.c.b16 %v1740_v7, %v1739_v10  ;;  %v1427_v45 = vsel %vm6923_vm8, %v1422_v25, %v1426_v3  ;;  %v1613_v7 = vor.u32 %v1612_v6, %v7383_v13 }
 0x1f2   : > { %v1411_v15 = vor.u32 %v1410_v2, %v1407_v1  ;;  %v1040_v42 = vpop.permute.xlu0 %1039  ;;  %v2305_v2 = vunpack.c.l.b16 %v2205_v18 }
 0x1f3   : > { %5723 = vmatmul.msk.bf16.gmra.mxu3 %vm1773_vm10, %v1761_v11  ;;  %v1193_v28 = vsel %vm6944_vm9, %v1040_v42, %v1192_v37  ;;  %v1036_v30 = vpop.permute.xlu1 %1035  ;;  %v1092_v57 = vpop.permute.xlu2 %1091  ;;  %v1324_v14 = vld [vmem:[#allocation2 + $0x8c] sm:$0x1]  ;;  %v1442_v37 = vshrl.u32 %v7385_v38, 16 }
 0x1f4   : > { %v1412_v22 = vrot.slane %v1411_v15, 4  ;;  %1194 = vst [vmem:[#allocation2 + $0x38] sm:$0x1] %v1193_v28  ;;  %v1189_v35 = vsel %vm7006_vm12, %v1036_v30, %v1188_v61  ;;  %v6148_v27 = vld [vmem:[#allocation2 + $0x84] sm:$0xff]  ;;  %v1616_v1 = vshll.u32 %v1324_v14, 16  ;;  %v1726_v15 = vunpack.c.l.b16 %v1427_v45 }
 0x1f5   : > { %v1301_v10 = vld [vmem:[#allocation2 + $0x84] sm:$0xf]  ;;  %1190 = vst [vmem:[#allocation2 + $0x30] sm:$0xf] %v1189_v35  ;;  %5808 = vmatmul.msk.bf16.gmra.mxu2 %vm1773_vm10, %v6148_v27  ;;  %v7402_v25 = vpack.c.b16 %v2305_v2, %v2304_v8  ;;  %v1304_v28 = vld [vmem:[#allocation2 + $0x94] sm:$0xf] }
 0x1f6   : > { %v1417_v31 = vsel %vm6923_vm8, %v1412_v22, %v7360_v33  ;;  %v1597_v11 = vshrl.u32 %v1301_v10, 16  ;;  %v1600_v3 = vshll.u32 %v1301_v10, 16  ;;  %1254 = vst.msk [vmem:[#allocation2 + $0xa0] sm:$0xf] %vm654_vm5, %v1092_v57  ;;  %v1618_v18 = vrot.slane %v1616_v1, 5 }
 0x1f7   : > { %v1725_v61 = vunpack.c.l.b16 %v1417_v31  ;;  %v1248_v14 = vld [vmem:[#allocation2 + $0x98] sm:$0x1]  ;;  %v1244_v35 = vld [vmem:[#allocation2 + $0x90] sm:$0xf]  ;;  %v1614_v22 = vrot.slane %v1613_v7, 4  ;;  %v1440_v10 = vrot.slane %v1438_v50, 5 }
 0x1f8   : > { %v1599_v6 = vrot.slane %v1597_v11, 4  ;;  %v1602_v42 = vrot.slane %v1600_v3, 5  ;;  %v1444_v63 = vrot.slane %v1442_v37, 4  ;;  %v1630_v62 = vshll.u32 %v1304_v28, 16 }
 0x1f9   : > { %v1754_v30 = vpack.c.b16 %v1726_v15, %v1725_v61  ;;  %v1619_v1 = vsel %vm6923_vm8, %v1614_v22, %v1618_v18  ;;  %v1634_v11 = vshrl.u32 %v1304_v28, 16  ;;  %v1199_v22 = vld [vmem:[#allocation2 + $0x44] sm:$0x1] }
 0x1fa   : > { %v1603_v33 = vor.u32 %v1602_v42, %v1599_v6  ;;  %v1088_v57 = vpop.permute.xlu0 %1087  ;;  %v1445_v42 = vor.u32 %v1444_v63, %v1440_v10  ;;  %v1742_v28 = vunpack.c.l.b16 %v1619_v1 }
 0x1fb   : > { %5716 = vmatmul.msk.bf16.gmra.mxu1 %vm1773_vm10, %v1754_v30  ;;  %v1249_v45 = vsel %vm6944_vm9, %v1088_v57, %v1248_v14  ;;  %v1084_v8 = vpop.permute.xlu1 %1083  ;;  %v1050_v27 = vpop.permute.xlu2 %1049  ;;  %v7409_v31 = vld [vmem:[#allocation2 + $0x38] sm:$0x1]  ;;  %v7419_v57 = vrot.slane %v1630_v62, 5 }
 0x1fc   : > { %v1604_v2 = vrot.slane %v1603_v33, 4  ;;  %1250 = vst [vmem:[#allocation2 + $0x98] sm:$0x1] %v1249_v45  ;;  %v1245_v50 = vsel %vm7006_vm12, %v1084_v8, %v1244_v35  ;;  %v6141_v7 = vld [vmem:[#allocation2 + $0x30] sm:$0xff]  ;;  %v1448_v37 = vshll.u32 %v7409_v31, 16  ;;  %v1636_v45 = vrot.slane %v1634_v11, 4 }
 0x1fd   : > { %v1287_v3 = vld [vmem:[#allocation2 + $0x30] sm:$0xf]  ;;  %1246 = vst [vmem:[#allocation2 + $0x90] sm:$0xf] %v1245_v50  ;;  %5801 = vmatmul.msk.bf16.gmra.mxu0 %vm1773_vm10, %v6141_v7  ;;  %v7421_v8 = vld [vmem:[#allocation2 + $0x40] sm:$0xf] }
 0x1fe   : > { %v1609_v61 = vsel %vm6923_vm8, %v1604_v2, %v7383_v13  ;;  %v1429_v15 = vshrl.u32 %v1287_v3, 16  ;;  %v1432_v6 = vshll.u32 %v1287_v3, 16  ;;  %1205 = vst.msk [vmem:[#allocation2 + $0x4c] sm:$0xf] %vm654_vm5, %v1050_v27  ;;  %v1450_v35 = vrot.slane %v1448_v37, 5 }
 0x1ff   : > { %v1741_v18 = vunpack.c.l.b16 %v1609_v61  ;;  %v1195_v13 = vld [vmem:[#allocation2 + $0x3c] sm:$0xf]  ;;  %v1446_v50 = vrot.slane %v1445_v42, 4  ;;  %v1462_v11 = vshll.u32 %v7421_v8, 16  ;;  %v1637_v42 = vor.u32 %v1636_v45, %v7419_v57 }
 0x200   : > { %v1431_v30 = vrot.slane %v1429_v15, 4  ;;  %v1434_v14 = vrot.slane %v1432_v6, 5 }
 0x201   : > { %v1762_v33 = vpack.c.b16 %v1742_v28, %v1741_v18  ;;  %v1451_v37 = vsel %vm6923_vm8, %v1446_v50, %v1450_v35  ;;  %v1466_v35 = vshrl.u32 %v7421_v8, 16 }
 0x202   : > { %v1435_v2 = vor.u32 %v1434_v14, %v1431_v30  ;;  %v1046_v63 = vpop.permute.xlu0 %1045 }
 0x203   : > { %5724 = vmatmul.msk.bf16.gmra.mxu3 %vm1773_vm10, %v1762_v33  ;;  %v1200_v27 = vsel %vm6944_vm9, %v1046_v63, %v1199_v22  ;;  %v1042_v1 = vpop.permute.xlu1 %1041  ;;  %v1098_v7 = vpop.permute.xlu2 %1097  ;;  %v1325_v62 = vld [vmem:[#allocation2 + $0x98] sm:$0x1]  ;;  %v1728_v22 = vunpack.c.l.b16 %v1451_v37  ;;  %v1306_v63 = vld [vmem:[#allocation2 + $0xa0] sm:$0xf] }
 0x204   : > { %v1436_v3 = vrot.slane %v1435_v2, 4  ;;  %1201 = vst [vmem:[#allocation2 + $0x44] sm:$0x1] %v1200_v27  ;;  %v1196_v61 = vsel %vm7006_vm12, %v1042_v1, %v1195_v13  ;;  %v6149_v15 = vld [vmem:[#allocation2 + $0x90] sm:$0xff]  ;;  %v1640_v18 = vshll.u32 %v1325_v62, 16  ;;  %v1654_v9 = vshll.u32 %v1306_v63, 16 }
 0x205   : > { %v1303_v6 = vld [vmem:[#allocation2 + $0x90] sm:$0xf]  ;;  %1197 = vst [vmem:[#allocation2 + $0x3c] sm:$0xf] %v1196_v61  ;;  %5809 = vmatmul.msk.bf16.gmra.mxu2 %vm1773_vm10, %v6149_v15  ;;  %v1255_v27 = vld [vmem:[#allocation2 + $0xa4] sm:$0x1] }
 0x206   : > { %v1441_v28 = vsel %vm6923_vm8, %v1436_v3, %v1440_v10  ;;  %v1621_v30 = vshrl.u32 %v1303_v6, 16  ;;  %v1624_v14 = vshll.u32 %v1303_v6, 16  ;;  %1261 = vst.msk [vmem:[#allocation2 + $0xac] sm:$0xf] %vm654_vm5, %v1098_v7  ;;  %v1642_v50 = vrot.slane %v1640_v18, 5 }
 0x207   : > { %v1727_v33 = vunpack.c.l.b16 %v1441_v28  ;;  %v1251_v1 = vld [vmem:[#allocation2 + $0x9c] sm:$0xf]  ;;  %v1265_v62 = vld [vmem:[#allocation2 + $0xb4] sm:$0xf]  ;;  %v1638_v10 = vrot.slane %v1637_v42, 4  ;;  %v7437_v3 = vrot.slane %v1462_v11, 5 }
 0x208   : > { %v1623_v13 = vrot.slane %v1621_v30, 4  ;;  %v1626_v2 = vrot.slane %v1624_v14, 5  ;;  %v1468_v6 = vrot.slane %v1466_v35, 4  ;;  %v2208_v15 = vrot.slane %v7343_v36, 5  ;;  %v2137_v42 = vld [vmem:[#allocation2 + $0x24] sm:$0xe] }
 0x209   : > { %v1755_v45 = vpack.c.b16 %v1728_v22, %v1727_v33  ;;  %v1643_v14 = vsel %vm6923_vm8, %v1638_v10, %v1642_v50  ;;  %v1658_v11 = vshrl.u32 %v1306_v63, 16  ;;  %v6191_v10 = vld [vmem:[#allocation8 + $0x30] sm:$0xff]  ;;  %v2829_v4 = vld [vmem:[#allocation2 + $0x4c] sm:$0xf] }
 0x20a   : > { %v1627_v61 = vor.u32 %v1626_v2, %v1623_v13  ;;  %v1094_v7 = vpop.permute.xlu0 %1093  ;;  %v1469_v63 = vor.u32 %v1468_v6, %v7437_v3  ;;  %4050 = vmatpush.bf16.msra.mxu0 %v6191_v10  ;;  %v1202_v6 = vld [vmem:[#allocation2 + $0x48] sm:$0xf] }
 0x20b   : > { %5717 = vmatmul.msk.bf16.gmra.mxu1 %vm1773_vm10, %v1755_v45  ;;  %v1256_v37 = vsel %vm6944_vm9, %v1094_v7, %v1255_v27  ;;  %v1090_v18 = vpop.permute.xlu1 %1089  ;;  %v1102_v28 = vpop.permute.xlu2 %1101  ;;  %v7445_v33 = vld [vmem:[#allocation2 + $0x44] sm:$0x1] }
 0x20c   : > { %v1628_v30 = vrot.slane %v1627_v61, 4  ;;  %1257 = vst [vmem:[#allocation2 + $0xa4] sm:$0x1] %v1256_v37  ;;  %v1252_v35 = vsel %vm7006_vm12, %v1090_v18, %v1251_v1  ;;  %v1266_v36 = vsel %vm7006_vm12, %v1102_v28, %v1265_v62  ;;  %v6142_v22 = vld [vmem:[#allocation2 + $0x3c] sm:$0xff]  ;;  %v1472_v2 = vshll.u32 %v7445_v33, 16 }
 0x20d   : > { %v1289_v13 = vld [vmem:[#allocation2 + $0x3c] sm:$0xf]  ;;  %1253 = vst [vmem:[#allocation2 + $0x9c] sm:$0xf] %v1252_v35  ;;  %5802 = vmatmul.msk.bf16.gmra.mxu0 %vm1773_vm10, %v6142_v22  ;;  %v1744_v61 = vunpack.c.l.b16 %v1643_v14  ;;  %v5816_v62 = vrot.slane %v2137_v42, 9  ;;  %v2211_v35 = vrot.slane %v7368_v43, 5 }
 0x20e   : > { %v1633_v50 = vsel %vm6923_vm8, %v1628_v30, %v7419_v57  ;;  %v1453_v45 = vshrl.u32 %v1289_v13, 16  ;;  %v1456_v27 = vshll.u32 %v1289_v13, 16  ;;  %1267 = vst [vmem:[#allocation2 + $0xb4] sm:$0xf] %v1266_v36  ;;  %v1474_v18 = vrot.slane %v1472_v2, 5 }
 0x20f   : > { %v1743_v1 = vunpack.c.l.b16 %v1633_v50  ;;  %v7457_v28 = vld [vmem:[#allocation2 + $0x4c] sm:$0xf]  ;;  %v1206_v57 = vld [vmem:[#allocation2 + $0x50] sm:$0x1]  ;;  %v7460_v30 = vrot.slane %v1654_v9, 5  ;;  %v1660_v13 = vrot.slane %v1658_v11, 4 }
 0x210   : > { %v1455_v7 = vrot.slane %v1453_v45, 4  ;;  %v1458_v37 = vrot.slane %v1456_v27, 5  ;;  %v1220_v36 = vld [vmem:[#allocation2 + $0x68] sm:$0x1]  ;;  %v1470_v50 = vrot.slane %v1469_v63, 4  ;;  %v2210_v14 = vrot.slane %v2208_v15, 4 }
 0x211   : > { %v1763_v46 = vpack.c.b16 %v1744_v61, %v1743_v1  ;;  %v1486_v2 = vshll.u32 %v7457_v28, 16  ;;  %v2209_v45 = vsel %vm7083_vm15, %v5816_v62, %v2208_v15 }
 0x212   : > { %v1459_v22 = vor.u32 %v1458_v37, %v1455_v7  ;;  %v1052_v42 = vpop.permute.xlu0 %1051  ;;  %v1475_v1 = vsel %vm6923_vm8, %v1470_v50, %v1474_v18  ;;  %v2212_v63 = vsel %vm7083_vm15, %v2210_v14, %v2211_v35  ;;  %v1661_v7 = vor.u32 %v1660_v13, %v7460_v30  ;;  %v1308_v13 = vld [vmem:[#allocation2 + $0xac] sm:$0xf] }
 0x213   : > { %5725 = vmatmul.msk.bf16.gmra.mxu3 %vm1773_vm10, %v1763_v46  ;;  %v1207_v43 = vsel %vm6944_vm9, %v1052_v42, %v1206_v57  ;;  %v1048_v9 = vpop.permute.xlu1 %1047  ;;  %v1064_v27 = vpop.permute.xlu2 %1063  ;;  %v1326_v61 = vld [vmem:[#allocation2 + $0xa4] sm:$0x1]  ;;  %v1490_v35 = vshrl.u32 %v7457_v28, 16  ;;  %v1730_v50 = vunpack.c.l.b16 %v1475_v1 }
 0x214   : > { %v1460_v11 = vrot.slane %v1459_v22, 4  ;;  %1208 = vst [vmem:[#allocation2 + $0x50] sm:$0x1] %v1207_v43  ;;  %v1203_v46 = vsel %vm7006_vm12, %v1048_v9, %v1202_v6  ;;  %v1221_v15 = vsel %vm6944_vm9, %v1064_v27, %v1220_v36  ;;  %v6150_v10 = vld [vmem:[#allocation2 + $0x9c] sm:$0xff]  ;;  %v1664_v37 = vshll.u32 %v1326_v61, 16 }
 0x215   : > { %v1305_v62 = vld [vmem:[#allocation2 + $0x9c] sm:$0xf]  ;;  %1204 = vst [vmem:[#allocation2 + $0x48] sm:$0xf] %v1203_v46  ;;  %5810 = vmatmul.msk.bf16.gmra.mxu2 %vm1773_vm10, %v6150_v10  ;;  %v2306_v36 = vunpack.c.l.b16 %v2209_v45  ;;  %v1262_v27 = vld [vmem:[#allocation2 + $0xb0] sm:$0x1]  ;;  %v2307_v61 = vunpack.c.l.b16 %v2212_v63 }
 0x216   : > { %v1465_v18 = vsel %vm6923_vm8, %v1460_v11, %v7437_v3  ;;  %v1645_v57 = vshrl.u32 %v1305_v62, 16  ;;  %v1648_v22 = vshll.u32 %v1305_v62, 16  ;;  %1222 = vst [vmem:[#allocation2 + $0x68] sm:$0x1] %v1221_v15  ;;  %v1666_v43 = vrot.slane %v1664_v37, 5 }
 0x217   : > { %v1729_v6 = vunpack.c.l.b16 %v1465_v18  ;;  %v1258_v46 = vld [vmem:[#allocation2 + $0xa8] sm:$0xf]  ;;  %v1662_v3 = vrot.slane %v1661_v7, 4  ;;  %v7482_v11 = vrot.slane %v1486_v2, 5  ;;  %v1492_v62 = vrot.slane %v1490_v35, 4 }
 0x218   : > { %v1647_v14 = vrot.slane %v1645_v57, 4  ;;  %v1650_v42 = vrot.slane %v1648_v22, 5  ;;  %v1678_v10 = vshll.u32 %v1308_v13, 16  ;;  %v7485_v18 = vpack.c.b16 %v2307_v61, %v2306_v36  ;;  %v1293_v2 = vld [vmem:[#allocation2 + $0x54] sm:$0xf] }
 0x219   : > { %v1756_v9 = vpack.c.b16 %v1730_v50, %v1729_v6  ;;  %v1667_v63 = vsel %vm6923_vm8, %v1662_v3, %v1666_v43  ;;  %v1682_v7 = vshrl.u32 %v1308_v13, 16  ;;  %v7500_v43 = vld [vmem:[#allocation2 + $0x58] sm:$0xf] }
 0x21a   : > { %v1651_v20 = vor.u32 %v1650_v42, %v1647_v14  ;;  %v1100_v15 = vpop.permute.xlu0 %1099  ;;  %v1493_v42 = vor.u32 %v1492_v62, %v7482_v11 }
 0x21b   : > { %5718 = vmatmul.msk.bf16.gmra.mxu1 %vm1773_vm10, %v1756_v9  ;;  %v1263_v45 = vsel %vm6944_vm9, %v1100_v15, %v1262_v27  ;;  %v1096_v1 = vpop.permute.xlu1 %1095  ;;  %v7491_v57 = vld [vmem:[#allocation2 + $0x50] sm:$0x1]  ;;  %v1746_v9 = vunpack.c.l.b16 %v1667_v63  ;;  %v1501_v27 = vshrl.u32 %v1293_v2, 16  ;;  %v1504_v15 = vshll.u32 %v1293_v2, 16 }
 0x21c   : > { %v1652_v37 = vrot.slane %v1651_v20, 4  ;;  %1264 = vst [vmem:[#allocation2 + $0xb0] sm:$0x1] %v1263_v45  ;;  %v1259_v22 = vsel %vm7006_vm12, %v1096_v1, %v1258_v46  ;;  %v6143_v35 = vld [vmem:[#allocation2 + $0x48] sm:$0xff]  ;;  %v1496_v50 = vshll.u32 %v7491_v57, 16  ;;  %v1494_v56 = vrot.slane %v1493_v42, 4 }
 0x21d   : > { %v1291_v6 = vld [vmem:[#allocation2 + $0x48] sm:$0xf]  ;;  %1260 = vst [vmem:[#allocation2 + $0xa8] sm:$0xf] %v1259_v22  ;;  %5803 = vmatmul.msk.bf16.gmra.mxu0 %vm1773_vm10, %v6143_v35  ;;  %v2138_v45 = vld [vmem:[#allocation2 + $0x30] sm:$0xe] }
 0x21e   : > { %v1657_v20 = vsel %vm6923_vm8, %v1652_v37, %v7460_v30  ;;  %v1477_v36 = vshrl.u32 %v1291_v6, 16  ;;  %v1480_v14 = vshll.u32 %v1291_v6, 16  ;;  %v1498_v3 = vrot.slane %v1496_v50, 5  ;;  %v1213_v6 = vld [vmem:[#allocation2 + $0x5c] sm:$0x1] }
 0x21f   : > { %v1745_v13 = vunpack.c.l.b16 %v1657_v20  ;;  %v7503_v22 = vrot.slane %v1678_v10, 5  ;;  %v1684_v30 = vrot.slane %v1682_v7, 4  ;;  %v1510_v37 = vshll.u32 %v7500_v43, 16 }
 0x220   : > { %v1479_v61 = vrot.slane %v1477_v36, 4  ;;  %v1482_v46 = vrot.slane %v1480_v14, 5  ;;  %v7508_v63 = vrot.slane %v1501_v27, 4  ;;  %v1514_v35 = vshrl.u32 %v7500_v43, 16 }
 0x221   : > { %v1764_v1 = vpack.c.b16 %v1746_v9, %v1745_v13  ;;  %v5817_v50 = vrot.slane %v2138_v45, 9  ;;  %v1499_v10 = vsel %vm6923_vm8, %v1494_v56, %v1498_v3  ;;  %v1506_v36 = vrot.slane %v1504_v15, 5 }
 0x222   : > { %v1483_v62 = vor.u32 %v1482_v46, %v1479_v61  ;;  %v2218_v14 = vrot.slane %v7409_v31, 5  ;;  %v1685_v9 = vor.u32 %v1684_v30, %v7503_v22  ;;  %v7517_v61 = vrot.slane %v1510_v37, 5 }
 0x223   : > { %5726 = vmatmul.msk.bf16.gmra.mxu3 %vm1773_vm10, %v1764_v1  ;;  %v1058_v2 = vpop.permute.xlu1 %1057  ;;  %v1327_v7 = vld [vmem:[#allocation2 + $0xb0] sm:$0x1]  ;;  %v2217_v15 = vrot.slane %v2215_v23, 4  ;;  %v1732_v45 = vunpack.c.l.b16 %v1499_v10  ;;  %v1516_v1 = vrot.slane %v1514_v35, 4  ;;  %v1507_v35 = vor.u32 %v1506_v36, %v7508_v63  ;;  %v6175_v63 = vld [vmem:[#allocation2 + $0x18] sm:$0xff] }
 0x224   : > { %v1484_v20 = vrot.slane %v1483_v62, 4  ;;  %v1214_v42 = vsel %vm6944_vm9, %v1058_v2, %v1213_v6  ;;  %v6151_v38 = vld [vmem:[#allocation2 + $0xa8] sm:$0xff]  ;;  %v1688_v27 = vshll.u32 %v1327_v7, 16  ;;  %v2216_v6 = vsel %vm7083_vm15, %v5817_v50, %v2215_v23  ;;  %v1309_v50 = vld [vmem:[#allocation2 + $0xb4] sm:$0xf] }
 0x225   : > { %v1307_v13 = vld [vmem:[#allocation2 + $0xa8] sm:$0xf]  ;;  %1215 = vst [vmem:[#allocation2 + $0x5c] sm:$0x1] %v1214_v42  ;;  %5811 = vmatmul.msk.bf16.gmra.mxu2 %vm1773_vm10, %v6151_v38  ;;  %v7525_v2 = vld [vmem:[#allocation2 + $0xc] sm:$0xf]  ;;  %v2219_v7 = vsel %vm7083_vm15, %v2217_v15, %v2218_v14  ;;  %v2308_v38 = vunpack.c.l.b16 %v2216_v6  ;;  %v1517_v23 = vor.u32 %v1516_v1, %v7517_v61 }
 0x226   : > { %v1489_v46 = vsel %vm6923_vm8, %v1484_v20, %v7482_v11  ;;  %v1669_v56 = vshrl.u32 %v1307_v13, 16  ;;  %v1672_v3 = vshll.u32 %v1307_v13, 16  ;;  %v1690_v37 = vrot.slane %v1688_v27, 5  ;;  %v2139_v20 = vld [vmem:[#allocation2 + $0x3c] sm:$0xe] }
 0x227   : > { %v1731_v31 = vunpack.c.l.b16 %v1489_v46  ;;  %v1269_v42 = vld [vmem:[#allocation2 + $0xbc] sm:$0x1]  ;;  %v1686_v24 = vrot.slane %v1685_v9, 4  ;;  %v2309_v46 = vunpack.c.l.b16 %v2219_v7  ;;  %v2862_v10 = vshrl.u32 %v7525_v2, 16 }
 0x228   : > { %v1671_v30 = vrot.slane %v1669_v56, 4  ;;  %v1674_v62 = vrot.slane %v1672_v3, 5  ;;  %v5818_v27 = vrot.slane %v2139_v20, 9  ;;  %v2222_v9 = vrot.slane %v7421_v8, 5  ;;  %v1295_v20 = vld [vmem:[#allocation2 + $0x60] sm:$0xf] }
 0x229   : > { %v1757_v11 = vpack.c.b16 %v1732_v45, %v1731_v31  ;;  %v1691_v14 = vsel %vm6923_vm8, %v1686_v24, %v1690_v37  ;;  %v7535_v15 = vpack.c.b16 %v2309_v46, %v2308_v38  ;;  %v2865_v1 = vshll.u32 %v7525_v2, 16 }
 0x22a   : > { %v1675_v13 = vor.u32 %v1674_v62, %v1671_v30  ;;  %v2871_v6 = vshll.u32 %v7292_v51, 16  ;;  %v2875_v30 = vshrl.u32 %v7292_v51, 16  ;;  %v2225_v62 = vrot.slane %v7445_v33, 5 }
 0x22b   : > { %5719 = vmatmul.msk.bf16.gmra.mxu1 %vm1773_vm10, %v1757_v11  ;;  %v1106_v56 = vpop.permute.xlu1 %1105  ;;  %v1693_v37 = vshrl.u32 %v1309_v50, 16  ;;  %v1748_v2 = vunpack.c.l.b16 %v1691_v14  ;;  %v1696_v11 = vshll.u32 %v1309_v50, 16  ;;  %v2223_v51 = vsel %vm7083_vm15, %v5818_v27, %v2222_v9 }
 0x22c   : > { %v1676_v3 = vrot.slane %v1675_v13, 4  ;;  %v1270_v31 = vsel %vm6944_vm9, %v1106_v56, %v1269_v42  ;;  %v1104_v45 = vpop.permute.xlu0 %1103  ;;  %v7540_v36 = vld [vmem:[#allocation2 + $0x5c] sm:$0x1]  ;;  %v1508_v33 = vrot.slane %v1507_v35, 4  ;;  %v1518_v42 = vrot.slane %v1517_v23, 4 }
 0x22d   : > { %1271 = vst [vmem:[#allocation2 + $0xbc] sm:$0x1] %v1270_v31  ;;  %v1520_v8 = vshll.u32 %v7540_v36, 16  ;;  %6057 = vmatmul.msk.bf16.vlgmr.msra.gmra.mxu0 %vm1773_vm10, %v6175_v63  ;;  %v2224_v38 = vrot.slane %v2222_v9, 4  ;;  %v2877_v56 = vrot.slane %v2875_v30, 4  ;;  %v2310_v31 = vunpack.c.l.b16 %v2223_v51 }
 0x22e   : > { %v1681_v24 = vsel %vm6923_vm8, %v1676_v3, %v7503_v22  ;;  %1268 = vst.msk [vmem:[#allocation2 + $0xb8] sm:$0xf] %vm654_vm5, %v1104_v45  ;;  %v7554_v22 = vrot.slane %v2871_v6, 5  ;;  %v7556_v3 = vld [vmem:[#allocation2 + $0x64] sm:$0xf]  ;;  %v1513_v14 = vsel %vm6923_vm8, %v1508_v33, %v7517_v61  ;;  %v1525_v45 = vshrl.u32 %v1295_v20, 16 }
 0x22f   : > { %v1747_v7 = vunpack.c.l.b16 %v1681_v24  ;;  %v1522_v13 = vrot.slane %v1520_v8, 5  ;;  %v2226_v35 = vsel %vm7083_vm15, %v2224_v38, %v2225_v62  ;;  %v1695_v23 = vrot.slane %v1693_v37, 4  ;;  %v6174_v61 = vld [vmem:[#allocation8 + $0x28] sm:$0xff] }
 0x230   : > { %v1698_v27 = vrot.slane %v1696_v11, 5  ;;  %v1528_v9 = vshll.u32 %v1295_v20, 16  ;;  %v2311_v63 = vunpack.c.l.b16 %v2226_v35  ;;  %v2881_v6 = vshll.u32 %v7297_v54, 16  ;;  %3759 = vmatpush.bf16.msra.mxu3 %v6174_v61  ;;  %v7573_v35 = vld [vmem:[#allocation2 + $0x68] sm:$0x1] }
 0x231   : > { %v1765_v46 = vpack.c.b16 %v1748_v2, %v1747_v7  ;;  %v1523_v50 = vsel %vm6923_vm8, %v1518_v42, %v1522_v13  ;;  %v1534_v30 = vshll.u32 %v7556_v3, 16  ;;  %v1538_v24 = vshrl.u32 %v7556_v3, 16 }
 0x232   : > { %v1734_v8 = vunpack.c.l.b16 %v1523_v50  ;;  %v2864_v2 = vrot.slane %v2862_v10, 4  ;;  %v2867_v51 = vrot.slane %v2865_v1, 5  ;;  %v7569_v33 = vpack.c.b16 %v2311_v63, %v2310_v31  ;;  %v6193_v63 = vld [vmem:[#allocation8 + $0x40] sm:$0xff] }
 0x233   : > { %5727 = vmatmul.msk.bf16.gmra.mxu3 %vm1773_vm10, %v1765_v46  ;;  %v1733_v42 = vunpack.c.l.b16 %v1513_v14  ;;  %v2878_v37 = vor.u32 %v2877_v56, %v7554_v22  ;;  %v1527_v11 = vrot.slane %v1525_v45, 4  ;;  %v2229_v54 = vrot.slane %v7457_v28, 5  ;;  %5110 = vmatpush.bf16.msra.mxu2 %v6193_v63 }
 0x234   : > { %v1328_v7 = vld [vmem:[#allocation2 + $0xbc] sm:$0x1]  ;;  %v1699_v20 = vor.u32 %v1698_v27, %v1695_v23  ;;  %v1530_v50 = vrot.slane %v1528_v9, 5  ;;  %v2232_v10 = vrot.slane %v7491_v57, 5  ;;  %v7577_v31 = vrot.slane %v1534_v30, 5 }
 0x235   : > { %v6152_v62 = vld [vmem:[#allocation2 + $0xb4] sm:$0xff]  ;;  %v1712_v1 = vshll.u32 %v1328_v7, 16  ;;  %v1540_v14 = vrot.slane %v1538_v24, 4  ;;  %v1758_v56 = vpack.c.b16 %v1734_v8, %v1733_v42  ;;  %v2868_v28 = vor.u32 %v2867_v51, %v2864_v2  ;;  %v2140_v9 = vld [vmem:[#allocation2 + $0x48] sm:$0xe] }
 0x236   : > { %v1310_v13 = vld [vmem:[#allocation2 + $0xb8] sm:$0xf]  ;;  %5812 = vmatmul.msk.bf16.gmra.mxu2 %vm1773_vm10, %v6152_v62  ;;  %v2879_v23 = vrot.slane %v2878_v37, 4  ;;  %v1544_v27 = vshll.u32 %v7573_v35, 16  ;;  %v1700_v57 = vrot.slane %v1699_v20, 4  ;;  %v1531_v30 = vor.u32 %v1530_v50, %v1527_v11  ;;  %v6176_v51 = vld [vmem:[#allocation2 + $0x24] sm:$0xff] }
 0x237   : > { %v1702_v38 = vshll.u32 %v1310_v13, 16  ;;  %v1706_v46 = vshrl.u32 %v1310_v13, 16  ;;  %v2231_v13 = vrot.slane %v2229_v54, 4  ;;  %v5819_v62 = vrot.slane %v2140_v9, 9  ;;  %v2816_v42 = vld [vmem:[#allocation2 + $0x18] sm:$0xf] }
 0x238   : > { %v7579_v32 = vpop.f32.mrf.mxu2  ;;  %v1714_v24 = vrot.slane %v1712_v1, 5  ;;  %v2883_v39 = vrot.slane %v2881_v6, 5  ;;  %v1541_v8 = vor.u32 %v1540_v14, %v7577_v31  ;;  %v2869_v11 = vrot.slane %v2868_v28, 4  ;;  %v6289_v28 = vld [vmem:[#allocation2 + $0x4] sm:$0xf] }
 0x239   : > { %v1704_v45 = vrot.slane %v1702_v38, 5  ;;  %v1708_v61 = vrot.slane %v1706_v46, 4  ;;  %v6192_v38 = vld [vmem:[#allocation8 + $0x38] sm:$0xff]  ;;  %v2233_v2 = vsel %vm7083_vm15, %v2231_v13, %v2232_v10  ;;  %v2230_v20 = vsel %vm7083_vm15, %v5819_v62, %v2229_v54  ;;  %v2817_v54 = vld [vmem:[#allocation2 + $0x1c] sm:$0xf] }
 0x23a   : > { %v2313_v63 = vunpack.c.l.b16 %v2233_v2  ;;  %v2884_v6 = vsel %vm6923_vm8, %v2879_v23, %v2883_v39  ;;  %v1546_v50 = vrot.slane %v1544_v27, 5  ;;  %4708 = vmatpush.bf16.msra.mxu1 %v6192_v38  ;;  %v2312_v1 = vunpack.c.l.b16 %v2230_v20 }
 0x23b   : > { %5720 = vmatmul.msk.bf16.gmra.mxu1 %vm1773_vm10, %v1758_v56  ;;  %v1709_v7 = vor.u32 %v1708_v61, %v1704_v45  ;;  %v1705_v37 = vsel %vm6923_vm8, %v1700_v57, %v1704_v45  ;;  %v1532_v14 = vrot.slane %v1531_v30, 4  ;;  %v2886_v56 = vshrl.u32 %v2816_v42, 16 }
 0x23c   : > { %v2889_v45 = vshll.u32 %v2816_v42, 16  ;;  %v1749_v61 = vunpack.c.l.b16 %v1705_v37  ;;  %v1542_v13 = vrot.slane %v1541_v8, 4  ;;  %v7595_v57 = vpack.c.b16 %v2313_v63, %v2312_v1  ;;  %v6290_v37 = vld [vmem:[#allocation2 + $0x8] sm:$0x1]  ;;  %v2818_v1 = vld [vmem:[#allocation2 + $0x20] sm:$0x1] }
 0x23d   : > { %v1710_v46 = vrot.slane %v1709_v7, 4  ;;  %6058 = vmatmul.msk.bf16.gmra.mxu0 %vm1773_vm10, %v6176_v51  ;;  %v2874_v39 = vsel %vm6923_vm8, %v2869_v11, %v7554_v22  ;;  %v2187_v23 = vrot.slane %v6289_v28, 5  ;;  %v3249_v62 = vunpack.c.l.b16 %v2884_v6 }
 0x23e   : > { %v1547_v30 = vsel %vm6923_vm8, %v1542_v13, %v1546_v50  ;;  %v2888_v42 = vrot.slane %v2886_v56, 4  ;;  %v2891_v38 = vrot.slane %v2889_v45, 5  ;;  %v2895_v8 = vshll.u32 %v2817_v54, 16 }
 0x23f   : > { %v1715_v10 = vsel %vm6923_vm8, %v1710_v46, %v1714_v24  ;;  %v2134_v24 = vld [vmem:[#allocation2] sm:$0xe]  ;;  %v2899_v2 = vshrl.u32 %v2817_v54, 16  ;;  %v3248_v51 = vunpack.c.l.b16 %v2874_v39  ;;  %v1537_v22 = vsel %vm6923_vm8, %v1532_v14, %v7577_v31 }
 0x240   : > { %v1750_v9 = vunpack.c.l.b16 %v1715_v10  ;;  %v7600_v27 = vpop.f32.mrf.mxu2  ;;  %v2190_v46 = vrot.slane %v6290_v37, 5  ;;  %v1736_v20 = vunpack.c.l.b16 %v1547_v30  ;;  %v5813_v63 = vrot.slane %v2134_v24, 9  ;;  %v6177_v30 = vld [vmem:[#allocation2 + $0x30] sm:$0xff] }
 0x241   : > { %v2189_v11 = vrot.slane %v2187_v23, 4  ;;  %v3280_v6 = vpack.c.b16 %v3249_v62, %v3248_v51  ;;  %v1735_v50 = vunpack.c.l.b16 %v1537_v22  ;;  %v2892_v10 = vor.u32 %v2891_v38, %v2888_v42  ;;  %v2819_v62 = vld [vmem:[#allocation2 + $0x24] sm:$0xf]  ;;  %v2820_v51 = vld [vmem:[#allocation2 + $0x28] sm:$0xf] }
 0x242   : > { %v1766_v7 = vpack.c.b16 %v1750_v9, %v1749_v61  ;;  %v2897_v56 = vrot.slane %v2895_v8, 5  ;;  %v2901_v45 = vrot.slane %v2899_v2, 4  ;;  %v2188_v9 = vsel %vm7083_vm15, %v5813_v63, %v2187_v23 }
 0x243   : > { %v1759_v61 = vpack.c.b16 %v1736_v20, %v1735_v50  ;;  %v2191_v31 = vsel %vm7083_vm15, %v2189_v11, %v2190_v46  ;;  %v2905_v14 = vshll.u32 %v2818_v1, 16  ;;  %v2893_v54 = vrot.slane %v2892_v10, 4  ;;  %v7623_v1 = vpop.f32.mrf.mxu0 }
 0x244   : > { %5728 = vmatmul.msk.bf16.gmra.mxu3 %vm1773_vm10, %v1766_v7  ;;  %v2902_v39 = vor.u32 %v2901_v45, %v2897_v56  ;;  %v2300_v28 = vunpack.c.l.b16 %v2188_v9  ;;  %v2301_v7 = vunpack.c.l.b16 %v2191_v31  ;;  %v2910_v38 = vshrl.u32 %v2819_v62, 16  ;;  %v6156_v31 = vld [vmem:[#allocation2 + $0xc] sm:$0xff] }
 0x245   : > { %v2907_v24 = vrot.slane %v2905_v14, 5  ;;  %v2898_v23 = vsel %vm6923_vm8, %v2893_v54, %v2897_v56  ;;  %v2913_v8 = vshll.u32 %v2819_v62, 16  ;;  %v2919_v11 = vshll.u32 %v2820_v51, 16  ;;  %v2821_v56 = vld [vmem:[#allocation2 + $0x2c] sm:$0x1] }
 0x246   : > { %5937 = vmatmul.msk.bf16.vlgmr.msrb.gmra.mxu2 %vm1773_vm10, %v3280_v6  ;;  %v2903_v42 = vrot.slane %v2902_v39, 4  ;;  %v2332_v2 = vpack.c.b16 %v2301_v7, %v2300_v28  ;;  %v3250_v46 = vunpack.c.l.b16 %v2898_v23  ;;  %v2912_v20 = vrot.slane %v2910_v38, 4  ;;  %v2822_v7 = vld [vmem:[#allocation2 + $0x30] sm:$0xf] }
 0x247   : > { %v2915_v63 = vrot.slane %v2913_v8, 5  ;;  %v2923_v6 = vshrl.u32 %v2820_v51, 16  ;;  %v2929_v14 = vshll.u32 %v2821_v56, 16  ;;  %v2934_v23 = vshrl.u32 %v2822_v7, 16  ;;  %v2823_v51 = vld [vmem:[#allocation2 + $0x34] sm:$0xf] }
 0x248   : > { %v7613_v13 = vpop.f32.mrf.mxu2  ;;  %v2908_v22 = vsel %vm6923_vm8, %v2903_v42, %v2907_v24  ;;  %v2937_v42 = vshll.u32 %v2822_v7, 16  ;;  %v6291_v7 = vld [vmem:[%s8883_s2] ss:$0 sm:$0xff]  ;;  %v2239_v44 = vrot.slane %v7540_v36, 5 }
 0x249   : > { %v3251_v50 = vunpack.c.l.b16 %v2908_v22  ;;  %v2916_v45 = vor.u32 %v2915_v63, %v2912_v20  ;;  %v2925_v9 = vrot.slane %v2923_v6, 4  ;;  %v2931_v24 = vrot.slane %v2929_v14, 5 }
 0x24a   : > { %v2936_v63 = vrot.slane %v2934_v23, 4  ;;  %v2943_v6 = vshll.u32 %v2823_v51, 16  ;;  %v6157_v23 = vld [vmem:[#allocation2 + $0x18] sm:$0xff] }
 0x24b   : > { %5721 = vmatmul.msk.bf16.gmra.mxu1 %vm1773_vm10, %v1759_v61  ;;  %v3281_v10 = vpack.c.b16 %v3251_v50, %v3250_v46  ;;  %v2921_v61 = vrot.slane %v2919_v11, 5  ;;  %v2917_v39 = vrot.slane %v2916_v45, 4  ;;  %v2939_v11 = vrot.slane %v2937_v42, 5 }
 0x24c   : > { %v2947_v50 = vshrl.u32 %v2823_v51, 16 }
 0x24d   : > { %6059 = vmatmul.msk.bf16.gmra.mxu0 %vm1773_vm10, %v6177_v30  ;;  %v2926_v28 = vor.u32 %v2925_v9, %v2921_v61  ;;  %v6178_v30 = vld [vmem:[#allocation2 + $0x3c] sm:$0xff]  ;;  %v2922_v38 = vsel %vm6923_vm8, %v2917_v39, %v2921_v61  ;;  %v2824_v9 = vld [vmem:[#allocation2 + $0x38] sm:$0x1]  ;;  %v2945_v39 = vrot.slane %v2943_v6, 5 }
 0x24e   : > { %v3252_v20 = vunpack.c.l.b16 %v2922_v38  ;;  %v2953_v42 = vshll.u32 %v2824_v9, 16 }
 0x24f   : > { %v2927_v8 = vrot.slane %v2926_v28, 4  ;;  %v2949_v28 = vrot.slane %v2947_v50, 4 }
 0x250   : > { %v7621_v37 = vpop.f32.mrf.mxu2  ;;  %v2955_v6 = vrot.slane %v2953_v42, 5 }
 0x251   : > { %v2932_v22 = vsel %vm6923_vm8, %v2927_v8, %v2931_v24  ;;  %v2950_v51 = vor.u32 %v2949_v28, %v2945_v39 }
 0x252   : > { %v3253_v56 = vunpack.c.l.b16 %v2932_v22  ;;  %v2825_v22 = vld [vmem:[#allocation2 + $0x3c] sm:$0xf] }
 0x253   : > { %v2951_v9 = vrot.slane %v2950_v51, 4 }
 0x254   : > { %5833 = vmatmul.msk.bf16.vlgmr.msrb.gmra.mxu3 %vm1773_vm10, %v2332_v2  ;;  %v7631_v2 = vpop.f32.mrf.mxu1  ;;  %v3282_v61 = vpack.c.b16 %v3253_v56, %v3252_v20  ;;  %v6292_v20 = vld [vmem:[%s8884_s3] ss:$0 sm:$0xff]  ;;  %v2958_v56 = vshrl.u32 %v2825_v22, 16 }
 0x256   : > { %5938 = vmatmul.msk.bf16.gmra.mxu2 %vm1773_vm10, %v3281_v10 }
 0x258   : > { %v2099_v54 = vpop.f32.mrf.mxu2 }
 0x25a   : > { %v2064_v62 = vpop.f32.mrf.mxu0 }
 0x25b   : > { %5917 = vmatmul.msk.bf16.vlgmr.msrb.gmra.mxu1 %vm1773_vm10, %v6156_v31  ;;  %v2940_v31 = vor.u32 %v2939_v11, %v2936_v63  ;;  %v6179_v11 = vld [vmem:[#allocation2 + $0x48] sm:$0xff] }
 0x25d   : > { %6060 = vmatmul.msk.bf16.gmra.mxu0 %vm1773_vm10, %v6178_v30  ;;  %v585_v30 = vmul.f32 %v6291_v7, %v7288_v48  ;;  %v2941_v8 = vrot.slane %v2940_v31, 4  ;;  %v2826_v31 = vld [vmem:[#allocation2 + $0x40] sm:$0xf] }
 0x25f   : > { %v621_v48 = vadd.f32 %v6292_v20, %v585_v30  ;;  %v2946_v50 = vsel %vm6923_vm8, %v2941_v8, %v2945_v39  ;;  %v2960_v39 = vrot.slane %v2958_v56, 4 }
 0x260   : > { %v2101_v46 = vpop.f32.mrf.mxu2 }
 0x261   : > { %v7656_v28 = vmax.f32 %v621_v48, 0.0 }
 0x262   : > { %v2066_v10 = vpop.f32.mrf.mxu0 }
 0x263   : > { %8969 = vst [vmem:[#allocation46_spill] sm:$0xff] %v7656_v28  ;;  %v741_v51 = vpack.c.bf16 %v7656_v28, %v7656_v28 }
 0x264   : > { %5834 = vmatmul.msk.bf16.gmra.mxu3 %vm1773_vm10, %v7115_v16 }
 0x266   : > { %v1876_v45 = vpop.f32.mrf.mxu3  ;;  %5939 = vmatmul.msk.bf16.gmra.mxu2 %vm1773_vm10, %v3282_v61 }
 0x267   : > { %v7637_v14 = vadd.f32 %v2099_v54, %v1876_v45  ;;  %v584_v54 = vmul.f32 %v6291_v7, %v7277_v12  ;;  %v2961_v45 = vshll.u32 %v2825_v22, 16  ;;  %v2967_v22 = vshll.u32 %v2826_v31, 16 }
 0x268   : > { %v1841_v24 = vpop.f32.mrf.mxu1  ;;  %v2104_v38 = vpop.f32.mrf.mxu2 }
 0x269   : > { %v7644_v16 = vadd.f32 %v2064_v62, %v1841_v24  ;;  %v620_v61 = vadd.f32 %v6292_v20, %v584_v54  ;;  %v2956_v24 = vsel %vm6923_vm8, %v2951_v9, %v2955_v6  ;;  %v2963_v8 = vrot.slane %v2961_v45, 5 }
 0x26a   : > { %v2069_v63 = vpop.f32.mrf.mxu0  ;;  %v2971_v54 = vshrl.u32 %v2826_v31, 16 }
 0x26b   : > { %5918 = vmatmul.msk.bf16.gmra.mxu1 %vm1773_vm10, %v6157_v23  ;;  %v3254_v23 = vunpack.c.l.b16 %v2946_v50  ;;  %v2964_v6 = vor.u32 %v2963_v8, %v2960_v39  ;;  %v2969_v50 = vrot.slane %v2967_v22, 5  ;;  %v2828_v39 = vld [vmem:[#allocation2 + $0x48] sm:$0xf] }
 0x26c   : > { %v2973_v9 = vrot.slane %v2971_v54, 4 }
 0x26d   : > { %6061 = vmatmul.msk.bf16.gmra.mxu0 %vm1773_vm10, %v6179_v11  ;;  %v2965_v60 = vrot.slane %v2964_v6, 4 }
 0x26e   : > { %v1878_v62 = vpop.f32.mrf.mxu3 }
 0x26f   : > { %v7653_v12 = vadd.f32 %v2101_v46, %v1878_v62  ;;  %v7662_v46 = vmax.f32 %v620_v61, 0.0  ;;  %v2827_v62 = vld [vmem:[#allocation2 + $0x44] sm:$0x1]  ;;  %v1009_v61 = vshrl.u32 %v741_v51, 16 }
 0x270   : > { %v1843_v7 = vpop.f32.mrf.mxu1  ;;  %v2106_v42 = vpop.f32.mrf.mxu2  ;;  %v2977_v28 = vshll.u32 %v2827_v62, 16 }
 0x271   : > { %v7658_v30 = vadd.f32 %v2066_v10, %v1843_v7  ;;  %8970 = vst [vmem:[#allocation47_spill] sm:$0xff] %v7662_v46  ;;  %v3255_v10 = vunpack.c.l.b16 %v2956_v24  ;;  %v740_v56 = vpack.c.bf16 %v7662_v46, %v7662_v46  ;;  %v7676_v54 = vrot.slane %v1009_v61, 7 }
 0x272   : > { %v2071_v20 = vpop.f32.mrf.mxu0 }
 0x273   : > { %v3283_v11 = vpack.c.b16 %v3255_v10, %v3254_v23  ;;  %v2974_v23 = vor.u32 %v2973_v9, %v2969_v50  ;;  %v1001_v8 = vshrl.u32 %v740_v56, 16  ;;  %v1004_v22 = vshll.u32 %v740_v56, 16  ;;  %v6180_v10 = vld [vmem:[#allocation2 + $0x54] sm:$0xff] }
 0x274   : > { %5835 = vmatmul.msk.bf16.gmra.mxu3 %vm1773_vm10, %v7402_v25  ;;  %v6158_v25 = vld [vmem:[#allocation2 + $0x24] sm:$0xff]  ;;  %v2985_v56 = vshll.u32 %v2828_v39, 16 }
 0x275   : > { %v1003_v46 = vrot.slane %v1001_v8, 7  ;;  %v2975_v62 = vrot.slane %v2974_v23, 4 }
 0x276   : > { %v1881_v48 = vpop.f32.mrf.mxu3  ;;  %5940 = vmatmul.msk.bf16.gmra.mxu2 %vm1773_vm10, %v3283_v11 }
 0x277   : > { %v7670_v45 = vadd.f32 %v2104_v38, %v1881_v48  ;;  %v1012_v38 = vshll.u32 %v741_v51, 16  ;;  %v2979_v48 = vrot.slane %v2977_v28, 5  ;;  %v1006_v61 = vor.u32 %v1004_v22, %v1003_v46 }
 0x278   : > { %v1846_v31 = vpop.f32.mrf.mxu1  ;;  %v2109_v24 = vpop.f32.mrf.mxu2  ;;  %v2991_v22 = vshll.u32 %v2829_v4, 16 }
 0x279   : > { %v7673_v7 = vadd.f32 %v2069_v63, %v1846_v31  ;;  %v2970_v63 = vsel %vm6923_vm8, %v2965_v60, %v2969_v50  ;;  %v2982_v31 = vshrl.u32 %v2828_v39, 16  ;;  %v1014_v6 = vor.u32 %v1012_v38, %v7676_v54  ;;  %1107 = vrot.lane.b32.xlu0 %v1006_v61, %s6574_s13 }
 0x27a   : > { %v2074_v58 = vpop.f32.mrf.mxu0  ;;  %v2980_v8 = vsel %vm6923_vm8, %v2975_v62, %v2979_v48  ;;  %v2987_v39 = vrot.slane %v2985_v56, 5  ;;  %v2830_v48 = vld [vmem:[#allocation2 + $0x50] sm:$0x1]  ;;  %v2993_v52 = vrot.slane %v2991_v22, 5  ;;  %v2831_v22 = vld [vmem:[#allocation2 + $0x54] sm:$0xf] }
 0x27b   : > { %5919 = vmatmul.msk.bf16.gmra.mxu1 %vm1773_vm10, %v6158_v25  ;;  %v1007_v25 = vrot.slane %v1003_v46, 4  ;;  %v2984_v23 = vrot.slane %v2982_v31, 4  ;;  %v2995_v46 = vshrl.u32 %v2829_v4, 16  ;;  %v6159_v56 = vld [vmem:[#allocation2 + $0x30] sm:$0xff]  ;;  %v3001_v4 = vshll.u32 %v2830_v48, 16 }
 0x27d   : > { %6062 = vmatmul.msk.bf16.gmra.mxu0 %vm1773_vm10, %v6180_v10  ;;  %v1015_v60 = vsel %vm6806_vm3, %v1007_v25, %v1014_v6  ;;  %v2988_v62 = vor.u32 %v2987_v39, %v2984_v23  ;;  %v2997_v6 = vrot.slane %v2995_v46, 4 }
 0x27e   : > { %v1883_v11 = vpop.f32.mrf.mxu3  ;;  %1109 = vrot.lane.b32.xlu1 %v1015_v60, %s6574_s13  ;;  %v3003_v60 = vrot.slane %v3001_v4, 5 }
 0x27f   : > { %v7681_v9 = vadd.f32 %v2106_v42, %v1883_v11  ;;  %v3256_v42 = vunpack.c.l.b16 %v2970_v63 }
 0x280   : > { %v1848_v51 = vpop.f32.mrf.mxu1  ;;  %v2111_v50 = vpop.f32.mrf.mxu2 }
 0x281   : > { %v7684_v28 = vadd.f32 %v2071_v20, %v1848_v51  ;;  %v3257_v20 = vunpack.c.l.b16 %v2980_v8  ;;  %v2998_v51 = vor.u32 %v2997_v6, %v2993_v52  ;;  %v6181_v8 = vld [vmem:[#allocation2 + $0x60] sm:$0xff] }
 0x282   : > { %v2076_v61 = vpop.f32.mrf.mxu0 }
 0x283   : > { %v3284_v10 = vpack.c.b16 %v3257_v20, %v3256_v42  ;;  %v2832_v42 = vld [vmem:[#allocation2 + $0x58] sm:$0xf] }
 0x284   : > { %5836 = vmatmul.msk.bf16.gmra.mxu3 %vm1773_vm10, %v7485_v18  ;;  %v2989_v18 = vrot.slane %v2988_v62, 4  ;;  %v3019_v48 = vshrl.u32 %v2832_v42, 16 }
 0x286   : > { %v1886_v38 = vpop.f32.mrf.mxu3  ;;  %5941 = vmatmul.msk.bf16.gmra.mxu2 %vm1773_vm10, %v3284_v10  ;;  %v2994_v39 = vsel %vm6923_vm8, %v2989_v18, %v2993_v52  ;;  %v3015_v10 = vshll.u32 %v2832_v42, 16  ;;  %v2833_v52 = vld [vmem:[#allocation2 + $0x5c] sm:$0x1] }
 0x287   : > { %v7694_v11 = vadd.f32 %v2109_v24, %v1886_v38 }
 0x288   : > { %v1851_v63 = vpop.f32.mrf.mxu1  ;;  %v2114_v25 = vpop.f32.mrf.mxu2  ;;  %v3017_v18 = vrot.slane %v3015_v10, 5 }
 0x289   : > { %v7697_v31 = vadd.f32 %v2074_v58, %v1851_v63  ;;  %v2999_v58 = vrot.slane %v2998_v51, 4  ;;  %v3258_v63 = vunpack.c.l.b16 %v2994_v39  ;;  %v3021_v51 = vrot.slane %v3019_v48, 4 }
 0x28a   : > { %v2079_v62 = vpop.f32.mrf.mxu0 }
 0x28b   : > { %5920 = vmatmul.msk.bf16.gmra.mxu1 %vm1773_vm10, %v6159_v56  ;;  %v3004_v38 = vsel %vm6923_vm8, %v2999_v58, %v3003_v60  ;;  %v3009_v56 = vshll.u32 %v2831_v22, 16  ;;  %v3025_v60 = vshll.u32 %v2833_v52, 16  ;;  %v6160_v58 = vld [vmem:[#allocation2 + $0x3c] sm:$0xff]  ;;  %v2835_v52 = vld [vmem:[#allocation2 + $0x64] sm:$0xf] }
 0x28c   : > { %v3259_v4 = vunpack.c.l.b16 %v3004_v38 }
 0x28d   : > { %6063 = vmatmul.msk.bf16.gmra.mxu0 %vm1773_vm10, %v6181_v8  ;;  %v3027_v10 = vrot.slane %v3025_v60, 5  ;;  %v3039_v60 = vshll.u32 %v2835_v52, 16 }
 0x28e   : > { %v1888_v24 = vpop.f32.mrf.mxu3 }
 0x28f   : > { %v7700_v23 = vadd.f32 %v2111_v50, %v1888_v24  ;;  %v3006_v50 = vshrl.u32 %v2831_v22, 16  ;;  %v3022_v22 = vor.u32 %v3021_v51, %v3017_v18 }
 0x290   : > { %v1853_v46 = vpop.f32.mrf.mxu1  ;;  %v2116_v6 = vpop.f32.mrf.mxu2 }
 0x291   : > { %v7705_v20 = vadd.f32 %v2076_v61, %v1853_v46  ;;  %v3285_v61 = vpack.c.b16 %v3259_v4, %v3258_v63  ;;  %v3008_v24 = vrot.slane %v3006_v50, 4  ;;  %v3011_v46 = vrot.slane %v3009_v56, 5  ;;  %v2834_v50 = vld [vmem:[#allocation2 + $0x60] sm:$0xf] }
 0x292   : > { %v2081_v48 = vpop.f32.mrf.mxu0  ;;  %v3023_v63 = vrot.slane %v3022_v22, 4  ;;  %v2836_v22 = vld [vmem:[#allocation2 + $0x68] sm:$0x1] }
 0x293   : > { %v3012_v47 = vor.u32 %v3011_v46, %v3008_v24  ;;  %v3033_v46 = vshll.u32 %v2834_v50, 16 }
 0x294   : > { %5837 = vmatmul.msk.bf16.gmra.mxu3 %vm1773_vm10, %v7535_v15  ;;  %v1016_v15 = vrot.slane %v7676_v54, 4  ;;  %v3028_v54 = vsel %vm6923_vm8, %v3023_v63, %v3027_v10  ;;  %v3041_v10 = vrot.slane %v3039_v60, 5  ;;  %v6183_v60 = vld [vmem:[#allocation2 + $0x78] sm:$0xff] }
 0x295   : > { %v3013_v4 = vrot.slane %v3012_v47, 4  ;;  %v3261_v47 = vunpack.c.l.b16 %v3028_v54  ;;  %v6161_v54 = vld [vmem:[#allocation2 + $0x48] sm:$0xff] }
 0x296   : > { %v1891_v8 = vpop.f32.mrf.mxu3  ;;  %5942 = vmatmul.msk.bf16.gmra.mxu2 %vm1773_vm10, %v3285_v61  ;;  %1111 = vrot.lane.b32.xlu2 %v1016_v15, %s6574_s13  ;;  %v3030_v61 = vshrl.u32 %v2834_v50, 16  ;;  %s8597_s13 = scalar_lea.vmem [#allocation11], %s5680_s16  ;;  %s6511_s16 = scalar_lea.hbm %s8888_s7, 512 }
 0x297   : > { %v7711_v17 = vadd.f32 %v2114_v25, %v1891_v8  ;;  %v6182_v25 = vld [vmem:[#allocation2 + $0x6c] sm:$0xff]  ;;  %v3018_v8 = vsel %vm6923_vm8, %v3013_v4, %v3017_v18  ;;  %s5565_s9 = sshll.u32 %s8597_s13, 4  ;;  %p6513_p9 = scmp.lt.s32.totalorder %s6511_s16, %s6507_s12  ;;  %s5566_s9 = int_to_ptr.vmem [resolvable:$true] %s5565_s9 }
 0x298   : > { %v1856_v42 = vpop.f32.mrf.mxu1  ;;  %v2119_v38 = vpop.f32.mrf.mxu2  ;;  %v3032_v15 = vrot.slane %v3030_v61, 4 }
 0x299   : > { %v7714_v39 = vadd.f32 %v2079_v62, %v1856_v42  ;;  %v3043_v42 = vshrl.u32 %v2835_v52, 16  ;;  %p6514_p2 = por %p6513_p9, %p6512_p11 }
 0x29b   : > { %5921 = vmatmul.msk.bf16.gmra.mxu1 %vm1773_vm10, %v6160_v58  ;;  %v3045_v63 = vrot.slane %v3043_v42, 4  ;;  %p6515_p10 = pnand %p6514_p2, %p6510_p8 }
 0x29d   : > { %6064 = vmatmul.msk.bf16.gmra.mxu0 %vm1773_vm10, %v6182_v25  ;;  %v3035_v25 = vrot.slane %v3033_v46, 5  ;;  %v2838_v46 = vld [vmem:[#allocation2 + $0x70] sm:$0xf] }
 0x29e   : > { %v1893_v56 = vpop.f32.mrf.mxu3 }
 0x29f   : > { %v7719_v62 = vadd.f32 %v2116_v6, %v1893_v56  ;;  %v3260_v6 = vunpack.c.l.b16 %v3018_v8  ;;  %v2084_v56 = vpop.f32.mrf.mxu0 }
 0x2a0   : > { %v1858_v51 = vpop.f32.mrf.mxu1  ;;  %v2121_v58 = vpop.f32.mrf.mxu2 }
 0x2a1   : > { %v7726_v24 = vadd.f32 %v2081_v48, %v1858_v51  ;;  %v3286_v18 = vpack.c.b16 %v3261_v47, %v3260_v6  ;;  %v3049_v48 = vshll.u32 %v2836_v22, 16  ;;  %v3036_v51 = vor.u32 %v3035_v25, %v3032_v15  ;;  %v2837_v6 = vld [vmem:[#allocation2 + $0x6c] sm:$0xf] }
 0x2a2   : > { %v3063_v22 = vshll.u32 %v2838_v46, 16  ;;  %v3067_v15 = vshrl.u32 %v2838_v46, 16 }
 0x2a3   : > { %v3051_v61 = vrot.slane %v3049_v48, 5  ;;  %v3037_v42 = vrot.slane %v3036_v51, 4 }
 0x2a4   : > { %5838 = vmatmul.msk.bf16.gmra.mxu3 %vm1773_vm10, %v7569_v33  ;;  %v3046_v33 = vor.u32 %v3045_v63, %v3041_v10  ;;  %v3065_v51 = vrot.slane %v3063_v22, 5  ;;  %v6162_v22 = vld [vmem:[#allocation2 + $0x54] sm:$0xff] }
 0x2a6   : > { %v1896_v53 = vpop.f32.mrf.mxu3  ;;  %5943 = vmatmul.msk.bf16.gmra.mxu2 %vm1773_vm10, %v3286_v18  ;;  %v3047_v21 = vrot.slane %v3046_v33, 4  ;;  %v3042_v18 = vsel %vm6923_vm8, %v3037_v42, %v3041_v10  ;;  %v3069_v33 = vrot.slane %v3067_v15, 4 }
 0x2a7   : > { %v7730_v4 = vadd.f32 %v2119_v38, %v1896_v53  ;;  %v2086_v25 = vpop.f32.mrf.mxu0 }
 0x2a8   : > { %v1861_v50 = vpop.f32.mrf.mxu1  ;;  %v2124_v8 = vpop.f32.mrf.mxu2  ;;  %v3052_v38 = vsel %vm6923_vm8, %v3047_v21, %v3051_v61  ;;  %v3262_v21 = vunpack.c.l.b16 %v3042_v18  ;;  %v2236_v61 = vrot.slane %v7500_v43, 5  ;;  %v3070_v42 = vor.u32 %v3069_v33, %v3065_v51 }
 0x2a9   : > { %v7733_v52 = vadd.f32 %v2084_v56, %v1861_v50  ;;  %v3263_v50 = vunpack.c.l.b16 %v3052_v38 }
 0x2aa   : > { %v3071_v36 = vrot.slane %v3070_v42, 4 }
 0x2ab   : > { %5922 = vmatmul.msk.bf16.gmra.mxu1 %vm1773_vm10, %v6161_v54  ;;  %v3054_v54 = vshrl.u32 %v2837_v6, 16 }
 0x2ad   : > { %6065 = vmatmul.msk.bf16.gmra.mxu0 %vm1773_vm10, %v6183_v60  ;;  %v3287_v60 = vpack.c.b16 %v3263_v50, %v3262_v21 }
 0x2ae   : > { %v1898_v47 = vpop.f32.mrf.mxu3 }
 0x2af   : > { %v7736_v53 = vadd.f32 %v2121_v58, %v1898_v47  ;;  %v3057_v58 = vshll.u32 %v2837_v6, 16  ;;  %v2839_v47 = vld [vmem:[#allocation2 + $0x74] sm:$0x1]  ;;  %v2141_v6 = vld [vmem:[#allocation2 + $0x54] sm:$0xe] }
 0x2b0   : > { %v1863_v63 = vpop.f32.mrf.mxu1  ;;  %v2126_v48 = vpop.f32.mrf.mxu2  ;;  %v3073_v15 = vshll.u32 %v2839_v47, 16  ;;  %v5820_v50 = vrot.slane %v2141_v6, 9  ;;  %v2841_v6 = vld [vmem:[#allocation2 + $0x7c] sm:$0xf] }
 0x2b1   : > { %v7741_v56 = vadd.f32 %v2086_v25, %v1863_v63  ;;  %v3056_v25 = vrot.slane %v3054_v54, 4  ;;  %v3059_v63 = vrot.slane %v3057_v58, 5  ;;  %v6184_v58 = vld [vmem:[#allocation2 + $0x84] sm:$0xff] }
 0x2b2   : > { %v2237_v33 = vsel %vm7083_vm15, %v5820_v50, %v2236_v61  ;;  %v3075_v21 = vrot.slane %v3073_v15, 5  ;;  %v3087_v50 = vshll.u32 %v2841_v6, 16 }
 0x2b3   : > { %v3060_v18 = vor.u32 %v3059_v63, %v3056_v25  ;;  %v2314_v42 = vunpack.c.l.b16 %v2237_v33  ;;  %v2246_v33 = vrot.slane %v7573_v35, 5 }
 0x2b4   : > { %5839 = vmatmul.msk.bf16.gmra.mxu3 %vm1773_vm10, %v7595_v57  ;;  %v2238_v57 = vrot.slane %v2236_v61, 4  ;;  %v3076_v47 = vsel %vm6923_vm8, %v3071_v36, %v3075_v21  ;;  %v2243_v36 = vrot.slane %v7556_v3, 5  ;;  %v2142_v21 = vld [vmem:[#allocation2 + $0x60] sm:$0xe] }
 0x2b5   : > { %v3061_v34 = vrot.slane %v3060_v18, 4 }
 0x2b6   : > { %v1901_v46 = vpop.f32.mrf.mxu3  ;;  %5944 = vmatmul.msk.bf16.gmra.mxu2 %vm1773_vm10, %v3287_v60  ;;  %v2240_v54 = vsel %vm7083_vm15, %v2238_v57, %v2239_v44  ;;  %v3265_v57 = vunpack.c.l.b16 %v3076_v47 }
 0x2b7   : > { %v7749_v10 = vadd.f32 %v2124_v8, %v1901_v46  ;;  %v2840_v8 = vld [vmem:[#allocation2 + $0x78] sm:$0xf]  ;;  %v2315_v60 = vunpack.c.l.b16 %v2240_v54  ;;  %v3066_v61 = vsel %vm6923_vm8, %v3061_v34, %v3065_v51  ;;  %v3091_v54 = vshrl.u32 %v2841_v6, 16 }
 0x2b8   : > { %v7751_v38 = vpop.f32.mrf.mxu1  ;;  %v3078_v25 = vshrl.u32 %v2840_v8, 16  ;;  %v3081_v63 = vshll.u32 %v2840_v8, 16  ;;  %v3089_v34 = vrot.slane %v3087_v50, 5 }
 0x2b9   : > { %8971 = vst [vmem:[#allocation48_spill] sm:$0xff] %v7749_v10  ;;  %v2129_v43 = vpop.f32.mrf.mxu2  ;;  %v3093_v51 = vrot.slane %v3091_v54, 4 }
 0x2ba   : > { %v3080_v18 = vrot.slane %v3078_v25, 4  ;;  %v6163_v25 = vld [vmem:[#allocation2 + $0x60] sm:$0xff] }
 0x2bb   : > { %5923 = vmatmul.msk.bf16.gmra.mxu1 %vm1773_vm10, %v6162_v22  ;;  %v2339_v22 = vpack.c.b16 %v2315_v60, %v2314_v42  ;;  %v2245_v42 = vrot.slane %v2243_v36, 4 }
 0x2bd   : > { %6066 = vmatmul.msk.bf16.gmra.mxu0 %vm1773_vm10, %v6184_v58  ;;  %v3264_v58 = vunpack.c.l.b16 %v3066_v61  ;;  %v2247_v35 = vsel %vm7083_vm15, %v2245_v42, %v2246_v33  ;;  %v6293_v42 = vld [vmem:[#allocation2 + $0x70] sm:$0xf] }
 0x2be   : > { %v1903_v46 = vpop.f32.mrf.mxu3 }
 0x2bf   : > { %v7759_v55 = vadd.f32 %v2126_v48, %v1903_v46  ;;  %v3083_v48 = vrot.slane %v3081_v63, 5  ;;  %v3288_v8 = vpack.c.b16 %v3265_v57, %v3264_v58  ;;  %v2842_v46 = vld [vmem:[#allocation2 + $0x80] sm:$0x1]  ;;  %v5821_v63 = vrot.slane %v2142_v21, 9  ;;  %v2843_v57 = vld [vmem:[#allocation2 + $0x84] sm:$0xf] }
 0x2c0   : > { %v7764_v44 = vpop.f32.mrf.mxu1  ;;  %v3097_v6 = vshll.u32 %v2842_v46, 16  ;;  %v3105_v21 = vshll.u32 %v2843_v57, 16 }
 0x2c1   : > { %8972 = vst [vmem:[#allocation49_spill] sm:$0xff] %v7759_v55  ;;  %v2131_v15 = vpop.f32.mrf.mxu2  ;;  %v3084_v10 = vor.u32 %v3083_v48, %v3080_v18  ;;  %v2317_v48 = vunpack.c.l.b16 %v2247_v35 }
 0x2c2   : > { %v3099_v18 = vrot.slane %v3097_v6, 5  ;;  %v2250_v6 = vrot.slane %v6293_v42, 5 }
 0x2c3   : > { %v3085_v61 = vrot.slane %v3084_v10, 4 }
 0x2c4   : > { %5840 = vmatmul.msk.bf16.gmra.mxu3 %vm1773_vm10, %v2339_v22  ;;  %v3094_v22 = vor.u32 %v3093_v51, %v3089_v34  ;;  %v2844_v51 = vld [vmem:[#allocation2 + $0x88] sm:$0xf] }
 0x2c5   : > { %v3090_v54 = vsel %vm6923_vm8, %v3085_v61, %v3089_v34  ;;  %v3107_v34 = vrot.slane %v3105_v21, 5  ;;  %v3111_v61 = vshll.u32 %v2844_v51, 16 }
 0x2c6   : > { %5945 = vmatmul.msk.bf16.gmra.mxu2 %vm1773_vm10, %v3288_v8  ;;  %v3095_v58 = vrot.slane %v3094_v22, 4  ;;  %v3102_v8 = vshrl.u32 %v2843_v57, 16  ;;  %v3115_v22 = vshrl.u32 %v2844_v51, 16 }
 0x2c7   : > { %v1906_v55 = vpop.f32.mrf.mxu3 }
 0x2c8   : > { %v7771_v60 = vadd.f32 %v2129_v43, %v1906_v55  ;;  %v7773_v47 = vpop.f32.mrf.mxu1  ;;  %v6185_v55 = vld [vmem:[#allocation2 + $0x90] sm:$0xff]  ;;  %v2244_v43 = vsel %vm7083_vm15, %v5821_v63, %v2243_v36  ;;  %v3100_v36 = vsel %vm6923_vm8, %v3095_v58, %v3099_v18  ;;  %v3266_v63 = vunpack.c.l.b16 %v3090_v54  ;;  %v2143_v58 = vld [vmem:[#allocation2 + $0x6c] sm:$0xe] }
 0x2c9   : > { %v7777_v3 = vpop.f32.mrf.mxu2  ;;  %v2316_v33 = vunpack.c.l.b16 %v2244_v43  ;;  %v3117_v18 = vrot.slane %v3115_v22, 4  ;;  %v6186_v22 = vld [vmem:[#allocation2 + $0x9c] sm:$0xff] }
 0x2ca   : > { %8973 = vst [vmem:[#allocation50_spill] sm:$0xff] %v7771_v60  ;;  %v3113_v60 = vrot.slane %v3111_v61, 5  ;;  %v7804_v61 = vpop.f32.mrf.mxu0 }
 0x2cb   : > { %5924 = vmatmul.msk.bf16.gmra.mxu1 %vm1773_vm10, %v6163_v25  ;;  %8974 = vst [vmem:[#allocation51_spill] sm:$0xff] %v7777_v3  ;;  %v2340_v25 = vpack.c.b16 %v2317_v48, %v2316_v33  ;;  %v2252_v3 = vrot.slane %v2250_v6, 4  ;;  %v6164_v33 = vld [vmem:[#allocation2 + $0x6c] sm:$0xff] }
 0x2cd   : > { %6067 = vmatmul.msk.bf16.gmra.mxu0 %vm1773_vm10, %v6185_v55  ;;  %v3104_v55 = vrot.slane %v3102_v8, 4  ;;  %v6294_v8 = vld [vmem:[#allocation2 + $0x74] sm:$0x1] }
 0x2ce   : > { %v2253_v21 = vrot.slane %v6294_v8, 5 }
 0x2cf   : > { %v1908_v50 = vpop.f32.mrf.mxu3 }
 0x2d0   : > { %v7786_v46 = vadd.f32 %v2131_v15, %v1908_v50  ;;  %v7788_v10 = vpop.f32.mrf.mxu1  ;;  %v3267_v15 = vunpack.c.l.b16 %v3100_v36  ;;  %v2845_v50 = vld [vmem:[#allocation2 + $0x8c] sm:$0x1] }
 0x2d1   : > { %v7792_v35 = vpop.f32.mrf.mxu2  ;;  %v3121_v51 = vshll.u32 %v2845_v50, 16  ;;  %v2057_v50 = vadd.f32 %v7318_v19, %v7320_v41 }
 0x2d2   : > { %8975 = vst [vmem:[#allocation52_spill] sm:$0xff] %v7786_v46  ;;  %v3289_v57 = vpack.c.b16 %v3267_v15, %v3266_v63  ;;  %v3108_v46 = vor.u32 %v3107_v34, %v3104_v55  ;;  %v2254_v63 = vsel %vm7083_vm15, %v2252_v3, %v2253_v21  ;;  %v2846_v34 = vld [vmem:[#allocation2 + $0x90] sm:$0xf] }
 0x2d3   : > { %8976 = vst [vmem:[#allocation53_spill] sm:$0xff] %v7792_v35 }
 0x2d4   : > { %5841 = vmatmul.msk.bf16.gmra.mxu3 %vm1773_vm10, %v2340_v25  ;;  %v5822_v25 = vrot.slane %v2143_v58, 9  ;;  %v3109_v55 = vrot.slane %v3108_v46, 4 }
 0x2d6   : > { %5946 = vmatmul.msk.bf16.gmra.mxu2 %vm1773_vm10, %v3289_v57  ;;  %v2251_v15 = vsel %vm7083_vm15, %v5822_v25, %v2250_v6  ;;  %v3123_v57 = vrot.slane %v3121_v51, 5  ;;  %v3114_v3 = vsel %vm6923_vm8, %v3109_v55, %v3113_v60 }
 0x2d7   : > { %v2411_v43 = vpop.f32.mrf.mxu3  ;;  %v2318_v21 = vunpack.c.l.b16 %v2251_v15  ;;  %v3268_v41 = vunpack.c.l.b16 %v3114_v3 }
 0x2d8   : > { %v2491_v48 = vadd.f32 %v2411_v43, %v7295_v59  ;;  %v2701_v54 = vpop.f32.mrf.mxu1  ;;  %v3118_v59 = vor.u32 %v3117_v18, %v3113_v60  ;;  %v2319_v43 = vunpack.c.l.b16 %v2254_v63  ;;  %v3126_v18 = vshrl.u32 %v2846_v34, 16 }
 0x2d9   : > { %v7800_v36 = vpop.f32.mrf.mxu2 }
 0x2da   : > { %v7797_v42 = vadd.f32 %v2701_v54, %v2491_v48  ;;  %8977 = vst [vmem:[#allocation54_spill] sm:$0xff] %v7800_v36  ;;  %v3119_v46 = vrot.slane %v3118_v59, 4  ;;  %v3129_v54 = vshll.u32 %v2846_v34, 16  ;;  %v2341_v19 = vpack.c.b16 %v2319_v43, %v2318_v21  ;;  %v2144_v59 = vld [vmem:[#allocation2 + $0x78] sm:$0xe] }
 0x2db   : > { %5925 = vmatmul.msk.bf16.gmra.mxu1 %vm1773_vm10, %v6164_v33  ;;  %v2847_v33 = vld [vmem:[#allocation2 + $0x94] sm:$0xf]  ;;  %v3128_v63 = vrot.slane %v3126_v18, 4  ;;  %v6295_v34 = vld [vmem:[#allocation2 + $0x7c] sm:$0xf]  ;;  %v5823_v3 = vrot.slane %v2144_v59, 9  ;;  %v2062_v59 = vadd.f32 %v7623_v1, %v7631_v2 }
 0x2dc   : > { %v3124_v6 = vsel %vm6923_vm8, %v3119_v46, %v3123_v57  ;;  %v3135_v36 = vshll.u32 %v2847_v33, 16  ;;  %v3139_v60 = vshrl.u32 %v2847_v33, 16  ;;  %v2257_v15 = vrot.slane %v6295_v34, 5  ;;  %v2848_v57 = vld [vmem:[#allocation2 + $0x98] sm:$0x1]  ;;  %v7820_v46 = vpop.f32.mrf.mxu0 }
 0x2dd   : > { %6068 = vmatmul.msk.bf16.gmra.mxu0 %vm1773_vm10, %v6186_v22  ;;  %v3131_v22 = vrot.slane %v3129_v54, 5  ;;  %v3269_v55 = vunpack.c.l.b16 %v3124_v6  ;;  %v6165_v33 = vld [vmem:[#allocation2 + $0x78] sm:$0xff]  ;;  %v1272_v1 = vld [vmem:[#allocation2 + $0xc0] sm:$0xf] }
 0x2de   : > { %v3141_v18 = vrot.slane %v3139_v60, 4  ;;  %v2259_v6 = vrot.slane %v2257_v15, 4  ;;  %v6187_v60 = vld [vmem:[#allocation2 + $0xa8] sm:$0xff] }
 0x2df   : > { %v2413_v48 = vpop.f32.mrf.mxu3  ;;  %v3290_v35 = vpack.c.b16 %v3269_v55, %v3268_v41  ;;  %v2258_v55 = vsel %vm7083_vm15, %v5823_v3, %v2257_v15 }
 0x2e0   : > { %v2492_v58 = vadd.f32 %v2413_v48, %v2057_v50  ;;  %v2703_v8 = vpop.f32.mrf.mxu1  ;;  %v6296_v50 = vld [vmem:[#allocation2 + $0x80] sm:$0x1] }
 0x2e1   : > { %v7817_v25 = vpop.f32.mrf.mxu2  ;;  %v2260_v48 = vrot.slane %v6296_v50, 5  ;;  %v2320_v50 = vunpack.c.l.b16 %v2258_v55 }
 0x2e2   : > { %v7815_v51 = vadd.f32 %v2703_v8, %v2492_v58  ;;  %8978 = vst [vmem:[#allocation55_spill] sm:$0xff] %v7817_v25  ;;  %v3132_v58 = vor.u32 %v3131_v22, %v3128_v63  ;;  %v3137_v8 = vrot.slane %v3135_v36, 5  ;;  %v2849_v22 = vld [vmem:[#allocation2 + $0x9c] sm:$0xf] }
 0x2e3   : > { %v2261_v36 = vsel %vm7083_vm15, %v2259_v6, %v2260_v48  ;;  %v3150_v3 = vshrl.u32 %v2849_v22, 16 }
 0x2e4   : > { %5842 = vmatmul.msk.bf16.gmra.mxu3 %vm1773_vm10, %v2341_v19  ;;  %v3145_v19 = vshll.u32 %v2848_v57, 16  ;;  %v3133_v63 = vrot.slane %v3132_v58, 4  ;;  %v2321_v57 = vunpack.c.l.b16 %v2261_v36 }
 0x2e6   : > { %5947 = vmatmul.msk.bf16.gmra.mxu2 %vm1773_vm10, %v3290_v35  ;;  %v3147_v35 = vrot.slane %v3145_v19, 5  ;;  %v2342_v19 = vpack.c.b16 %v2321_v57, %v2320_v50  ;;  %v6298_v57 = vld [vmem:[#allocation2 + $0x8c] sm:$0x1] }
 0x2e7   : > { %v2416_v43 = vpop.f32.mrf.mxu3 }
 0x2e8   : > { %v2493_v54 = vadd.f32 %v2416_v43, %v7339_v5  ;;  %v2706_v21 = vpop.f32.mrf.mxu1  ;;  %v3142_v5 = vor.u32 %v3141_v18, %v3137_v8  ;;  %v2850_v18 = vld [vmem:[#allocation2 + $0xa0] sm:$0xf] }
 0x2e9   : > { %v7827_v41 = vpop.f32.mrf.mxu2 }
 0x2ea   : > { %v7824_v34 = vadd.f32 %v2706_v21, %v2493_v54  ;;  %8979 = vst [vmem:[#allocation56_spill] sm:$0xff] %v7827_v41  ;;  %v3138_v54 = vsel %vm6923_vm8, %v3133_v63, %v3137_v8  ;;  %v3143_v15 = vrot.slane %v3142_v5, 4  ;;  %v3153_v21 = vshll.u32 %v2849_v22, 16  ;;  %v2145_v41 = vld [vmem:[#allocation2 + $0x84] sm:$0xe] }
 0x2eb   : > { %5926 = vmatmul.msk.bf16.gmra.mxu1 %vm1773_vm10, %v6165_v33  ;;  %v7838_v33 = vpop.f32.mrf.mxu0  ;;  %v3270_v55 = vunpack.c.l.b16 %v3138_v54  ;;  %v3159_v63 = vshll.u32 %v2850_v18, 16  ;;  %v3163_v5 = vshrl.u32 %v2850_v18, 16  ;;  %v1108_v22 = vpop.permute.xlu0 %1107  ;;  %v2267_v54 = vrot.slane %v6298_v57, 5 }
 0x2ec   : > { %v3148_v6 = vsel %vm6923_vm8, %v3143_v15, %v3147_v35  ;;  %v3155_v8 = vrot.slane %v3153_v21, 5  ;;  %v1273_v35 = vsel %vm7006_vm12, %v1108_v22, %v1272_v1  ;;  %v2851_v21 = vld [vmem:[#allocation2 + $0xa4] sm:$0x1] }
 0x2ed   : > { %6069 = vmatmul.msk.bf16.gmra.mxu0 %vm1773_vm10, %v6187_v60  ;;  %v3152_v60 = vrot.slane %v3150_v3, 4  ;;  %1274 = vst [vmem:[#allocation2 + $0xc0] sm:$0xf] %v1273_v35  ;;  %v3161_v25 = vrot.slane %v3159_v63, 5  ;;  %v3165_v40 = vrot.slane %v3163_v5, 4  ;;  %v6166_v35 = vld [vmem:[#allocation2 + $0x84] sm:$0xff] }
 0x2ee   : > { %v2852_v63 = vld [vmem:[#allocation2 + $0xa8] sm:$0xf]  ;;  %v6188_v5 = vld [vmem:[#allocation2 + $0xb4] sm:$0xff] }
 0x2ef   : > { %v2418_v43 = vpop.f32.mrf.mxu3 }
 0x2f0   : > { %v2494_v48 = vadd.f32 %v2418_v43, %v2062_v59  ;;  %v2708_v58 = vpop.f32.mrf.mxu1  ;;  %v1276_v59 = vld [vmem:[#allocation2 + $0xc8] sm:$0x1]  ;;  %v3271_v43 = vunpack.c.l.b16 %v3148_v6  ;;  %v1110_v15 = vpop.permute.xlu1 %1109  ;;  %v5824_v6 = vrot.slane %v2145_v41, 9 }
 0x2f1   : > { %v7844_v36 = vpop.f32.mrf.mxu2  ;;  %v1112_v50 = vpop.permute.xlu2 %1111  ;;  %1275 = vst.msk [vmem:[#allocation2 + $0xc4] sm:$0xf] %vm654_vm5, %v1110_v15 }
 0x2f2   : > { %v7842_v2 = vadd.f32 %v2708_v58, %v2494_v48  ;;  %8980 = vst [vmem:[#allocation57_spill] sm:$0xff] %v7844_v36  ;;  %v6297_v48 = vld [vmem:[#allocation2 + $0x88] sm:$0xf]  ;;  %v3291_v3 = vpack.c.b16 %v3271_v43, %v3270_v55  ;;  %v1277_v18 = vsel %vm6944_vm9, %v1112_v50, %v1276_v59  ;;  %v3156_v36 = vor.u32 %v3155_v8, %v3152_v60 }
 0x2f3   : > { %v2264_v58 = vrot.slane %v6297_v48, 5  ;;  %1278 = vst [vmem:[#allocation2 + $0xc8] sm:$0x1] %v1277_v18  ;;  %v3169_v55 = vshll.u32 %v2851_v21, 16  ;;  %v7856_v15 = vpop.f32.mrf.mxu0  ;;  %v3166_v8 = vor.u32 %v3165_v40, %v3161_v25 }
 0x2f4   : > { %5843 = vmatmul.msk.bf16.gmra.mxu3 %vm1773_vm10, %v2342_v19  ;;  %v3157_v60 = vrot.slane %v3156_v36, 4 }
 0x2f5   : > { %v2266_v48 = vrot.slane %v2264_v58, 4  ;;  %v2265_v41 = vsel %vm7083_vm15, %v5824_v6, %v2264_v58  ;;  %v3171_v59 = vrot.slane %v3169_v55, 5  ;;  %v3167_v18 = vrot.slane %v3166_v8, 4  ;;  %v2146_v55 = vld [vmem:[#allocation2 + $0x90] sm:$0xe] }
 0x2f6   : > { %5948 = vmatmul.msk.bf16.gmra.mxu2 %vm1773_vm10, %v3291_v3  ;;  %v2322_v50 = vunpack.c.l.b16 %v2265_v41  ;;  %v3162_v21 = vsel %vm6923_vm8, %v3157_v60, %v3161_v25 }
 0x2f7   : > { %v2421_v19 = vpop.f32.mrf.mxu3  ;;  %v3172_v36 = vsel %vm6923_vm8, %v3167_v18, %v3171_v59 }
 0x2f8   : > { %v2495_v1 = vadd.f32 %v2421_v19, %v7644_v16  ;;  %v2711_v22 = vpop.f32.mrf.mxu1  ;;  %v2268_v16 = vsel %vm7083_vm15, %v2266_v48, %v2267_v54  ;;  %v3174_v19 = vshrl.u32 %v2852_v63, 16  ;;  %v2853_v54 = vld [vmem:[#allocation2 + $0xac] sm:$0xf]  ;;  %v3273_v8 = vunpack.c.l.b16 %v3172_v36  ;;  %v6167_v36 = vld [vmem:[#allocation2 + $0x90] sm:$0xff] }
 0x2f9   : > { %v7859_v0 = vpop.f32.mrf.mxu2  ;;  %v2323_v57 = vunpack.c.l.b16 %v2268_v16  ;;  %v3183_v25 = vshll.u32 %v2853_v54, 16  ;;  %v3187_v60 = vshrl.u32 %v2853_v54, 16 }
 0x2fa   : > { %v7854_v43 = vadd.f32 %v2711_v22, %v2495_v1  ;;  %8981 = vst [vmem:[#allocation58_spill] sm:$0xff] %v7859_v0  ;;  %v3177_v1 = vshll.u32 %v2852_v63, 16  ;;  %v3176_v41 = vrot.slane %v3174_v19, 4 }
 0x2fb   : > { %5927 = vmatmul.msk.bf16.gmra.mxu1 %vm1773_vm10, %v6166_v35  ;;  %v2343_v22 = vpack.c.b16 %v2323_v57, %v2322_v50  ;;  %v3272_v35 = vunpack.c.l.b16 %v3162_v21  ;;  %v2854_v50 = vld [vmem:[#allocation2 + $0xb0] sm:$0x1] }
 0x2fc   : > { %v3179_v16 = vrot.slane %v3177_v1, 5 }
 0x2fd   : > { %6070 = vmatmul.msk.bf16.gmra.mxu0 %vm1773_vm10, %v6188_v5  ;;  %v7876_v5 = vpop.f32.mrf.mxu0  ;;  %v3292_v18 = vpack.c.b16 %v3273_v8, %v3272_v35 }
 0x2fe   : > { %v3180_v21 = vor.u32 %v3179_v16, %v3176_v41  ;;  %v2856_v16 = vld [vmem:[#allocation2 + $0xb8] sm:$0xf] }
 0x2ff   : > { %v2423_v3 = vpop.f32.mrf.mxu3 }
 0x300   : > { %v2496_v58 = vadd.f32 %v2423_v3, %v7658_v30  ;;  %v2713_v6 = vpop.f32.mrf.mxu1  ;;  %v6299_v30 = vld [vmem:[#allocation2 + $0x94] sm:$0xf]  ;;  %v6300_v3 = vld [vmem:[#allocation2 + $0x98] sm:$0x1]  ;;  %v3181_v41 = vrot.slane %v3180_v21, 4 }
 0x301   : > { %v7873_v48 = vpop.f32.mrf.mxu2  ;;  %v2271_v63 = vrot.slane %v6299_v30, 5  ;;  %v2274_v59 = vrot.slane %v6300_v3, 5 }
 0x302   : > { %v7871_v40 = vadd.f32 %v2713_v6, %v2496_v58  ;;  %8982 = vst [vmem:[#allocation59_spill] sm:$0xff] %v7873_v48  ;;  %v5825_v58 = vrot.slane %v2146_v55, 9  ;;  %v3185_v6 = vrot.slane %v3183_v25, 5  ;;  %v3189_v48 = vrot.slane %v3187_v60, 4  ;;  %v6189_v25 = vld [vmem:[#allocation2 + $0xc0] sm:$0xff] }
 0x303   : > { %v2273_v54 = vrot.slane %v2271_v63, 4 }
 0x304   : > { %5844 = vmatmul.msk.bf16.gmra.mxu3 %vm1773_vm10, %v2343_v22  ;;  %v3193_v22 = vshll.u32 %v2854_v50, 16  ;;  %v2272_v3 = vsel %vm7083_vm15, %v5825_v58, %v2271_v63  ;;  %v2855_v50 = vld [vmem:[#allocation2 + $0xb4] sm:$0xf] }
 0x305   : > { %v2275_v35 = vsel %vm7083_vm15, %v2273_v54, %v2274_v59  ;;  %v2324_v60 = vunpack.c.l.b16 %v2272_v3  ;;  %v3186_v59 = vsel %vm6923_vm8, %v3181_v41, %v3185_v6  ;;  %v3201_v3 = vshll.u32 %v2855_v50, 16  ;;  %v2147_v41 = vld [vmem:[#allocation2 + $0x9c] sm:$0xe] }
 0x306   : > { %5949 = vmatmul.msk.bf16.gmra.mxu2 %vm1773_vm10, %v3292_v18  ;;  %v2325_v8 = vunpack.c.l.b16 %v2275_v35  ;;  %v3195_v18 = vrot.slane %v3193_v22, 5  ;;  %v3198_v22 = vshrl.u32 %v2855_v50, 16 }
 0x307   : > { %v2426_v57 = vpop.f32.mrf.mxu3 }
 0x308   : > { %v2497_v19 = vadd.f32 %v2426_v57, %v7673_v7  ;;  %v2716_v1 = vpop.f32.mrf.mxu1  ;;  %v3190_v7 = vor.u32 %v3189_v48, %v3185_v6  ;;  %v3207_v57 = vshll.u32 %v2856_v16, 16  ;;  %v2344_v54 = vpack.c.b16 %v2325_v8, %v2324_v60 }
 0x309   : > { %v7887_v55 = vpop.f32.mrf.mxu2  ;;  %v3200_v8 = vrot.slane %v3198_v22, 4 }
 0x30a   : > { %v7880_v30 = vadd.f32 %v2716_v1, %v2497_v19  ;;  %8984 = vst [vmem:[#allocation61_spill] sm:$0xff] %v7887_v55  ;;  %v3211_v19 = vshrl.u32 %v2856_v16, 16  ;;  %v7889_v1 = vpop.f32.mrf.mxu0  ;;  %v3191_v58 = vrot.slane %v3190_v7, 4  ;;  %v3274_v16 = vunpack.c.l.b16 %v3186_v59  ;;  %v6301_v7 = vld [vmem:[#allocation2 + $0xa0] sm:$0xf] }
 0x30b   : > { %5928 = vmatmul.msk.bf16.gmra.mxu1 %vm1773_vm10, %v6167_v36  ;;  %v3209_v55 = vrot.slane %v3207_v57, 5 }
 0x30c   : > { %8983 = vst [vmem:[#allocation60_spill] sm:$0xff] %v7880_v30  ;;  %v3196_v36 = vsel %vm6923_vm8, %v3191_v58, %v3195_v18  ;;  %v3213_v0 = vrot.slane %v3211_v19, 4  ;;  %v6302_v58 = vld [vmem:[#allocation2 + $0xa4] sm:$0x1] }
 0x30d   : > { %6071 = vmatmul.msk.bf16.gmra.mxu0 %vm1773_vm10, %v6189_v25  ;;  %v3275_v6 = vunpack.c.l.b16 %v3196_v36  ;;  %v2857_v25 = vld [vmem:[#allocation2 + $0xbc] sm:$0x1]  ;;  %v2281_v50 = vrot.slane %v6302_v58, 5 }
 0x30e   : > { %v3214_v18 = vor.u32 %v3213_v0, %v3209_v55  ;;  %v3217_v59 = vshll.u32 %v2857_v25, 16 }
 0x30f   : > { %v2428_v63 = vpop.f32.mrf.mxu3  ;;  %v3293_v60 = vpack.c.b16 %v3275_v6, %v3274_v16  ;;  %v2858_v16 = vld [vmem:[#allocation2 + $0xc0] sm:$0xf]  ;;  %v2859_v6 = vld [vmem:[#allocation2 + $0xc4] sm:$0xf] }
 0x310   : > { %v2498_v21 = vadd.f32 %v2428_v63, %v7684_v28  ;;  %v2718_v48 = vpop.f32.mrf.mxu1  ;;  %v2278_v28 = vrot.slane %v6301_v7, 5  ;;  %v3203_v63 = vrot.slane %v3201_v3, 5  ;;  %v3219_v3 = vrot.slane %v3217_v59, 5 }
 0x311   : > { %v7899_v30 = vpop.f32.mrf.mxu2  ;;  %v3225_v58 = vshll.u32 %v2858_v16, 16 }
 0x312   : > { %v7897_v35 = vadd.f32 %v2718_v48, %v2498_v21  ;;  %8986 = vst [vmem:[#allocation63_spill] sm:$0xff] %v7899_v30  ;;  %v5826_v48 = vrot.slane %v2147_v41, 9  ;;  %v2280_v36 = vrot.slane %v2278_v28, 4  ;;  %v3204_v7 = vor.u32 %v3203_v63, %v3200_v8 }
 0x314   : > { %8985 = vst [vmem:[#allocation62_spill] sm:$0xff] %v7897_v35  ;;  %5845 = vmatmul.msk.bf16.gmra.mxu3 %vm1773_vm10, %v2344_v54  ;;  %v6168_v54 = vld [vmem:[#allocation2 + $0x9c] sm:$0xff]  ;;  %v3215_v35 = vrot.slane %v3214_v18, 4  ;;  %v2279_v0 = vsel %vm7083_vm15, %v5826_v48, %v2278_v28  ;;  %v3222_v18 = vshrl.u32 %v2858_v16, 16  ;;  %v2148_v16 = vld [vmem:[#allocation2 + $0xa8] sm:$0xe] }
 0x315   : > { %v2326_v41 = vunpack.c.l.b16 %v2279_v0  ;;  %v3227_v0 = vrot.slane %v3225_v58, 5 }
 0x316   : > { %5950 = vmatmul.msk.bf16.gmra.mxu2 %vm1773_vm10, %v3293_v60  ;;  %v3205_v60 = vrot.slane %v3204_v7, 4  ;;  %v3220_v8 = vsel %vm6923_vm8, %v3215_v35, %v3219_v3  ;;  %v3224_v7 = vrot.slane %v3222_v18, 4 }
 0x317   : > { %v2431_v21 = vpop.f32.mrf.mxu3 }
 0x318   : > { %v2499_v57 = vadd.f32 %v2431_v21, %v7697_v31  ;;  %v2721_v19 = vpop.f32.mrf.mxu1  ;;  %v2282_v31 = vsel %vm7083_vm15, %v2280_v36, %v2281_v50  ;;  %v3231_v21 = vshll.u32 %v2859_v6, 16  ;;  %v3210_v50 = vsel %vm6923_vm8, %v3205_v60, %v3209_v55 }
 0x319   : > { %v7907_v22 = vpop.f32.mrf.mxu2  ;;  %v2327_v25 = vunpack.c.l.b16 %v2282_v31  ;;  %v3276_v3 = vunpack.c.l.b16 %v3210_v50 }
 0x31a   : > { %v7904_v30 = vadd.f32 %v2721_v19, %v2499_v57  ;;  %8988 = vst [vmem:[#allocation65_spill] sm:$0xff] %v7907_v22  ;;  %v3235_v57 = vshrl.u32 %v2859_v6, 16  ;;  %v3233_v35 = vrot.slane %v3231_v21, 5  ;;  %v6303_v6 = vld [vmem:[#allocation2 + $0xac] sm:$0xf] }
 0x31b   : > { %5929 = vmatmul.msk.bf16.gmra.mxu1 %vm1773_vm10, %v6168_v54  ;;  %v2345_v59 = vpack.c.b16 %v2327_v25, %v2326_v41  ;;  %v3277_v54 = vunpack.c.l.b16 %v3220_v8  ;;  %v6304_v22 = vld [vmem:[#allocation2 + $0xb0] sm:$0x1]  ;;  %v3228_v41 = vor.u32 %v3227_v0, %v3224_v7 }
 0x31c   : > { %8987 = vst [vmem:[#allocation64_spill] sm:$0xff] %v7904_v30  ;;  %v3237_v31 = vrot.slane %v3235_v57, 4  ;;  %v2288_v30 = vrot.slane %v6304_v22, 5  ;;  %v6169_v57 = vld [vmem:[#allocation2 + $0xa8] sm:$0xff] }
 0x31d   : > { %v3294_v55 = vpack.c.b16 %v3277_v54, %v3276_v3  ;;  %v3229_v54 = vrot.slane %v3228_v41, 4  ;;  %v6305_v41 = vld [vmem:[#allocation2 + $0xb8] sm:$0xf] }
 0x31e   : > { %v3238_v25 = vor.u32 %v3237_v31, %v3233_v35 }
 0x31f   : > { %v2433_v63 = vpop.f32.mrf.mxu3 }
 0x320   : > { %v2500_v19 = vadd.f32 %v2433_v63, %v7705_v20  ;;  %v2723_v28 = vpop.f32.mrf.mxu1  ;;  %v2285_v20 = vrot.slane %v6303_v6, 5  ;;  %v2860_v63 = vld [vmem:[#allocation2 + $0xc8] sm:$0x1]  ;;  %v3239_v7 = vrot.slane %v3238_v25, 4  ;;  %v2292_v25 = vrot.slane %v6305_v41, 5 }
 0x321   : > { %v7920_v36 = vpop.f32.mrf.mxu2  ;;  %v3241_v8 = vshll.u32 %v2860_v63, 16 }
 0x322   : > { %v7918_v48 = vadd.f32 %v2723_v28, %v2500_v19  ;;  %v5827_v19 = vrot.slane %v2148_v16, 9  ;;  %v2287_v21 = vrot.slane %v2285_v20, 4  ;;  %v3234_v16 = vsel %vm6923_vm8, %v3229_v54, %v3233_v35  ;;  %v6306_v35 = vld [vmem:[#allocation2 + $0xbc] sm:$0x1] }
 0x324   : > { %5846 = vmatmul.msk.bf16.gmra.mxu3 %vm1773_vm10, %v2345_v59  ;;  %v2289_v50 = vsel %vm7083_vm15, %v2287_v21, %v2288_v30  ;;  %v2286_v59 = vsel %vm7083_vm15, %v5827_v19, %v2285_v20  ;;  %v2295_v21 = vrot.slane %v6306_v35, 5 }
 0x325   : > { %v2328_v0 = vunpack.c.l.b16 %v2286_v59  ;;  %v2329_v31 = vunpack.c.l.b16 %v2289_v50  ;;  %v2294_v50 = vrot.slane %v2292_v25, 4  ;;  %v4822_v59 = vld [vmem:[#allocation2 + $0x18] sm:$0xe] }
 0x326   : > { %5951 = vmatmul.msk.bf16.gmra.mxu2 %vm1773_vm10, %v3294_v55 }
 0x327   : > { %v2436_v60 = vpop.f32.mrf.mxu3 }
 0x328   : > { %v2501_v18 = vadd.f32 %v2436_v60, %v7714_v39  ;;  %v2726_v58 = vpop.f32.mrf.mxu1  ;;  %v3243_v39 = vrot.slane %v3241_v8, 5  ;;  %v2346_v60 = vpack.c.b16 %v2329_v31, %v2328_v0  ;;  %v6170_v0 = vld [vmem:[#allocation2 + $0xb4] sm:$0xff] }
 0x329   : > { %v7930_v22 = vpop.f32.mrf.mxu2 }
 0x32a   : > { %v7925_v28 = vadd.f32 %v2726_v58, %v2501_v18  ;;  %v3244_v6 = vsel %vm6923_vm8, %v3239_v7, %v3243_v39  ;;  %v3278_v18 = vunpack.c.l.b16 %v3234_v16  ;;  %v4165_v58 = vld [vmem:[#allocation2 + $0x1c] sm:$0xf]  ;;  %v2149_v7 = vld [vmem:[#allocation2 + $0xb4] sm:$0xe]  ;;  %v4166_v39 = vld [vmem:[#allocation2 + $0x20] sm:$0x1] }
 0x32b   : > { %5930 = vmatmul.msk.bf16.gmra.mxu1 %vm1773_vm10, %v6169_v57  ;;  %v3279_v20 = vunpack.c.l.b16 %v3244_v6  ;;  %v4888_v31 = vrot.slane %v4165_v58, 5  ;;  %v6093_v16 = vrot.slane %v4822_v59, 9 }
 0x32d   : > { %v3295_v8 = vpack.c.b16 %v3279_v20, %v3278_v18  ;;  %v4890_v18 = vrot.slane %v4888_v31, 4  ;;  %v4889_v41 = vsel %vm7083_vm15, %v6093_v16, %v4888_v31  ;;  %v4222_v31 = vshll.u32 %v4165_v58, 16 }
 0x32e   : > { %v4226_v16 = vshrl.u32 %v4165_v58, 16 }
 0x32f   : > { %v2438_v3 = vpop.f32.mrf.mxu3  ;;  %v4224_v58 = vrot.slane %v4222_v31, 5 }
 0x330   : > { %v2502_v30 = vadd.f32 %v2438_v3, %v7726_v24  ;;  %v2728_v63 = vpop.f32.mrf.mxu1 }
 0x331   : > { %v7941_v19 = vpop.f32.mrf.mxu2 }
 0x332   : > { %v7939_v55 = vadd.f32 %v2728_v63, %v2502_v30  ;;  %v5828_v30 = vrot.slane %v2149_v7, 9  ;;  %v2296_v63 = vsel %vm7083_vm15, %v2294_v50, %v2295_v21  ;;  %v5001_v7 = vunpack.c.l.b16 %v4889_v41 }
 0x333   : > { %v2331_v20 = vunpack.c.l.b16 %v2296_v63 }
 0x334   : > { %5847 = vmatmul.msk.bf16.gmra.mxu3 %vm1773_vm10, %v2346_v60  ;;  %v4891_v60 = vrot.slane %v4166_v39, 5 }
 0x336   : > { %5952 = vmatmul.msk.bf16.gmra.mxu2 %vm1773_vm10, %v3295_v8  ;;  %v4164_v8 = vld [vmem:[#allocation2 + $0x18] sm:$0xf] }
 0x337   : > { %v2441_v57 = vpop.f32.mrf.mxu3  ;;  %v4213_v21 = vshrl.u32 %v4164_v8, 16 }
 0x338   : > { %v2503_v24 = vadd.f32 %v2441_v57, %v7733_v52  ;;  %v2731_v54 = vpop.f32.mrf.mxu1  ;;  %v2293_v52 = vsel %vm7083_vm15, %v5828_v30, %v2292_v25  ;;  %v4892_v57 = vsel %vm7083_vm15, %v4890_v18, %v4891_v60  ;;  %v4216_v30 = vshll.u32 %v4164_v8, 16  ;;  %v4823_v8 = vld [vmem:[#allocation2 + $0x24] sm:$0xe] }
 0x339   : > { %v7949_v6 = vpop.f32.mrf.mxu2  ;;  %v5002_v25 = vunpack.c.l.b16 %v4892_v57  ;;  %v2090_v60 = vadd.f32 %v7579_v32, %v7751_v38  ;;  %v6171_v57 = vld [vmem:[#allocation2 + $0xc0] sm:$0xff] }
 0x33a   : > { %v7946_v3 = vadd.f32 %v2731_v54, %v2503_v24  ;;  %8989 = vst [vmem:[#allocation66_spill] sm:$0xff] %v7949_v6  ;;  %v2330_v54 = vunpack.c.l.b16 %v2293_v52  ;;  %v4215_v52 = vrot.slane %v4213_v21, 4  ;;  %v4218_v41 = vrot.slane %v4216_v30, 5  ;;  %v4167_v6 = vld [vmem:[#allocation2 + $0x24] sm:$0xf] }
 0x33b   : > { %5931 = vmatmul.msk.bf16.gmra.mxu1 %vm1773_vm10, %v6170_v0  ;;  %v5033_v18 = vpack.c.b16 %v5002_v25, %v5001_v7  ;;  %v6094_v7 = vrot.slane %v4823_v8, 9  ;;  %v4232_v25 = vshll.u32 %v4166_v39, 16  ;;  %v4240_v39 = vshll.u32 %v4167_v6, 16 }
 0x33c   : > { %v2347_v0 = vpack.c.b16 %v2331_v20, %v2330_v54  ;;  %v7970_v20 = vld [vmem:[#allocation2 + $0x2c] sm:$0x1]  ;;  %v4219_v32 = vor.u32 %v4218_v41, %v4215_v52 }
 0x33d   : > { %v4898_v21 = vrot.slane %v7970_v20, 5 }
 0x33f   : > { %v2443_v35 = vpop.f32.mrf.mxu3 }
 0x340   : > { %v2504_v59 = vadd.f32 %v2443_v35, %v7741_v56  ;;  %v2733_v24 = vpop.f32.mrf.mxu1  ;;  %v7967_v56 = vld [vmem:[#allocation2 + $0x28] sm:$0xf] }
 0x341   : > { %v7962_v63 = vpop.f32.mrf.mxu2  ;;  %v4895_v54 = vrot.slane %v7967_v56, 5 }
 0x342   : > { %v7960_v50 = vadd.f32 %v2733_v24, %v2504_v59  ;;  %8990 = vst [vmem:[#allocation67_spill] sm:$0xff] %v7962_v63 }
 0x343   : > { %v4897_v30 = vrot.slane %v4895_v54, 4 }
 0x344   : > { %5848 = vmatmul.msk.bf16.gmra.mxu3 %vm1773_vm10, %v2347_v0  ;;  %v4228_v0 = vrot.slane %v4226_v16, 4  ;;  %v4896_v16 = vsel %vm7083_vm15, %v6094_v7, %v4895_v54  ;;  %v6307_v54 = vld [vmem:[#allocation2 + $0x20] sm:$0x1] }
 0x345   : > { %v4899_v52 = vsel %vm7083_vm15, %v4897_v30, %v4898_v21  ;;  %v3547_v7 = vrot.slane %v6307_v54, 5 }
 0x346   : > { %6113 = vmatmul.msk.bf16.vlgmr.msra.gmra.mxu2 %vm1773_vm10, %v5033_v18  ;;  %v2092_v18 = vadd.f32 %v7600_v27, %v7764_v44  ;;  %v3472_v44 = vld [vmem:[#allocation2 + $0x18] sm:$0xe] }
 0x347   : > { %v2446_v35 = vpop.f32.mrf.mxu3 }
 0x348   : > { %v2505_v59 = vadd.f32 %v2446_v35, %v2090_v60  ;;  %v2736_v24 = vpop.f32.mrf.mxu1  ;;  %v4229_v60 = vor.u32 %v4228_v0, %v4224_v58  ;;  %v4220_v35 = vrot.slane %v4219_v32, 4  ;;  %v5003_v0 = vunpack.c.l.b16 %v4896_v16  ;;  %v7997_v16 = vld [vmem:[#allocation2 + $0x34] sm:$0xf] }
 0x349   : > { %v7976_v38 = vpop.f32.mrf.mxu2 }
 0x34a   : > { %v7973_v63 = vadd.f32 %v2736_v24, %v2505_v59  ;;  %8992 = vst [vmem:[#allocation69_spill] sm:$0xff] %v7976_v38  ;;  %v4234_v24 = vrot.slane %v4232_v25, 5  ;;  %v4230_v8 = vrot.slane %v4229_v60, 4  ;;  %v4225_v27 = vsel %vm6923_vm8, %v4220_v35, %v4224_v58  ;;  %v6308_v25 = vld [vmem:[#allocation2 + $0x1c] sm:$0xf] }
 0x34b   : > { %5932 = vmatmul.msk.bf16.gmra.mxu1 %vm1773_vm10, %v6171_v57  ;;  %v4237_v57 = vshrl.u32 %v4167_v6, 16  ;;  %v3544_v6 = vrot.slane %v6308_v25, 5  ;;  %v4599_v30 = vunpack.c.l.b16 %v4225_v27  ;;  %v5954_v60 = vrot.slane %v3472_v44, 9  ;;  %v8002_v27 = vld [vmem:[#allocation2 + $0x38] sm:$0x1] }
 0x34c   : > { %8991 = vst [vmem:[#allocation68_spill] sm:$0xff] %v7973_v63  ;;  %v5004_v63 = vunpack.c.l.b16 %v4899_v52  ;;  %v4235_v21 = vsel %vm6923_vm8, %v4230_v8, %v4234_v24  ;;  %v2095_v58 = vadd.f32 %v7613_v13, %v7773_v47  ;;  %v4246_v52 = vshll.u32 %v7967_v56, 16 }
 0x34d   : > { %v3546_v8 = vrot.slane %v3544_v6, 4  ;;  %v3545_v13 = vsel %vm7083_vm15, %v5954_v60, %v3544_v6  ;;  %v4902_v47 = vrot.slane %v7997_v16, 5 }
 0x34e   : > { %v5034_v35 = vpack.c.b16 %v5004_v63, %v5003_v0  ;;  %v4248_v44 = vrot.slane %v4246_v52, 5  ;;  %v3652_v6 = vunpack.c.l.b16 %v3545_v13 }
 0x34f   : > { %v2448_v31 = vpop.f32.mrf.mxu3 }
 0x350   : > { %v2506_v41 = vadd.f32 %v2448_v31, %v2092_v18  ;;  %v2738_v59 = vpop.f32.mrf.mxu1  ;;  %v4239_v18 = vrot.slane %v4237_v57, 4  ;;  %v4242_v31 = vrot.slane %v4240_v39, 5  ;;  %v4824_v57 = vld [vmem:[#allocation2 + $0x30] sm:$0xe] }
 0x351   : > { %v7989_v32 = vpop.f32.mrf.mxu2 }
 0x352   : > { %v7985_v38 = vadd.f32 %v2738_v59, %v2506_v41  ;;  %8993 = vst [vmem:[#allocation70_spill] sm:$0xff] %v7989_v32  ;;  %v4250_v41 = vshrl.u32 %v7967_v56, 16  ;;  %v4600_v59 = vunpack.c.l.b16 %v4235_v21  ;;  %v4243_v63 = vor.u32 %v4242_v31, %v4239_v18 }
 0x353   : > { %v3548_v56 = vsel %vm7083_vm15, %v3546_v8, %v3547_v7  ;;  %v2097_v31 = vadd.f32 %v7621_v37, %v7788_v10  ;;  %v4170_v7 = vld [vmem:[#allocation2 + $0x30] sm:$0xf] }
 0x354   : > { %5973 = vmatmul.msk.bf16.vlgmr.msra.gmra.mxu3 %vm1773_vm10, %v7308_v29  ;;  %v4631_v39 = vpack.c.b16 %v4600_v59, %v4599_v30  ;;  %v4252_v21 = vrot.slane %v4250_v41, 4  ;;  %v4905_v30 = vrot.slane %v8002_v27, 5  ;;  %v3653_v60 = vunpack.c.l.b16 %v3548_v56 }
 0x355   : > { %v4244_v18 = vrot.slane %v4243_v63, 4  ;;  %v4261_v56 = vshrl.u32 %v4170_v7, 16  ;;  %v4264_v37 = vshll.u32 %v4170_v7, 16  ;;  %v4274_v7 = vshrl.u32 %v7997_v16, 16 }
 0x356   : > { %6114 = vmatmul.msk.bf16.gmra.mxu2 %vm1773_vm10, %v5034_v35  ;;  %v4256_v35 = vshll.u32 %v7970_v20, 16  ;;  %v4253_v59 = vor.u32 %v4252_v21, %v4248_v44  ;;  %v6309_v20 = vld [vmem:[#allocation2 + $0x28] sm:$0xf]  ;;  %v3683_v13 = vpack.c.b16 %v3653_v60, %v3652_v6  ;;  %v8031_v60 = vld [vmem:[#allocation2 + $0x40] sm:$0xf] }
 0x357   : > { %v2451_v29 = vpop.f32.mrf.mxu3  ;;  %v4249_v63 = vsel %vm6923_vm8, %v4244_v18, %v4248_v44  ;;  %v4263_v44 = vrot.slane %v4261_v56, 4  ;;  %v4266_v18 = vrot.slane %v4264_v37, 5  ;;  %v4276_v37 = vrot.slane %v4274_v7, 4 }
 0x358   : > { %v2507_v54 = vadd.f32 %v2451_v29, %v2095_v58  ;;  %v2741_v24 = vpop.f32.mrf.mxu1  ;;  %v6095_v58 = vrot.slane %v4824_v57, 9  ;;  %v4904_v29 = vrot.slane %v4902_v47, 4  ;;  %v4258_v57 = vrot.slane %v4256_v35, 5 }
 0x359   : > { %v8011_v25 = vpop.f32.mrf.mxu2  ;;  %v4254_v32 = vrot.slane %v4253_v59, 4  ;;  %v4601_v6 = vunpack.c.l.b16 %v4249_v63  ;;  %v4909_v63 = vrot.slane %v8031_v60, 5 }
 0x35a   : > { %v8007_v0 = vadd.f32 %v2741_v24, %v2507_v54  ;;  %8994 = vst [vmem:[#allocation71_spill] sm:$0xff] %v8011_v25  ;;  %v4903_v41 = vsel %vm7083_vm15, %v6095_v58, %v4902_v47  ;;  %v4906_v54 = vsel %vm7083_vm15, %v4904_v29, %v4905_v30  ;;  %v3473_v58 = vld [vmem:[#allocation2 + $0x24] sm:$0xe]  ;;  %v6310_v30 = vld [vmem:[#allocation2 + $0x2c] sm:$0x1] }
 0x35b   : > { %6077 = vmatmul.msk.bf16.vlgmr.msra.gmra.mxu1 %vm1773_vm10, %v4631_v39  ;;  %v3551_v39 = vrot.slane %v6309_v20, 5  ;;  %v5005_v21 = vunpack.c.l.b16 %v4903_v41  ;;  %v5006_v25 = vunpack.c.l.b16 %v4906_v54  ;;  %v3554_v29 = vrot.slane %v6310_v30, 5 }
 0x35c   : > { %v4259_v35 = vsel %vm6923_vm8, %v4254_v32, %v4258_v57  ;;  %v8039_v57 = vld [vmem:[#allocation2 + $0x44] sm:$0x1] }
 0x35d   : > { %v5035_v59 = vpack.c.b16 %v5006_v25, %v5005_v21  ;;  %v3553_v41 = vrot.slane %v3551_v39, 4 }
 0x35f   : > { %v2453_v52 = vpop.f32.mrf.mxu3  ;;  %v3555_v32 = vsel %vm7083_vm15, %v3553_v41, %v3554_v29  ;;  %v4912_v29 = vrot.slane %v8039_v57, 5 }
 0x360   : > { %v2508_v24 = vadd.f32 %v2453_v52, %v2097_v31  ;;  %v2743_v8 = vpop.f32.mrf.mxu1  ;;  %v4270_v31 = vshll.u32 %v7997_v16, 16  ;;  %v5955_v52 = vrot.slane %v3473_v58, 9  ;;  %v4267_v16 = vor.u32 %v4266_v18, %v4263_v44 }
 0x361   : > { %v8026_v47 = vpop.f32.mrf.mxu2 }
 0x362   : > { %v8024_v10 = vadd.f32 %v2743_v8, %v2508_v24  ;;  %v4602_v24 = vunpack.c.l.b16 %v4259_v35  ;;  %v4825_v8 = vld [vmem:[#allocation2 + $0x3c] sm:$0xe]  ;;  %v4272_v25 = vrot.slane %v4270_v31, 5  ;;  %v3552_v58 = vsel %vm7083_vm15, %v5955_v52, %v3551_v39 }
 0x363   : > { %v3655_v35 = vunpack.c.l.b16 %v3555_v32  ;;  %v3654_v41 = vunpack.c.l.b16 %v3552_v58  ;;  %v4268_v44 = vrot.slane %v4267_v16, 4  ;;  %v4173_v52 = vld [vmem:[#allocation2 + $0x3c] sm:$0xf] }
 0x364   : > { %5974 = vmatmul.msk.bf16.gmra.mxu3 %vm1773_vm10, %v3683_v13  ;;  %v4632_v56 = vpack.c.b16 %v4602_v24, %v4601_v6  ;;  %v4911_v6 = vrot.slane %v4909_v63, 4  ;;  %v4277_v18 = vor.u32 %v4276_v37, %v4272_v25  ;;  %v4288_v58 = vshll.u32 %v4173_v52, 16 }
 0x366   : > { %6115 = vmatmul.msk.bf16.gmra.mxu2 %vm1773_vm10, %v5035_v59  ;;  %v4280_v59 = vshll.u32 %v8002_v27, 16  ;;  %v4913_v39 = vsel %vm7083_vm15, %v4911_v6, %v4912_v29  ;;  %v4273_v27 = vsel %vm6923_vm8, %v4268_v44, %v4272_v25  ;;  %v4278_v32 = vrot.slane %v4277_v18, 4  ;;  %v6311_v29 = vld [vmem:[#allocation2 + $0x34] sm:$0xf]  ;;  %v8065_v44 = vld [vmem:[#allocation2 + $0x4c] sm:$0xf] }
 0x367   : > { %v2456_v54 = vpop.f32.mrf.mxu3  ;;  %v5008_v37 = vunpack.c.l.b16 %v4913_v39  ;;  %v3558_v6 = vrot.slane %v6311_v29, 5  ;;  %v4294_v18 = vshll.u32 %v8031_v60, 16 }
 0x368   : > { %v2509_v20 = vadd.f32 %v2456_v54, %v7637_v14  ;;  %v2746_v13 = vpop.f32.mrf.mxu1  ;;  %v6096_v14 = vrot.slane %v4825_v8, 9  ;;  %v4282_v8 = vrot.slane %v4280_v59, 5  ;;  %v4603_v59 = vunpack.c.l.b16 %v4273_v27 }
 0x369   : > { %v8046_v30 = vpop.f32.mrf.mxu2  ;;  %v3560_v29 = vrot.slane %v3558_v6, 4 }
 0x36a   : > { %v8042_v21 = vadd.f32 %v2746_v13, %v2509_v20  ;;  %v4910_v31 = vsel %vm7083_vm15, %v6096_v14, %v4909_v63  ;;  %v3684_v20 = vpack.c.b16 %v3655_v35, %v3654_v41  ;;  %v4285_v63 = vshrl.u32 %v4173_v52, 16  ;;  %v6312_v41 = vld [vmem:[#allocation2 + $0x38] sm:$0x1] }
 0x36b   : > { %6078 = vmatmul.msk.bf16.gmra.mxu1 %vm1773_vm10, %v4632_v56  ;;  %v5007_v13 = vunpack.c.l.b16 %v4910_v31  ;;  %v3474_v56 = vld [vmem:[#allocation2 + $0x30] sm:$0xe]  ;;  %v3561_v25 = vrot.slane %v6312_v41, 5  ;;  %v4298_v31 = vshrl.u32 %v8031_v60, 16  ;;  %v4290_v52 = vrot.slane %v4288_v58, 5 }
 0x36c   : > { %v5956_v35 = vrot.slane %v3474_v56, 9  ;;  %v4287_v39 = vrot.slane %v4285_v63, 4  ;;  %v4916_v56 = vrot.slane %v8065_v44, 5 }
 0x36d   : > { %v4300_v63 = vrot.slane %v4298_v31, 4 }
 0x36f   : > { %v2458_v7 = vpop.f32.mrf.mxu3 }
 0x370   : > { %v2510_v54 = vadd.f32 %v2458_v7, %v7653_v12  ;;  %v2748_v24 = vpop.f32.mrf.mxu1  ;;  %v4283_v12 = vsel %vm6923_vm8, %v4278_v32, %v4282_v8  ;;  %v5036_v7 = vpack.c.b16 %v5008_v37, %v5007_v13  ;;  %v3559_v32 = vsel %vm7083_vm15, %v5956_v35, %v3558_v6 }
 0x371   : > { %v8060_v14 = vpop.f32.mrf.mxu2  ;;  %v3562_v13 = vsel %vm7083_vm15, %v3560_v29, %v3561_v25  ;;  %v4296_v37 = vrot.slane %v4294_v18, 5  ;;  %v4304_v6 = vshll.u32 %v8039_v57, 16  ;;  %v3656_v35 = vunpack.c.l.b16 %v3559_v32  ;;  %v4176_v29 = vld [vmem:[#allocation2 + $0x48] sm:$0xf] }
 0x372   : > { %v8058_v16 = vadd.f32 %v2748_v24, %v2510_v54  ;;  %8995 = vst [vmem:[#allocation72_spill] sm:$0xff] %v8060_v14  ;;  %v4604_v24 = vunpack.c.l.b16 %v4283_v12  ;;  %v4826_v14 = vld [vmem:[#allocation2 + $0x48] sm:$0xe] }
 0x373   : > { %v6097_v12 = vrot.slane %v4826_v14, 9 }
 0x374   : > { %5975 = vmatmul.msk.bf16.gmra.mxu3 %vm1773_vm10, %v3684_v20  ;;  %v8069_v20 = vld [vmem:[#allocation2 + $0x50] sm:$0x1]  ;;  %v4633_v60 = vpack.c.b16 %v4604_v24, %v4603_v59  ;;  %v3657_v59 = vunpack.c.l.b16 %v3562_v13  ;;  %v4301_v24 = vor.u32 %v4300_v63, %v4296_v37  ;;  %v4309_v63 = vshrl.u32 %v4176_v29, 16 }
 0x375   : > { %v4919_v41 = vrot.slane %v8069_v20, 5  ;;  %v4917_v25 = vsel %vm7083_vm15, %v6097_v12, %v4916_v56  ;;  %v4312_v12 = vshll.u32 %v4176_v29, 16  ;;  %v4322_v29 = vshrl.u32 %v8065_v44, 16 }
 0x376   : > { %6116 = vmatmul.msk.bf16.gmra.mxu2 %vm1773_vm10, %v5036_v7  ;;  %v4918_v7 = vrot.slane %v4916_v56, 4  ;;  %v4302_v57 = vrot.slane %v4301_v24, 4  ;;  %v3475_v56 = vld [vmem:[#allocation2 + $0x3c] sm:$0xe]  ;;  %v6314_v24 = vld [vmem:[#allocation2 + $0x44] sm:$0x1] }
 0x377   : > { %v2461_v54 = vpop.f32.mrf.mxu3 }
 0x378   : > { %v2511_v8 = vadd.f32 %v2461_v54, %v7670_v45  ;;  %v2751_v27 = vpop.f32.mrf.mxu1  ;;  %v4291_v45 = vor.u32 %v4290_v52, %v4287_v39  ;;  %v4920_v18 = vsel %vm7083_vm15, %v4918_v7, %v4919_v41 }
 0x379   : > { %v8081_v54 = vpop.f32.mrf.mxu2 }
 0x37a   : > { %v8078_v58 = vadd.f32 %v2751_v27, %v2511_v8  ;;  %8996 = vst [vmem:[#allocation73_spill] sm:$0xff] %v8081_v54  ;;  %v4292_v14 = vrot.slane %v4291_v45, 4  ;;  %v4306_v8 = vrot.slane %v4304_v6, 5  ;;  %v3685_v27 = vpack.c.b16 %v3657_v59, %v3656_v35  ;;  %v6313_v45 = vld [vmem:[#allocation2 + $0x40] sm:$0xf] }
 0x37b   : > { %6079 = vmatmul.msk.bf16.gmra.mxu1 %vm1773_vm10, %v4633_v60  ;;  %v5009_v60 = vunpack.c.l.b16 %v4917_v25  ;;  %v5010_v54 = vunpack.c.l.b16 %v4920_v18  ;;  %v3565_v7 = vrot.slane %v6313_v45, 5  ;;  %v5957_v59 = vrot.slane %v3475_v56, 9  ;;  %v8099_v18 = vld [vmem:[#allocation2 + $0x58] sm:$0xf] }
 0x37c   : > { %v4297_v13 = vsel %vm6923_vm8, %v4292_v14, %v4296_v37  ;;  %v3568_v25 = vrot.slane %v6314_v24, 5  ;;  %v4311_v37 = vrot.slane %v4309_v63, 4  ;;  %v4314_v14 = vrot.slane %v4312_v12, 5 }
 0x37d   : > { %v5037_v6 = vpack.c.b16 %v5010_v54, %v5009_v60  ;;  %v4605_v35 = vunpack.c.l.b16 %v4297_v13  ;;  %v3567_v45 = vrot.slane %v3565_v7, 4  ;;  %v8105_v54 = vld [vmem:[#allocation2 + $0x5c] sm:$0x1]  ;;  %v3566_v60 = vsel %vm7083_vm15, %v5957_v59, %v3565_v7 }
 0x37e   : > { %v4923_v13 = vrot.slane %v8099_v18, 5  ;;  %v4315_v56 = vor.u32 %v4314_v14, %v4311_v37  ;;  %v4324_v12 = vrot.slane %v4322_v29, 4  ;;  %v3658_v7 = vunpack.c.l.b16 %v3566_v60 }
 0x37f   : > { %v2463_v31 = vpop.f32.mrf.mxu3 }
 0x380   : > { %v2512_v39 = vadd.f32 %v2463_v31, %v7681_v9  ;;  %v2753_v52 = vpop.f32.mrf.mxu1  ;;  %v4307_v9 = vsel %vm6923_vm8, %v4302_v57, %v4306_v8  ;;  %v4318_v31 = vshll.u32 %v8065_v44, 16  ;;  %v3569_v57 = vsel %vm7083_vm15, %v3567_v45, %v3568_v25 }
 0x381   : > { %v8094_v41 = vpop.f32.mrf.mxu2  ;;  %v3659_v59 = vunpack.c.l.b16 %v3569_v57  ;;  %v4925_v24 = vrot.slane %v4923_v13, 4  ;;  %v4316_v25 = vrot.slane %v4315_v56, 4  ;;  %v4179_v56 = vld [vmem:[#allocation2 + $0x54] sm:$0xf] }
 0x382   : > { %v8090_v32 = vadd.f32 %v2753_v52, %v2512_v39  ;;  %8997 = vst [vmem:[#allocation74_spill] sm:$0xff] %v8094_v41  ;;  %v4606_v52 = vunpack.c.l.b16 %v4307_v9  ;;  %v4320_v63 = vrot.slane %v4318_v31, 5  ;;  %v4926_v9 = vrot.slane %v8105_v54, 5 }
 0x383   : > { %v3686_v45 = vpack.c.b16 %v3659_v59, %v3658_v7  ;;  %v6315_v59 = vld [vmem:[#allocation2 + $0x4c] sm:$0xf] }
 0x384   : > { %5976 = vmatmul.msk.bf16.gmra.mxu3 %vm1773_vm10, %v3685_v27  ;;  %v4634_v8 = vpack.c.b16 %v4606_v52, %v4605_v35  ;;  %v4328_v35 = vshll.u32 %v8069_v20, 16  ;;  %v4927_v37 = vsel %vm7083_vm15, %v4925_v24, %v4926_v9  ;;  %v4321_v60 = vsel %vm6923_vm8, %v4316_v25, %v4320_v63 }
 0x385   : > { %v5012_v20 = vunpack.c.l.b16 %v4927_v37  ;;  %v4607_v7 = vunpack.c.l.b16 %v4321_v60  ;;  %v3572_v24 = vrot.slane %v6315_v59, 5  ;;  %v4336_v25 = vshll.u32 %v4179_v56, 16 }
 0x386   : > { %6117 = vmatmul.msk.bf16.gmra.mxu2 %vm1773_vm10, %v5037_v6  ;;  %v4827_v6 = vld [vmem:[#allocation2 + $0x54] sm:$0xe]  ;;  %v4330_v29 = vrot.slane %v4328_v35, 5  ;;  %v4342_v35 = vshll.u32 %v8099_v18, 16 }
 0x387   : > { %v2466_v39 = vpop.f32.mrf.mxu3 }
 0x388   : > { %v2513_v27 = vadd.f32 %v2466_v39, %v7694_v11  ;;  %v2756_v41 = vpop.f32.mrf.mxu1  ;;  %v4325_v39 = vor.u32 %v4324_v12, %v4320_v63  ;;  %v4333_v63 = vshrl.u32 %v4179_v56, 16  ;;  %v4344_v60 = vrot.slane %v4342_v35, 5  ;;  %v4828_v56 = vld [vmem:[#allocation2 + $0x60] sm:$0xe] }
 0x389   : > { %v8114_v11 = vpop.f32.mrf.mxu2 }
 0x38a   : > { %v8112_v44 = vadd.f32 %v2756_v41, %v2513_v27  ;;  %8998 = vst [vmem:[#allocation75_spill] sm:$0xff] %v8114_v11  ;;  %v6098_v41 = vrot.slane %v4827_v6, 9  ;;  %v4326_v57 = vrot.slane %v4325_v39, 4  ;;  %v3476_v6 = vld [vmem:[#allocation2 + $0x48] sm:$0xe]  ;;  %v3574_v11 = vrot.slane %v3572_v24, 4 }
 0x38b   : > { %6080 = vmatmul.msk.bf16.gmra.mxu1 %vm1773_vm10, %v4634_v8 }
 0x38c   : > { %v4924_v27 = vsel %vm7083_vm15, %v6098_v41, %v4923_v13  ;;  %v4346_v13 = vshrl.u32 %v8099_v18, 16 }
 0x38d   : > { %v5011_v9 = vunpack.c.l.b16 %v4924_v27 }
 0x38e   : > { %v4348_v59 = vrot.slane %v4346_v13, 4 }
 0x38f   : > { %v2468_v52 = vpop.f32.mrf.mxu3  ;;  %v5038_v39 = vpack.c.b16 %v5012_v20, %v5011_v9  ;;  %v4335_v20 = vrot.slane %v4333_v63, 4  ;;  %v4338_v9 = vrot.slane %v4336_v25, 5 }
 0x390   : > { %v2514_v14 = vadd.f32 %v2468_v52, %v7700_v23  ;;  %v2758_v31 = vpop.f32.mrf.mxu1  ;;  %v4331_v23 = vsel %vm6923_vm8, %v4326_v57, %v4330_v29  ;;  %v8135_v52 = vld [vmem:[#allocation2 + $0x64] sm:$0xf]  ;;  %v8139_v57 = vld [vmem:[#allocation2 + $0x68] sm:$0x1] }
 0x391   : > { %v8128_v12 = vpop.f32.mrf.mxu2  ;;  %v4608_v37 = vunpack.c.l.b16 %v4331_v23  ;;  %v4930_v18 = vrot.slane %v8135_v52, 5  ;;  %v4933_v13 = vrot.slane %v8139_v57, 5  ;;  %v4339_v25 = vor.u32 %v4338_v9, %v4335_v20 }
 0x392   : > { %v8124_v8 = vadd.f32 %v2758_v31, %v2514_v14  ;;  %9000 = vst [vmem:[#allocation77_spill] sm:$0xff] %v8128_v12  ;;  %v5958_v14 = vrot.slane %v3476_v6, 9  ;;  %v6316_v31 = vld [vmem:[#allocation2 + $0x50] sm:$0x1]  ;;  %v4352_v6 = vshll.u32 %v8105_v54, 16 }
 0x393   : > { %v4635_v12 = vpack.c.b16 %v4608_v37, %v4607_v7  ;;  %v6099_v7 = vrot.slane %v4828_v56, 9  ;;  %v4932_v63 = vrot.slane %v4930_v18, 4 }
 0x394   : > { %8999 = vst [vmem:[#allocation76_spill] sm:$0xff] %v8124_v8  ;;  %5977 = vmatmul.msk.bf16.gmra.mxu3 %vm1773_vm10, %v3686_v45  ;;  %v3575_v45 = vrot.slane %v6316_v31, 5 }
 0x396   : > { %6118 = vmatmul.msk.bf16.gmra.mxu2 %vm1773_vm10, %v5038_v39  ;;  %v3576_v35 = vsel %vm7083_vm15, %v3574_v11, %v3575_v45  ;;  %v4349_v39 = vor.u32 %v4348_v59, %v4344_v60  ;;  %v4340_v45 = vrot.slane %v4339_v25, 4 }
 0x397   : > { %v2471_v41 = vpop.f32.mrf.mxu3  ;;  %v3661_v37 = vunpack.c.l.b16 %v3576_v35 }
 0x398   : > { %v2515_v29 = vadd.f32 %v2471_v41, %v7711_v17  ;;  %v2761_v27 = vpop.f32.mrf.mxu1  ;;  %v3573_v17 = vsel %vm7083_vm15, %v5958_v14, %v3572_v24  ;;  %v4931_v24 = vsel %vm7083_vm15, %v6099_v7, %v4930_v18  ;;  %v4350_v11 = vrot.slane %v4349_v39, 4  ;;  %v4182_v14 = vld [vmem:[#allocation2 + $0x60] sm:$0xf]  ;;  %v8167_v18 = vld [vmem:[#allocation2 + $0x70] sm:$0xf] }
 0x399   : > { %v8145_v31 = vpop.f32.mrf.mxu2  ;;  %v3660_v41 = vunpack.c.l.b16 %v3573_v17  ;;  %v5013_v17 = vunpack.c.l.b16 %v4931_v24  ;;  %v4357_v35 = vshrl.u32 %v4182_v14, 16  ;;  %v4370_v7 = vshrl.u32 %v8135_v52, 16 }
 0x39a   : > { %v8142_v23 = vadd.f32 %v2761_v27, %v2515_v29  ;;  %9002 = vst [vmem:[#allocation79_spill] sm:$0xff] %v8145_v31  ;;  %v4354_v29 = vrot.slane %v4352_v6, 5  ;;  %v4934_v27 = vsel %vm7083_vm15, %v4932_v63, %v4933_v13  ;;  %v4360_v13 = vshll.u32 %v4182_v14, 16  ;;  %v6317_v63 = vld [vmem:[#allocation2 + $0x58] sm:$0xf] }
 0x39b   : > { %6081 = vmatmul.msk.bf16.gmra.mxu1 %vm1773_vm10, %v4635_v12  ;;  %v3687_v59 = vpack.c.b16 %v3661_v37, %v3660_v41  ;;  %v5014_v20 = vunpack.c.l.b16 %v4934_v27  ;;  %v3579_v25 = vrot.slane %v6317_v63, 5  ;;  %v4359_v24 = vrot.slane %v4357_v35, 4  ;;  %v3477_v14 = vld [vmem:[#allocation2 + $0x54] sm:$0xe] }
 0x39c   : > { %9001 = vst [vmem:[#allocation78_spill] sm:$0xff] %v8142_v23  ;;  %v4355_v9 = vsel %vm6923_vm8, %v4350_v11, %v4354_v29 }
 0x39d   : > { %v4610_v39 = vunpack.c.l.b16 %v4355_v9  ;;  %v5039_v41 = vpack.c.b16 %v5014_v20, %v5013_v17  ;;  %v8176_v20 = vld [vmem:[#allocation2 + $0x74] sm:$0x1]  ;;  %v4376_v17 = vshll.u32 %v8139_v57, 16 }
 0x39f   : > { %v2473_v54 = vpop.f32.mrf.mxu3 }
 0x3a0   : > { %v2516_v12 = vadd.f32 %v2473_v54, %v7719_v62  ;;  %v2763_v31 = vpop.f32.mrf.mxu1  ;;  %v4345_v62 = vsel %vm6923_vm8, %v4340_v45, %v4344_v60  ;;  %v6318_v54 = vld [vmem:[#allocation2 + $0x5c] sm:$0x1]  ;;  %v4362_v45 = vrot.slane %v4360_v13, 5  ;;  %v4829_v13 = vld [vmem:[#allocation2 + $0x6c] sm:$0xe] }
 0x3a1   : > { %v8162_v6 = vpop.f32.mrf.mxu2  ;;  %v4609_v29 = vunpack.c.l.b16 %v4345_v62  ;;  %v3582_v27 = vrot.slane %v6318_v54, 5  ;;  %v4378_v54 = vrot.slane %v4376_v17, 5 }
 0x3a2   : > { %v8158_v56 = vadd.f32 %v2763_v31, %v2516_v12  ;;  %9004 = vst [vmem:[#allocation81_spill] sm:$0xff] %v8162_v6  ;;  %v4366_v31 = vshll.u32 %v8135_v52, 16  ;;  %v4937_v12 = vrot.slane %v8167_v18, 5  ;;  %v4372_v52 = vrot.slane %v4370_v7, 4 }
 0x3a3   : > { %v4636_v9 = vpack.c.b16 %v4610_v39, %v4609_v29  ;;  %v3581_v6 = vrot.slane %v3579_v25, 4 }
 0x3a4   : > { %9003 = vst [vmem:[#allocation80_spill] sm:$0xff] %v8158_v56  ;;  %5978 = vmatmul.msk.bf16.gmra.mxu3 %vm1773_vm10, %v3687_v59  ;;  %v4368_v59 = vrot.slane %v4366_v31, 5  ;;  %v4363_v31 = vor.u32 %v4362_v45, %v4359_v24  ;;  %v4185_v45 = vld [vmem:[#allocation2 + $0x6c] sm:$0xf] }
 0x3a5   : > { %v3583_v35 = vsel %vm7083_vm15, %v3581_v6, %v3582_v27 }
 0x3a6   : > { %6119 = vmatmul.msk.bf16.gmra.mxu2 %vm1773_vm10, %v5039_v41  ;;  %v4939_v41 = vrot.slane %v4937_v12, 4  ;;  %v4373_v7 = vor.u32 %v4372_v52, %v4368_v59  ;;  %v3663_v29 = vunpack.c.l.b16 %v3583_v35  ;;  %v4364_v27 = vrot.slane %v4363_v31, 4  ;;  %v3478_v31 = vld [vmem:[#allocation2 + $0x60] sm:$0xe] }
 0x3a7   : > { %v2476_v37 = vpop.f32.mrf.mxu3  ;;  %v4394_v52 = vshrl.u32 %v8167_v18, 16 }
 0x3a8   : > { %v2517_v60 = vadd.f32 %v2476_v37, %v7730_v4  ;;  %v2766_v11 = vpop.f32.mrf.mxu1  ;;  %v5959_v4 = vrot.slane %v3477_v14, 9  ;;  %v4940_v37 = vrot.slane %v8176_v20, 5 }
 0x3a9   : > { %v8179_v62 = vpop.f32.mrf.mxu2 }
 0x3aa   : > { %v8174_v63 = vadd.f32 %v2766_v11, %v2517_v60  ;;  %9006 = vst [vmem:[#allocation83_spill] sm:$0xff] %v8179_v62  ;;  %v3580_v39 = vsel %vm7083_vm15, %v5959_v4, %v3579_v25  ;;  %v6100_v60 = vrot.slane %v4829_v13, 9  ;;  %v4941_v11 = vsel %vm7083_vm15, %v4939_v41, %v4940_v37 }
 0x3ab   : > { %6082 = vmatmul.msk.bf16.gmra.mxu1 %vm1773_vm10, %v4636_v9  ;;  %v3662_v6 = vunpack.c.l.b16 %v3580_v39  ;;  %v4374_v62 = vrot.slane %v4373_v7, 4  ;;  %v4390_v25 = vshll.u32 %v8167_v18, 16  ;;  %v5016_v35 = vunpack.c.l.b16 %v4941_v11  ;;  %v6319_v7 = vld [vmem:[#allocation2 + $0x64] sm:$0xf] }
 0x3ac   : > { %9005 = vst [vmem:[#allocation82_spill] sm:$0xff] %v8174_v63  ;;  %v4938_v24 = vsel %vm7083_vm15, %v6100_v60, %v4937_v12  ;;  %v4369_v12 = vsel %vm6923_vm8, %v4364_v27, %v4368_v59  ;;  %v3586_v39 = vrot.slane %v6319_v7, 5  ;;  %v4381_v37 = vshrl.u32 %v4185_v45, 16 }
 0x3ad   : > { %v3688_v4 = vpack.c.b16 %v3663_v29, %v3662_v6  ;;  %v4379_v41 = vsel %vm6923_vm8, %v4374_v62, %v4378_v54  ;;  %v5015_v13 = vunpack.c.l.b16 %v4938_v24  ;;  %v4384_v29 = vshll.u32 %v4185_v45, 16  ;;  %v4830_v24 = vld [vmem:[#allocation2 + $0x78] sm:$0xe] }
 0x3ae   : > { %v4612_v18 = vunpack.c.l.b16 %v4379_v41  ;;  %v4392_v60 = vrot.slane %v4390_v25, 5  ;;  %v4396_v11 = vrot.slane %v4394_v52, 4  ;;  %v4611_v54 = vunpack.c.l.b16 %v4369_v12 }
 0x3af   : > { %v2478_v57 = vpop.f32.mrf.mxu3  ;;  %v5960_v7 = vrot.slane %v3478_v31, 9  ;;  %v3588_v41 = vrot.slane %v3586_v39, 4  ;;  %v4383_v25 = vrot.slane %v4381_v37, 4  ;;  %v4386_v52 = vrot.slane %v4384_v29, 5 }
 0x3b0   : > { %v2518_v14 = vadd.f32 %v2478_v57, %v7736_v53  ;;  %v2768_v9 = vpop.f32.mrf.mxu1  ;;  %v8203_v57 = vld [vmem:[#allocation2 + $0x7c] sm:$0xf]  ;;  %v4637_v45 = vpack.c.b16 %v4612_v18, %v4611_v54  ;;  %v6101_v12 = vrot.slane %v4830_v24, 9  ;;  %v4400_v31 = vshll.u32 %v8176_v20, 16 }
 0x3b1   : > { %v8198_v53 = vpop.f32.mrf.mxu2  ;;  %v3587_v37 = vsel %vm7083_vm15, %v5960_v7, %v3586_v39  ;;  %v4387_v18 = vor.u32 %v4386_v52, %v4383_v25 }
 0x3b2   : > { %v8194_v17 = vadd.f32 %v2768_v9, %v2518_v14  ;;  %9008 = vst [vmem:[#allocation85_spill] sm:$0xff] %v8198_v53  ;;  %v5040_v14 = vpack.c.b16 %v5016_v35, %v5015_v13  ;;  %v6320_v9 = vld [vmem:[#allocation2 + $0x68] sm:$0x1]  ;;  %v9009_v53 = vld [vmem:[#allocation48_spill] sm:$0xff]  ;;  %v4397_v35 = vor.u32 %v4396_v11, %v4392_v60  ;;  %v3664_v20 = vunpack.c.l.b16 %v3587_v37 }
 0x3b3   : > { %v3589_v6 = vrot.slane %v6320_v9, 5  ;;  %v4388_v7 = vrot.slane %v4387_v18, 4 }
 0x3b4   : > { %9007 = vst [vmem:[#allocation84_spill] sm:$0xff] %v8194_v17  ;;  %5979 = vmatmul.msk.bf16.gmra.mxu3 %vm1773_vm10, %v3688_v4  ;;  %v8205_v4 = vld [vmem:[#allocation2 + $0x80] sm:$0x1]  ;;  %v4944_v17 = vrot.slane %v8203_v57, 5  ;;  %v4398_v29 = vrot.slane %v4397_v35, 4 }
 0x3b5   : > { %v4947_v9 = vrot.slane %v8205_v4, 5 }
 0x3b6   : > { %6120 = vmatmul.msk.bf16.gmra.mxu2 %vm1773_vm10, %v5040_v14  ;;  %v4946_v14 = vrot.slane %v4944_v17, 4 }
 0x3b7   : > { %v2481_v62 = vpop.f32.mrf.mxu3 }
 0x3b8   : > { %v2519_v59 = vadd.f32 %v2481_v62, %v9009_v53  ;;  %v2771_v27 = vpop.f32.mrf.mxu1  ;;  %v3590_v53 = vsel %vm7083_vm15, %v3588_v41, %v3589_v6  ;;  %v4945_v62 = vsel %vm7083_vm15, %v6101_v12, %v4944_v17  ;;  %v4948_v54 = vsel %vm7083_vm15, %v4946_v14, %v4947_v9 }
 0x3b9   : > { %v8213_v63 = vpop.f32.mrf.mxu2  ;;  %v3665_v11 = vunpack.c.l.b16 %v3590_v53  ;;  %v5017_v56 = vunpack.c.l.b16 %v4945_v62  ;;  %v5018_v39 = vunpack.c.l.b16 %v4948_v54  ;;  %v4393_v53 = vsel %vm6923_vm8, %v4388_v7, %v4392_v60  ;;  %v6322_v60 = vld [vmem:[#allocation2 + $0x74] sm:$0x1]  ;;  %v4831_v7 = vld [vmem:[#allocation2 + $0x84] sm:$0xe] }
 0x3ba   : > { %v8210_v13 = vadd.f32 %v2771_v27, %v2519_v59  ;;  %9011 = vst [vmem:[#allocation86_spill] sm:$0xff] %v8213_v63  ;;  %v4402_v59 = vrot.slane %v4400_v31, 5  ;;  %v4188_v27 = vld [vmem:[#allocation2 + $0x78] sm:$0xf]  ;;  %v6321_v63 = vld [vmem:[#allocation2 + $0x70] sm:$0xf] }
 0x3bb   : > { %6083 = vmatmul.msk.bf16.gmra.mxu1 %vm1773_vm10, %v4637_v45  ;;  %v9012_v45 = vld [vmem:[#allocation49_spill] sm:$0xff]  ;;  %v3689_v17 = vpack.c.b16 %v3665_v11, %v3664_v20  ;;  %v4405_v35 = vshrl.u32 %v4188_v27, 16  ;;  %v4408_v12 = vshll.u32 %v4188_v27, 16  ;;  %v4418_v14 = vshrl.u32 %v8203_v57, 16  ;;  %v9015_v27 = vld [vmem:[#allocation50_spill] sm:$0xff] }
 0x3bc   : > { %9010 = vst [vmem:[#allocation48_spill] sm:$0xff] %v8210_v13  ;;  %v3593_v13 = vrot.slane %v6321_v63, 5  ;;  %v4403_v25 = vsel %vm6923_vm8, %v4398_v29, %v4402_v59  ;;  %v4414_v63 = vshll.u32 %v8203_v57, 16  ;;  %v5041_v37 = vpack.c.b16 %v5018_v39, %v5017_v56  ;;  %v8237_v29 = vld [vmem:[#allocation2 + $0x88] sm:$0xf] }
 0x3bd   : > { %v4614_v31 = vunpack.c.l.b16 %v4403_v25  ;;  %v4407_v62 = vrot.slane %v4405_v35, 4  ;;  %v4410_v11 = vrot.slane %v4408_v12, 5  ;;  %v3479_v59 = vld [vmem:[#allocation2 + $0x6c] sm:$0xe]  ;;  %v8241_v20 = vld [vmem:[#allocation2 + $0x8c] sm:$0x1] }
 0x3be   : > { %v3595_v18 = vrot.slane %v3593_v13, 4  ;;  %v4951_v56 = vrot.slane %v8237_v29, 5  ;;  %v4416_v39 = vrot.slane %v4414_v63, 5  ;;  %v4420_v25 = vrot.slane %v4418_v14, 4 }
 0x3bf   : > { %v2483_v24 = vpop.f32.mrf.mxu3  ;;  %v5961_v35 = vrot.slane %v3479_v59, 9  ;;  %v4424_v63 = vshll.u32 %v8205_v4, 16 }
 0x3c0   : > { %v2520_v6 = vadd.f32 %v2483_v24, %v9012_v45  ;;  %v2773_v41 = vpop.f32.mrf.mxu1  ;;  %v4613_v24 = vunpack.c.l.b16 %v4393_v53  ;;  %v4411_v53 = vor.u32 %v4410_v11, %v4407_v62 }
 0x3c1   : > { %v8230_v9 = vpop.f32.mrf.mxu2 }
 0x3c2   : > { %v8228_v52 = vadd.f32 %v2773_v41, %v2520_v6  ;;  %9014 = vst [vmem:[#allocation87_spill] sm:$0xff] %v8230_v9  ;;  %v3596_v41 = vrot.slane %v6322_v60, 5  ;;  %v4638_v57 = vpack.c.b16 %v4614_v31, %v4613_v24  ;;  %v3594_v31 = vsel %vm7083_vm15, %v5961_v35, %v3593_v13 }
 0x3c3   : > { %v4953_v24 = vrot.slane %v4951_v56, 4  ;;  %v4412_v59 = vrot.slane %v4411_v53, 4  ;;  %v4426_v9 = vrot.slane %v4424_v63, 5 }
 0x3c4   : > { %9013 = vst [vmem:[#allocation49_spill] sm:$0xff] %v8228_v52  ;;  %5980 = vmatmul.msk.bf16.gmra.mxu3 %vm1773_vm10, %v3689_v17  ;;  %v3597_v12 = vsel %vm7083_vm15, %v3595_v18, %v3596_v41  ;;  %v3666_v18 = vunpack.c.l.b16 %v3594_v31  ;;  %v9017_v41 = vld [vmem:[#allocation52_spill] sm:$0xff] }
 0x3c5   : > { %v3667_v14 = vunpack.c.l.b16 %v3597_v12  ;;  %v4417_v31 = vsel %vm6923_vm8, %v4412_v59, %v4416_v39 }
 0x3c6   : > { %6121 = vmatmul.msk.bf16.gmra.mxu2 %vm1773_vm10, %v5041_v37 }
 0x3c7   : > { %v2486_v54 = vpop.f32.mrf.mxu3  ;;  %v3690_v13 = vpack.c.b16 %v3667_v14, %v3666_v18  ;;  %v4438_v14 = vshll.u32 %v8237_v29, 16  ;;  %v9019_v18 = vld [vmem:[#allocation51_spill] sm:$0xff] }
 0x3c8   : > { %v2521_v45 = vadd.f32 %v2486_v54, %v9015_v27  ;;  %v2776_v6 = vpop.f32.mrf.mxu1  ;;  %v6102_v54 = vrot.slane %v4831_v7, 9  ;;  %v4954_v27 = vrot.slane %v8241_v20, 5 }
 0x3c9   : > { %v8249_v37 = vpop.f32.mrf.mxu2 }
 0x3ca   : > { %v8244_v17 = vadd.f32 %v2776_v6, %v2521_v45  ;;  %v4421_v45 = vor.u32 %v4420_v25, %v4416_v39  ;;  %v4191_v6 = vld [vmem:[#allocation2 + $0x84] sm:$0xf]  ;;  %v4952_v62 = vsel %vm7083_vm15, %v6102_v54, %v4951_v56  ;;  %v4955_v11 = vsel %vm7083_vm15, %v4953_v24, %v4954_v27  ;;  %v3480_v56 = vld [vmem:[#allocation2 + $0x78] sm:$0xe]  ;;  %v6323_v54 = vld [vmem:[#allocation2 + $0x7c] sm:$0xf] }
 0x3cb   : > { %6084 = vmatmul.msk.bf16.gmra.mxu1 %vm1773_vm10, %v4638_v57  ;;  %v4429_v4 = vshrl.u32 %v4191_v6, 16  ;;  %v4432_v12 = vshll.u32 %v4191_v6, 16  ;;  %v5019_v25 = vunpack.c.l.b16 %v4952_v62  ;;  %v5020_v53 = vunpack.c.l.b16 %v4955_v11  ;;  %v6324_v11 = vld [vmem:[#allocation2 + $0x80] sm:$0x1] }
 0x3cc   : > { %9016 = vst [vmem:[#allocation50_spill] sm:$0xff] %v8244_v17  ;;  %v4422_v35 = vrot.slane %v4421_v45, 4  ;;  %v3600_v27 = vrot.slane %v6323_v54, 5  ;;  %v4442_v24 = vshrl.u32 %v8237_v29, 16  ;;  %v4615_v45 = vunpack.c.l.b16 %v4417_v31  ;;  %v8276_v29 = vld [vmem:[#allocation2 + $0x98] sm:$0x1] }
 0x3cd   : > { %v4431_v6 = vrot.slane %v4429_v4, 4  ;;  %v3439_v39 = vadd.f32 %v9019_v18, %v7797_v42  ;;  %v5042_v59 = vpack.c.b16 %v5020_v53, %v5019_v25  ;;  %v5962_v62 = vrot.slane %v3480_v56, 9  ;;  %v4832_v4 = vld [vmem:[#allocation2 + $0x90] sm:$0xe]  ;;  %v8284_v18 = vpop.f32.mrf.mxu0 }
 0x3ce   : > { %v4427_v63 = vsel %vm6923_vm8, %v4422_v35, %v4426_v9  ;;  %v3602_v54 = vrot.slane %v3600_v27, 4  ;;  %v4444_v31 = vrot.slane %v4442_v24, 4  ;;  %v4961_v24 = vrot.slane %v8276_v29, 5 }
 0x3cf   : > { %v2488_v60 = vpop.f32.mrf.mxu3  ;;  %v3601_v56 = vsel %vm7083_vm15, %v5962_v62, %v3600_v27  ;;  %v4448_v27 = vshll.u32 %v8241_v20, 16 }
 0x3d0   : > { %v2522_v7 = vadd.f32 %v2488_v60, %v9017_v41  ;;  %v2778_v57 = vpop.f32.mrf.mxu1  ;;  %v4434_v60 = vrot.slane %v4432_v12, 5  ;;  %v3603_v41 = vrot.slane %v6324_v11, 5  ;;  %v4440_v12 = vrot.slane %v4438_v14, 5 }
 0x3d1   : > { %v8264_v52 = vpop.f32.mrf.mxu2  ;;  %v6103_v14 = vrot.slane %v4832_v4, 9 }
 0x3d2   : > { %v8260_v17 = vadd.f32 %v2778_v57, %v2522_v7  ;;  %v8273_v7 = vld [vmem:[#allocation2 + $0x94] sm:$0xf]  ;;  %v4435_v25 = vor.u32 %v4434_v60, %v4431_v6  ;;  %v4445_v6 = vor.u32 %v4444_v31, %v4440_v12  ;;  %v3668_v60 = vunpack.c.l.b16 %v3601_v56 }
 0x3d3   : > { %v4958_v42 = vrot.slane %v8273_v7, 5  ;;  %v4450_v56 = vrot.slane %v4448_v27, 5 }
 0x3d4   : > { %9018 = vst [vmem:[#allocation52_spill] sm:$0xff] %v8260_v17  ;;  %5981 = vmatmul.msk.bf16.gmra.mxu3 %vm1773_vm10, %v3690_v13  ;;  %v4616_v13 = vunpack.c.l.b16 %v4427_v63  ;;  %v3604_v63 = vsel %vm7083_vm15, %v3602_v54, %v3603_v41  ;;  %v4436_v11 = vrot.slane %v4435_v25, 4  ;;  %v9020_v41 = vld [vmem:[#allocation53_spill] sm:$0xff]  ;;  %v4194_v54 = vld [vmem:[#allocation2 + $0x90] sm:$0xf]  ;;  %v4446_v25 = vrot.slane %v4445_v6, 4 }
 0x3d5   : > { %v4960_v62 = vrot.slane %v4958_v42, 4  ;;  %v4462_v6 = vshll.u32 %v8273_v7, 16 }
 0x3d6   : > { %6122 = vmatmul.msk.bf16.gmra.mxu2 %vm1773_vm10, %v5042_v59  ;;  %v4639_v17 = vpack.c.b16 %v4616_v13, %v4615_v45  ;;  %v3669_v59 = vunpack.c.l.b16 %v3604_v63  ;;  %v8299_v13 = vld [vmem:[#allocation9] ss:$0 sm:$0xff]  ;;  %v4453_v63 = vshrl.u32 %v4194_v54, 16 }
 0x3d7   : > { %v3761_v57 = vpop.f32.mrf.mxu3  ;;  %v4962_v4 = vsel %vm7083_vm15, %v4960_v62, %v4961_v24  ;;  %v3481_v24 = vld [vmem:[#allocation2 + $0x84] sm:$0xe]  ;;  %v6325_v62 = vld [vmem:[#allocation2 + $0x88] sm:$0xf] }
 0x3d8   : > { %v3841_v9 = vadd.f32 %v3761_v57, %v3439_v39  ;;  %v4710_v35 = vpop.f32.mrf.mxu1  ;;  %v3440_v57 = vadd.f32 %v9020_v41, %v7815_v51  ;;  %v4441_v51 = vsel %vm6923_vm8, %v4436_v11, %v4440_v12  ;;  %v4451_v12 = vsel %vm6923_vm8, %v4446_v25, %v4450_v56  ;;  %v8323_v25 = vld [vmem:[#allocation2 + $0xa0] sm:$0xf] }
 0x3d9   : > { %v8287_v39 = vpop.f32.mrf.mxu2  ;;  %v4617_v11 = vunpack.c.l.b16 %v4441_v51  ;;  %v4618_v56 = vunpack.c.l.b16 %v4451_v12 }
 0x3da   : > { %v4132_v53 = vadd.f32 %v7804_v61, %v3841_v9  ;;  %v8293_v61 = vld [vmem:[%s8886_s5] ss:$0 sm:$0xff] }
 0x3db   : > { %6085 = vmatmul.msk.bf16.gmra.mxu1 %vm1773_vm10, %v4639_v17 }
 0x3dc   : > { %v4790_v45 = vadd.f32 %v4710_v35, %v4132_v53  ;;  %v4959_v35 = vsel %vm7083_vm15, %v6103_v14, %v4958_v42  ;;  %v5022_v14 = vunpack.c.l.b16 %v4962_v4 }
 0x3dd   : > { %v5021_v42 = vunpack.c.l.b16 %v4959_v35 }
 0x3de   : > { %v5192_v17 = vadd.f32 %v8249_v37, %v4790_v45  ;;  %v3691_v37 = vpack.c.b16 %v3669_v59, %v3668_v60  ;;  %v4456_v45 = vshll.u32 %v4194_v54, 16  ;;  %v8317_v59 = vpop.f32.mrf.mxu0 }
 0x3df   : > { %v3763_v9 = vpop.f32.mrf.mxu3 }
 0x3e0   : > { %v5228_v20 = vmul.f32 %v8293_v61, %v5192_v17  ;;  %v3842_v31 = vadd.f32 %v3763_v9, %v3440_v57  ;;  %v4712_v53 = vpop.f32.mrf.mxu1  ;;  %v3607_v17 = vrot.slane %v6325_v62, 5  ;;  %v6326_v57 = vld [vmem:[#allocation2 + $0x8c] sm:$0x1]  ;;  %v4455_v9 = vrot.slane %v4453_v63, 4 }
 0x3e1   : > { %v8310_v8 = vpop.f32.mrf.mxu2  ;;  %v3610_v54 = vrot.slane %v6326_v57, 5  ;;  %v4458_v35 = vrot.slane %v4456_v45, 5  ;;  %v4833_v45 = vld [vmem:[#allocation2 + $0x9c] sm:$0xe]  ;;  %v4464_v62 = vrot.slane %v4462_v6, 5 }
 0x3e2   : > { %v4133_v41 = vadd.f32 %v7820_v46, %v3842_v31  ;;  %v5264_v23 = vadd.f32 %v8299_v13, %v5228_v20  ;;  %v4466_v46 = vshrl.u32 %v8273_v7, 16  ;;  %v9021_v20 = vld [vmem:[#allocation54_spill] sm:$0xff]  ;;  %v5043_v31 = vpack.c.b16 %v5022_v14, %v5021_v42 }
 0x3e3   : > { %v4459_v42 = vor.u32 %v4458_v35, %v4455_v9  ;;  %v6104_v6 = vrot.slane %v4833_v45, 9 }
 0x3e4   : > { %v4791_v27 = vadd.f32 %v4712_v53, %v4133_v41  ;;  %5982 = vmatmul.msk.bf16.gmra.mxu3 %vm1773_vm10, %v3691_v37  ;;  %v5296_v60 = vmax.f32 %v5264_v23, 0.0  ;;  %v3441_v23 = vadd.f32 %v9021_v20, %v7824_v34  ;;  %v5963_v53 = vrot.slane %v3481_v24, 9 }
 0x3e5   : > { %v3609_v37 = vrot.slane %v3607_v17, 4  ;;  %v4965_v34 = vrot.slane %v8323_v25, 5 }
 0x3e6   : > { %v5193_v4 = vadd.f32 %v8264_v52, %v4791_v27  ;;  %5360 = vrot.lane.b32.xlu0 %v5296_v60, %s6576_s10  ;;  %6123 = vmatmul.msk.bf16.gmra.mxu2 %vm1773_vm10, %v5043_v31  ;;  %v8327_v52 = vld [vmem:[#allocation2 + $0xa4] sm:$0x1]  ;;  %v4468_v27 = vrot.slane %v4466_v46, 4  ;;  %v4640_v60 = vpack.c.b16 %v4618_v56, %v4617_v11  ;;  %v3608_v12 = vsel %vm7083_vm15, %v5963_v53, %v3607_v17  ;;  %v4197_v56 = vld [vmem:[#allocation2 + $0x9c] sm:$0xf] }
 0x3e7   : > { %v3766_v7 = vpop.f32.mrf.mxu3  ;;  %v3611_v57 = vsel %vm7083_vm15, %v3609_v37, %v3610_v54  ;;  %v4968_v46 = vrot.slane %v8327_v52, 5  ;;  %v3670_v35 = vunpack.c.l.b16 %v3608_v12  ;;  %v4967_v31 = vrot.slane %v4965_v34, 4  ;;  %v9022_v54 = vld [vmem:[#allocation55_spill] sm:$0xff]  ;;  %v8345_v37 = vpop.f32.mrf.mxu0 }
 0x3e8   : > { %v5229_v51 = vmul.f32 %v8293_v61, %v5193_v4  ;;  %v3843_v41 = vadd.f32 %v3766_v7, %v3441_v23  ;;  %v4715_v63 = vpop.f32.mrf.mxu1  ;;  %v4469_v9 = vor.u32 %v4468_v27, %v4464_v62  ;;  %v3671_v23 = vunpack.c.l.b16 %v3611_v57 }
 0x3e9   : > { %v8337_v4 = vpop.f32.mrf.mxu2  ;;  %v4460_v7 = vrot.slane %v4459_v42, 4  ;;  %v3442_v53 = vadd.f32 %v9022_v54, %v7842_v2 }
 0x3ea   : > { %v4134_v14 = vadd.f32 %v7838_v33, %v3843_v41  ;;  %v5265_v24 = vadd.f32 %v8299_v13, %v5229_v51  ;;  %v4472_v33 = vshll.u32 %v8276_v29, 16  ;;  %v4966_v41 = vsel %vm7083_vm15, %v6104_v6, %v4965_v34 }
 0x3eb   : > { %6086 = vmatmul.msk.bf16.gmra.mxu1 %vm1773_vm10, %v4640_v60  ;;  %v4969_v29 = vsel %vm7083_vm15, %v4967_v31, %v4968_v46  ;;  %v3692_v42 = vpack.c.b16 %v3671_v23, %v3670_v35  ;;  %v4465_v2 = vsel %vm6923_vm8, %v4460_v7, %v4464_v62  ;;  %v5023_v34 = vunpack.c.l.b16 %v4966_v41 }
 0x3ec   : > { %v4792_v11 = vadd.f32 %v4715_v63, %v4134_v14  ;;  %v5297_v20 = vmax.f32 %v5265_v24, 0.0  ;;  %v4474_v60 = vrot.slane %v4472_v33, 5  ;;  %v4477_v14 = vshrl.u32 %v4197_v56, 16 }
 0x3ed   : > { %v4480_v24 = vshll.u32 %v4197_v56, 16  ;;  %v5024_v6 = vunpack.c.l.b16 %v4969_v29  ;;  %v4619_v23 = vunpack.c.l.b16 %v4465_v2  ;;  %v9023_v56 = vld [vmem:[#allocation56_spill] sm:$0xff] }
 0x3ee   : > { %v5194_v17 = vadd.f32 %v8287_v39, %v4792_v11  ;;  %5362 = vrot.lane.b32.xlu1 %v5297_v20, %s6576_s10  ;;  %v4470_v39 = vrot.slane %v4469_v9, 4  ;;  %v3482_v11 = vld [vmem:[#allocation2 + $0x90] sm:$0xe]  ;;  %v6327_v20 = vld [vmem:[#allocation2 + $0x94] sm:$0xf]  ;;  %v4486_v9 = vshll.u32 %v8323_v25, 16 }
 0x3ef   : > { %v3768_v51 = vpop.f32.mrf.mxu3  ;;  %v3614_v31 = vrot.slane %v6327_v20, 5  ;;  %v5964_v7 = vrot.slane %v3482_v11, 9  ;;  %v4482_v54 = vrot.slane %v4480_v24, 5  ;;  %v5044_v41 = vpack.c.b16 %v5024_v6, %v5023_v34  ;;  %v6328_v29 = vld [vmem:[#allocation2 + $0x98] sm:$0x1] }
 0x3f0   : > { %v5230_v63 = vmul.f32 %v8293_v61, %v5194_v17  ;;  %v3844_v45 = vadd.f32 %v3768_v51, %v3442_v53  ;;  %v4717_v27 = vpop.f32.mrf.mxu1  ;;  %v4475_v62 = vsel %vm6923_vm8, %v4470_v39, %v4474_v60  ;;  %v4479_v17 = vrot.slane %v4477_v14, 4  ;;  %v4834_v14 = vld [vmem:[#allocation2 + $0xa8] sm:$0xe] }
 0x3f1   : > { %v8356_v46 = vpop.f32.mrf.mxu2  ;;  %v3443_v51 = vadd.f32 %v9023_v56, %v7854_v43  ;;  %v4620_v39 = vunpack.c.l.b16 %v4475_v62  ;;  %v3616_v60 = vrot.slane %v3614_v31, 4  ;;  %v4488_v24 = vrot.slane %v4486_v9, 5  ;;  %v8373_v43 = vpop.f32.mrf.mxu0 }
 0x3f2   : > { %v4135_v12 = vadd.f32 %v7856_v15, %v3844_v45  ;;  %v5266_v57 = vadd.f32 %v8299_v13, %v5230_v63  ;;  %v4490_v15 = vshrl.u32 %v8323_v25, 16  ;;  %v3617_v63 = vrot.slane %v6328_v29, 5  ;;  %v8367_v45 = vld [vmem:[#allocation2 + $0xac] sm:$0xf] }
 0x3f3   : > { %v4972_v34 = vrot.slane %v8367_v45, 5  ;;  %v4483_v6 = vor.u32 %v4482_v54, %v4479_v17  ;;  %v6105_v62 = vrot.slane %v4834_v14, 9 }
 0x3f4   : > { %v4793_v33 = vadd.f32 %v4717_v27, %v4135_v12  ;;  %5983 = vmatmul.msk.bf16.gmra.mxu3 %vm1773_vm10, %v3692_v42  ;;  %v5298_v35 = vmax.f32 %v5266_v57, 0.0  ;;  %v4492_v12 = vrot.slane %v4490_v15, 4  ;;  %v4641_v57 = vpack.c.b16 %v4620_v39, %v4619_v23 }
 0x3f5   : > { %v4973_v39 = vsel %vm7083_vm15, %v6105_v62, %v4972_v34 }
 0x3f6   : > { %v5195_v53 = vadd.f32 %v8310_v8, %v4793_v33  ;;  %5364 = vrot.lane.b32.xlu2 %v5298_v35, %s6576_s10  ;;  %6124 = vmatmul.msk.bf16.gmra.mxu2 %vm1773_vm10, %v5044_v41  ;;  %v8371_v8 = vld [vmem:[#allocation2 + $0xb0] sm:$0x1]  ;;  %v3615_v33 = vsel %vm7083_vm15, %v5964_v7, %v3614_v31  ;;  %v3618_v35 = vsel %vm7083_vm15, %v3616_v60, %v3617_v63  ;;  %v4484_v41 = vrot.slane %v4483_v6, 4  ;;  %v9024_v7 = vld [vmem:[#allocation57_spill] sm:$0xff]  ;;  %v4200_v63 = vld [vmem:[#allocation2 + $0xa8] sm:$0xf] }
 0x3f7   : > { %v3771_v27 = vpop.f32.mrf.mxu3  ;;  %v4975_v15 = vrot.slane %v8371_v8, 5  ;;  %v4493_v17 = vor.u32 %v4492_v12, %v4488_v24  ;;  %v3672_v54 = vunpack.c.l.b16 %v3615_v33  ;;  %v3673_v56 = vunpack.c.l.b16 %v3618_v35  ;;  %v3483_v33 = vld [vmem:[#allocation2 + $0x9c] sm:$0xe] }
 0x3f8   : > { %v5231_v25 = vmul.f32 %v8293_v61, %v5195_v53  ;;  %v3845_v42 = vadd.f32 %v3771_v27, %v3443_v51  ;;  %v4720_v2 = vpop.f32.mrf.mxu1  ;;  %v4974_v51 = vrot.slane %v4972_v34, 4  ;;  %v3444_v29 = vadd.f32 %v9024_v7, %v7871_v40 }
 0x3f9   : > { %v8383_v9 = vpop.f32.mrf.mxu2  ;;  %v4489_v12 = vsel %vm6923_vm8, %v4484_v41, %v4488_v24  ;;  %v4504_v40 = vshll.u32 %v4200_v63, 16  ;;  %v5025_v34 = vunpack.c.l.b16 %v4973_v39  ;;  %v8400_v35 = vpop.f32.mrf.mxu0  ;;  %v6330_v41 = vld [vmem:[#allocation2 + $0xa4] sm:$0x1] }
 0x3fa   : > { %v4136_v11 = vadd.f32 %v7876_v5, %v3845_v42  ;;  %v5267_v20 = vadd.f32 %v8299_v13, %v5231_v25  ;;  %v4496_v5 = vshll.u32 %v8327_v52, 16  ;;  %v4976_v60 = vsel %vm7083_vm15, %v4974_v51, %v4975_v15  ;;  %v6329_v15 = vld [vmem:[#allocation2 + $0xa0] sm:$0xf] }
 0x3fb   : > { %6087 = vmatmul.msk.bf16.gmra.mxu1 %vm1773_vm10, %v4641_v57  ;;  %v4501_v57 = vshrl.u32 %v4200_v63, 16  ;;  %v5965_v51 = vrot.slane %v3483_v33, 9  ;;  %v9025_v63 = vld [vmem:[#allocation60_spill] sm:$0xff] }
 0x3fc   : > { %v4794_v23 = vadd.f32 %v4720_v2, %v4136_v11  ;;  %v5299_v53 = vmax.f32 %v5267_v20, 0.0  ;;  %v4494_v2 = vrot.slane %v4493_v17, 4  ;;  %v4498_v14 = vrot.slane %v4496_v5, 5  ;;  %v8408_v5 = vld [vmem:[#allocation2 + $0xb8] sm:$0xf] }
 0x3fd   : > { %v5026_v20 = vunpack.c.l.b16 %v4976_v60  ;;  %v4503_v7 = vrot.slane %v4501_v57, 4  ;;  %v8418_v57 = vld [vmem:[#allocation2 + $0xbc] sm:$0x1] }
 0x3fe   : > { %v5196_v31 = vadd.f32 %v8337_v4, %v4794_v23  ;;  %5366 = vrot.lane.b32.xlu0 %v5299_v53, %s6576_s10  ;;  %v3693_v4 = vpack.c.b16 %v3673_v56, %v3672_v54  ;;  %v3621_v23 = vrot.slane %v6329_v15, 5  ;;  %v4510_v53 = vshll.u32 %v8367_v45, 16 }
 0x3ff   : > { %v3773_v27 = vpop.f32.mrf.mxu3  ;;  %v4514_v54 = vshrl.u32 %v8367_v45, 16  ;;  %v4621_v56 = vunpack.c.l.b16 %v4489_v12  ;;  %v5045_v60 = vpack.c.b16 %v5026_v20, %v5025_v34 }
 0x400   : > { %v5232_v52 = vmul.f32 %v8293_v61, %v5196_v31  ;;  %v3846_v25 = vadd.f32 %v3773_v27, %v3444_v29  ;;  %v4722_v42 = vpop.f32.mrf.mxu1  ;;  %v3624_v31 = vrot.slane %v6330_v41, 5  ;;  %v9026_v27 = vld [vmem:[#allocation58_spill] sm:$0xff]  ;;  %v3623_v12 = vrot.slane %v3621_v23, 4 }
 0x401   : > { %v8402_v62 = vpop.f32.mrf.mxu2  ;;  %v3445_v39 = vadd.f32 %v9026_v27, %v9025_v63  ;;  %v4516_v34 = vrot.slane %v4514_v54, 4  ;;  %v9028_v63 = vld [vmem:[#allocation59_spill] sm:$0xff] }
 0x402   : > { %v4137_v6 = vadd.f32 %v7889_v1, %v3846_v25  ;;  %v5268_v11 = vadd.f32 %v8299_v13, %v5232_v52  ;;  %v4499_v1 = vsel %vm6923_vm8, %v4494_v2, %v4498_v14  ;;  %v4506_v52 = vrot.slane %v4504_v40, 5 }
 0x403   : > { %v4979_v2 = vrot.slane %v8408_v5, 5  ;;  %v3625_v33 = vsel %vm7083_vm15, %v3623_v12, %v3624_v31 }
 0x404   : > { %v4795_v17 = vadd.f32 %v4722_v42, %v4137_v6  ;;  %5984 = vmatmul.msk.bf16.gmra.mxu3 %vm1773_vm10, %v3693_v4  ;;  %v5300_v24 = vmax.f32 %v5268_v11, 0.0  ;;  %v4622_v42 = vunpack.c.l.b16 %v4499_v1  ;;  %v3622_v6 = vsel %vm7083_vm15, %v5965_v51, %v3621_v23  ;;  %v8431_v51 = vpop.f32.mrf.mxu0 }
 0x405   : > { %v4512_v11 = vrot.slane %v4510_v53, 5  ;;  %v4507_v15 = vor.u32 %v4506_v52, %v4503_v7  ;;  %v4981_v1 = vrot.slane %v4979_v2, 4  ;;  %v4520_v23 = vshll.u32 %v8371_v8, 16  ;;  %v9027_v7 = vld [vmem:[#allocation62_spill] sm:$0xff]  ;;  %v4203_v52 = vld [vmem:[#allocation2 + $0xb4] sm:$0xf] }
 0x406   : > { %v5197_v29 = vadd.f32 %v8356_v46, %v4795_v17  ;;  %5368 = vrot.lane.b32.xlu1 %v5300_v24, %s6576_s10  ;;  %6125 = vmatmul.msk.bf16.gmra.mxu2 %vm1773_vm10, %v5045_v60  ;;  %v4642_v46 = vpack.c.b16 %v4622_v42, %v4621_v56  ;;  %v4835_v24 = vld [vmem:[#allocation2 + $0xb4] sm:$0xe]  ;;  %v4982_v56 = vrot.slane %v8418_v57, 5  ;;  %v3675_v41 = vunpack.c.l.b16 %v3625_v33 }
 0x407   : > { %v3776_v25 = vpop.f32.mrf.mxu3  ;;  %v3446_v27 = vadd.f32 %v9028_v63, %v9027_v7  ;;  %v4508_v60 = vrot.slane %v4507_v15, 4  ;;  %v4522_v42 = vrot.slane %v4520_v23, 5  ;;  %v4525_v15 = vshrl.u32 %v4203_v52, 16 }
 0x408   : > { %v5233_v45 = vmul.f32 %v8293_v61, %v5197_v29  ;;  %v3847_v14 = vadd.f32 %v3776_v25, %v3445_v39  ;;  %v4725_v4 = vpop.f32.mrf.mxu1  ;;  %v4517_v29 = vor.u32 %v4516_v34, %v4512_v11  ;;  %v6106_v39 = vrot.slane %v4835_v24, 9  ;;  %v3484_v34 = vld [vmem:[#allocation2 + $0xa8] sm:$0xe] }
 0x409   : > { %v8427_v17 = vpop.f32.mrf.mxu2  ;;  %v4983_v8 = vsel %vm7083_vm15, %v4981_v1, %v4982_v56  ;;  %v4528_v24 = vshll.u32 %v4203_v52, 16  ;;  %v5966_v7 = vrot.slane %v3484_v34, 9 }
 0x40a   : > { %v4138_v40 = vadd.f32 %v8284_v18, %v3847_v14  ;;  %v5269_v20 = vadd.f32 %v8299_v13, %v5233_v45  ;;  %v3674_v18 = vunpack.c.l.b16 %v3622_v6  ;;  %v6331_v45 = vld [vmem:[#allocation2 + $0xac] sm:$0xf]  ;;  %v4980_v6 = vsel %vm7083_vm15, %v6106_v39, %v4979_v2 }
 0x40b   : > { %6088 = vmatmul.msk.bf16.gmra.mxu1 %vm1773_vm10, %v4642_v46  ;;  %v3628_v14 = vrot.slane %v6331_v45, 5  ;;  %v4518_v33 = vrot.slane %v4517_v29, 4  ;;  %v5028_v23 = vunpack.c.l.b16 %v4983_v8  ;;  %v4527_v39 = vrot.slane %v4525_v15, 4  ;;  %v8470_v15 = vld [vmem:[#allocation2 + $0xc8] sm:$0x1] }
 0x40c   : > { %v4796_v53 = vadd.f32 %v4725_v4, %v4138_v40  ;;  %v5301_v54 = vmax.f32 %v5269_v20, 0.0  ;;  %v4534_v4 = vshll.u32 %v8408_v5, 16  ;;  %v4538_v40 = vshrl.u32 %v8408_v5, 16  ;;  %v6332_v5 = vld [vmem:[#allocation2 + $0xb0] sm:$0x1] }
 0x40d   : > { %v3694_v20 = vpack.c.b16 %v3675_v41, %v3674_v18  ;;  %v4523_v2 = vsel %vm6923_vm8, %v4518_v33, %v4522_v42  ;;  %v3631_v18 = vrot.slane %v6332_v5, 5  ;;  %v4530_v52 = vrot.slane %v4528_v24, 5  ;;  %v4836_v24 = vld [vmem:[#allocation2 + $0xc0] sm:$0xe] }
 0x40e   : > { %v5198_v31 = vadd.f32 %v8383_v9, %v4796_v53  ;;  %5370 = vrot.lane.b32.xlu2 %v5301_v54, %s6576_s10  ;;  %v4513_v53 = vsel %vm6923_vm8, %v4508_v60, %v4512_v11  ;;  %v4540_v63 = vrot.slane %v4538_v40, 4  ;;  %v9029_v60 = vld [vmem:[#allocation64_spill] sm:$0xff]  ;;  %v3630_v45 = vrot.slane %v3628_v14, 4 }
 0x40f   : > { %v3778_v25 = vpop.f32.mrf.mxu3 }
 0x410   : > { %v5234_v12 = vmul.f32 %v8293_v61, %v5198_v31  ;;  %v3848_v9 = vadd.f32 %v3778_v25, %v3446_v27  ;;  %v4727_v46 = vpop.f32.mrf.mxu1  ;;  %v5027_v31 = vunpack.c.l.b16 %v4980_v6  ;;  %v4623_v27 = vunpack.c.l.b16 %v4513_v53  ;;  %v9030_v25 = vld [vmem:[#allocation61_spill] sm:$0xff] }
 0x411   : > { %v8448_v54 = vpop.f32.mrf.mxu2  ;;  %v3447_v8 = vadd.f32 %v9030_v25, %v9029_v60  ;;  %v3629_v6 = vsel %vm7083_vm15, %v5966_v7, %v3628_v14  ;;  %v3632_v33 = vsel %vm7083_vm15, %v3630_v45, %v3631_v18  ;;  %v6107_v18 = vrot.slane %v4836_v24, 9  ;;  %v4206_v25 = vld [vmem:[#allocation2 + $0xc0] sm:$0xf] }
 0x412   : > { %v4139_v1 = vadd.f32 %v8317_v59, %v3848_v9  ;;  %v5270_v56 = vadd.f32 %v8299_v13, %v5234_v12  ;;  %v8453_v59 = vrot.slane %v4534_v4, 5  ;;  %v5046_v42 = vpack.c.b16 %v5028_v23, %v5027_v31  ;;  %v8459_v12 = vld [vmem:[#allocation2 + $0xc4] sm:$0xf]  ;;  %v8461_v9 = vpop.f32.mrf.mxu0 }
 0x413   : > { %v4624_v4 = vunpack.c.l.b16 %v4523_v2  ;;  %v4986_v34 = vrot.slane %v8459_v12, 5  ;;  %v4531_v23 = vor.u32 %v4530_v52, %v4527_v39  ;;  %v3676_v31 = vunpack.c.l.b16 %v3629_v6 }
 0x414   : > { %v4797_v41 = vadd.f32 %v4727_v46, %v4139_v1  ;;  %5985 = vmatmul.msk.bf16.gmra.mxu3 %vm1773_vm10, %v3694_v20  ;;  %v5302_v29 = vmax.f32 %v5270_v56, 0.0  ;;  %v4541_v1 = vor.u32 %v4540_v63, %v8453_v59  ;;  %v4544_v2 = vshll.u32 %v8418_v57, 16 }
 0x415   : > { %v4643_v56 = vpack.c.b16 %v4624_v4, %v4623_v27  ;;  %v3677_v5 = vunpack.c.l.b16 %v3632_v33  ;;  %v4532_v57 = vrot.slane %v4531_v23, 4  ;;  %v4987_v45 = vsel %vm7083_vm15, %v6107_v18, %v4986_v34  ;;  %v8488_v4 = vld [vmem:[#allocation2 + $0xb8] sm:$0xf] }
 0x416   : > { %v5199_v11 = vadd.f32 %v8402_v62, %v4797_v41  ;;  %5372 = vrot.lane.b32.xlu0 %v5302_v29, %s6576_s10  ;;  %6126 = vmatmul.msk.bf16.gmra.mxu2 %vm1773_vm10, %v5046_v42  ;;  %v4988_v41 = vrot.slane %v4986_v34, 4  ;;  %v4989_v29 = vrot.slane %v8470_v15, 5  ;;  %v4542_v27 = vrot.slane %v4541_v1, 4 }
 0x417   : > { %v3781_v46 = vpop.f32.mrf.mxu3  ;;  %v4546_v60 = vrot.slane %v4544_v2, 5  ;;  %v3695_v42 = vpack.c.b16 %v3677_v5, %v3676_v31  ;;  %v4549_v34 = vshrl.u32 %v4206_v25, 16  ;;  %v4552_v24 = vshll.u32 %v4206_v25, 16 }
 0x418   : > { %v5235_v62 = vmul.f32 %v8293_v61, %v5199_v11  ;;  %v3849_v40 = vadd.f32 %v3781_v46, %v3447_v8  ;;  %v4730_v20 = vpop.f32.mrf.mxu1  ;;  %v4990_v46 = vsel %vm7083_vm15, %v4988_v41, %v4989_v29  ;;  %v4558_v1 = vshll.u32 %v8459_v12, 16 }
 0x419   : > { %v8477_v7 = vpop.f32.mrf.mxu2  ;;  %v5030_v31 = vunpack.c.l.b16 %v4990_v46 }
 0x41a   : > { %v4140_v14 = vadd.f32 %v8345_v37, %v3849_v40  ;;  %v5271_v53 = vadd.f32 %v8299_v13, %v5235_v62  ;;  %v9031_v37 = vld [vmem:[#allocation63_spill] sm:$0xff]  ;;  %v8497_v33 = vpop.f32.mrf.mxu0 }
 0x41b   : > { %6089 = vmatmul.msk.bf16.gmra.mxu1 %vm1773_vm10, %v4643_v56  ;;  %v3448_v52 = vadd.f32 %v9031_v37, %v7918_v48  ;;  %v4537_v48 = vsel %vm6923_vm8, %v4532_v57, %v8453_v59  ;;  %v4562_v56 = vshrl.u32 %v8459_v12, 16  ;;  %v6334_v59 = vld [vmem:[#allocation2 + $0xbc] sm:$0x1]  ;;  %v4554_v12 = vrot.slane %v4552_v24, 5 }
 0x41c   : > { %v4798_v11 = vadd.f32 %v4730_v20, %v4140_v14  ;;  %v5303_v63 = vmax.f32 %v5271_v53, 0.0  ;;  %v4547_v20 = vsel %vm6923_vm8, %v4542_v27, %v4546_v60  ;;  %v5029_v53 = vunpack.c.l.b16 %v4987_v45 }
 0x41d   : > { %v3638_v5 = vrot.slane %v6334_v59, 5  ;;  %v4626_v29 = vunpack.c.l.b16 %v4547_v20  ;;  %v4625_v27 = vunpack.c.l.b16 %v4537_v48  ;;  %v8506_v37 = vrot.slane %v4558_v1, 5  ;;  %v4837_v48 = vld [vmem:[#allocation2 + $0xcc] sm:$0xe] }
 0x41e   : > { %v5200_v39 = vadd.f32 %v8427_v17, %v4798_v11  ;;  %5374 = vrot.lane.b32.xlu1 %v5303_v63, %s6576_s10  ;;  %v3635_v17 = vrot.slane %v8488_v4, 5  ;;  %v3485_v11 = vld [vmem:[#allocation2 + $0xb4] sm:$0xe]  ;;  %v5047_v60 = vpack.c.b16 %v5030_v31, %v5029_v53  ;;  %v4564_v25 = vrot.slane %v4562_v56, 4  ;;  %v6190_v1 = vld [vmem:[#allocation2 + $0xcc] sm:$0xff] }
 0x41f   : > { %v3783_v8 = vpop.f32.mrf.mxu3  ;;  %v4568_v53 = vshll.u32 %v8470_v15, 16  ;;  %6072 = vmatmul.msk.bf16.gmra.mxu0 %vm1773_vm10, %v6190_v1 }
 0x420   : > { %v5236_v6 = vmul.f32 %v8293_v61, %v5200_v39  ;;  %v3850_v62 = vadd.f32 %v3783_v8, %v3448_v52  ;;  %v4732_v40 = vpop.f32.mrf.mxu1  ;;  %v3637_v63 = vrot.slane %v3635_v17, 4  ;;  %v4551_v39 = vrot.slane %v4549_v34, 4  ;;  %v9032_v52 = vld [vmem:[#allocation65_spill] sm:$0xff] }
 0x421   : > { %v8503_v2 = vpop.f32.mrf.mxu2  ;;  %v3449_v57 = vadd.f32 %v9032_v52, %v7925_v28  ;;  %v6108_v28 = vrot.slane %v4837_v48, 9 }
 0x422   : > { %v4141_v23 = vadd.f32 %v8373_v43, %v3850_v62  ;;  %v5272_v14 = vadd.f32 %v8299_v13, %v5236_v6  ;;  %v4644_v6 = vpack.c.b16 %v4626_v29, %v4625_v27  ;;  %v3639_v62 = vsel %vm7083_vm15, %v3637_v63, %v3638_v5  ;;  %v8523_v31 = vpop.f32.mrf.mxu0 }
 0x423   : > { %v4555_v20 = vor.u32 %v4554_v12, %v4551_v39  ;;  %v3450_v39 = vadd.f32 %v7920_v36, %v7939_v55 }
 0x424   : > { %v4799_v18 = vadd.f32 %v4732_v40, %v4141_v23  ;;  %5986 = vmatmul.msk.bf16.gmra.mxu3 %vm1773_vm10, %v3695_v42  ;;  %v5304_v41 = vmax.f32 %v5272_v14, 0.0  ;;  %v5967_v42 = vrot.slane %v3485_v11, 9  ;;  %v8516_v40 = vld [vmem:[#allocation2 + $0xd4] sm:$0x1]  ;;  %v4565_v14 = vor.u32 %v4564_v25, %v8506_v37 }
 0x425   : > { %v4996_v24 = vrot.slane %v8516_v40, 5  ;;  %v3679_v11 = vunpack.c.l.b16 %v3639_v62  ;;  %v4556_v63 = vrot.slane %v4555_v20, 4 }
 0x426   : > { %v5201_v43 = vadd.f32 %v8448_v54, %v4799_v18  ;;  %5376 = vrot.lane.b32.xlu2 %v5304_v41, %s6576_s10  ;;  %6127 = vmatmul.msk.bf16.gmra.mxu2 %vm1773_vm10, %v5047_v60  ;;  %v4210_v54 = vld [vmem:[#allocation2 + $0xd0] sm:$0xf]  ;;  %v4566_v12 = vrot.slane %v4565_v14, 4 }
 0x427   : > { %v3786_v8 = vpop.f32.mrf.mxu3  ;;  %v4993_v34 = vrot.slane %v4210_v54, 5  ;;  %v4586_v62 = vshrl.u32 %v4210_v54, 16  ;;  %v4561_v55 = vsel %vm6923_vm8, %v4556_v63, %v8506_v37 }
 0x428   : > { %v5237_v45 = vmul.f32 %v8293_v61, %v5201_v43  ;;  %v3851_v46 = vadd.f32 %v3786_v8, %v3449_v57  ;;  %v4735_v4 = vpop.f32.mrf.mxu1  ;;  %v4570_v43 = vrot.slane %v4568_v53, 5  ;;  %v4627_v37 = vunpack.c.l.b16 %v4561_v55 }
 0x429   : > { %v8526_v59 = vpop.f32.mrf.mxu2  ;;  %v4995_v5 = vrot.slane %v4993_v34, 4  ;;  %v4994_v29 = vsel %vm7083_vm15, %v6108_v28, %v4993_v34 }
 0x42a   : > { %v4142_v56 = vadd.f32 %v8400_v35, %v3851_v46  ;;  %v5273_v23 = vadd.f32 %v8299_v13, %v5237_v45  ;;  %v3636_v35 = vsel %vm7083_vm15, %v5967_v42, %v3635_v17  ;;  %v5031_v17 = vunpack.c.l.b16 %v4994_v29  ;;  %v4209_v45 = vld [vmem:[#allocation2 + $0xcc] sm:$0xf] }
 0x42b   : > { %6090 = vmatmul.msk.bf16.gmra.mxu1 %vm1773_vm10, %v4644_v6  ;;  %v4997_v15 = vsel %vm7083_vm15, %v4995_v5, %v4996_v24  ;;  %v3678_v57 = vunpack.c.l.b16 %v3636_v35  ;;  %v4582_v46 = vshll.u32 %v4210_v54, 16  ;;  %v4573_v6 = vshrl.u32 %v4209_v45, 16  ;;  %v6335_v24 = vld [vmem:[#allocation2 + $0xc4] sm:$0xf]  ;;  %v3486_v54 = vld [vmem:[#allocation2 + $0xc0] sm:$0xe] }
 0x42c   : > { %v4800_v18 = vadd.f32 %v4735_v4, %v4142_v56  ;;  %v5305_v41 = vmax.f32 %v5273_v23, 0.0  ;;  %v5032_v60 = vunpack.c.l.b16 %v4997_v15  ;;  %v4571_v20 = vsel %vm6923_vm8, %v4566_v12, %v4570_v43 }
 0x42d   : > { %v3696_v4 = vpack.c.b16 %v3679_v11, %v3678_v57  ;;  %v3642_v1 = vrot.slane %v6335_v24, 5  ;;  %v4575_v56 = vrot.slane %v4573_v6, 4  ;;  %v4584_v23 = vrot.slane %v4582_v46, 5 }
 0x42e   : > { %v5202_v27 = vadd.f32 %v8477_v7, %v4800_v18  ;;  %5378 = vrot.lane.b32.xlu0 %v5305_v41, %s6576_s10  ;;  %v4576_v7 = vshll.u32 %v4209_v45, 16  ;;  %v5048_v34 = vpack.c.b16 %v5032_v60, %v5031_v17  ;;  %v4588_v5 = vrot.slane %v4586_v62, 4  ;;  %v8550_v18 = vpop.f32.mrf.mxu0 }
 0x42f   : > { %v3788_v52 = vpop.f32.mrf.mxu3  ;;  %v4628_v41 = vunpack.c.l.b16 %v4571_v20  ;;  %v3451_v29 = vadd.f32 %v7930_v22, %v7946_v3  ;;  %v5968_v63 = vrot.slane %v3486_v54, 9  ;;  %v3644_v15 = vrot.slane %v3642_v1, 4 }
 0x430   : > { %v5238_v25 = vmul.f32 %v8293_v61, %v5202_v27  ;;  %v3852_v8 = vadd.f32 %v3788_v52, %v3450_v39  ;;  %v4737_v42 = vpop.f32.mrf.mxu1  ;;  %v4578_v53 = vrot.slane %v4576_v7, 5  ;;  %v6336_v27 = vld [vmem:[#allocation2 + $0xc8] sm:$0x1]  ;;  %v4592_v12 = vshll.u32 %v8516_v40, 16 }
 0x431   : > { %v8547_v28 = vpop.f32.mrf.mxu2  ;;  %v3645_v39 = vrot.slane %v6336_v27, 5  ;;  %v4645_v60 = vpack.c.b16 %v4628_v41, %v4627_v37  ;;  %v9034_v37 = vld [vmem:[#allocation66_spill] sm:$0xff] }
 0x432   : > { %v4143_v48 = vadd.f32 %v8431_v51, %v3852_v8  ;;  %v5274_v36 = vadd.f32 %v8299_v13, %v5238_v25  ;;  %v4579_v17 = vor.u32 %v4578_v53, %v4575_v56  ;;  %v3643_v8 = vsel %vm7083_vm15, %v5968_v63, %v3642_v1 }
 0x433   : > { %v3646_v40 = vsel %vm7083_vm15, %v3644_v15, %v3645_v39  ;;  %v3680_v62 = vunpack.c.l.b16 %v3643_v8 }
 0x434   : > { %v4801_v14 = vadd.f32 %v4737_v42, %v4143_v48  ;;  %5987 = vmatmul.msk.bf16.gmra.mxu3 %vm1773_vm10, %v3696_v4  ;;  %v5306_v51 = vmax.f32 %v5274_v36, 0.0  ;;  %v4594_v42 = vrot.slane %v4592_v12, 5  ;;  %v4580_v4 = vrot.slane %v4579_v17, 4 }
 0x435   : > { %v3681_v48 = vunpack.c.l.b16 %v3646_v40  ;;  %v6337_v40 = vld [vmem:[%s6736_s15 + $0x10] sm:$0xff] }
 0x436   : > { %v5203_v35 = vadd.f32 %v8503_v2, %v4801_v14  ;;  %5380 = vrot.lane.b32.xlu1 %v5306_v51, %s6576_s10  ;;  %6128 = vmatmul.msk.bf16.gmra.mxu2 %vm1773_vm10, %v5048_v34  ;;  %v4589_v2 = vor.u32 %v4588_v5, %v4584_v23  ;;  %v4092_v36 = vpop.f32.mrf.mxu0  ;;  %v4585_v24 = vsel %vm6923_vm8, %v4580_v4, %v4584_v23  ;;  %v9033_v23 = vld [vmem:[#allocation68_spill] sm:$0xff] }
 0x437   : > { %v3791_v11 = vpop.f32.mrf.mxu3  ;;  %v3697_v56 = vpack.c.b16 %v3681_v48, %v3680_v62  ;;  %v3453_v49 = vadd.f32 %v9034_v37, %v9033_v23 }
 0x438   : > { %v5239_v43 = vmul.f32 %v8293_v61, %v5203_v35  ;;  %v3853_v52 = vadd.f32 %v3791_v11, %v3451_v29  ;;  %v4740_v57 = vpop.f32.mrf.mxu1  ;;  %v4590_v6 = vrot.slane %v4589_v2, 4 }
 0x439   : > { %v5147_v3 = vpop.f32.mrf.mxu2 }
 0x43a   : > { %v4144_v25 = vadd.f32 %v8461_v9, %v3853_v52  ;;  %v5275_v22 = vadd.f32 %v8299_v13, %v5239_v43  ;;  %v3452_v9 = vadd.f32 %v7941_v19, %v7960_v50  ;;  %v4595_v1 = vsel %vm6923_vm8, %v4590_v6, %v4594_v42  ;;  %v9035_v52 = vld [vmem:[#allocation67_spill] sm:$0xff] }
 0x43b   : > { %6091 = vmatmul.msk.bf16.gmra.mxu1 %vm1773_vm10, %v4645_v60  ;;  %v4629_v50 = vunpack.c.l.b16 %v4585_v24  ;;  %v4630_v51 = vunpack.c.l.b16 %v4595_v1  ;;  %v6338_v1 = vld [vmem:[%s6736_s15] sm:$0xff] }
 0x43c   : > { %v4802_v45 = vadd.f32 %v4740_v57, %v4144_v25  ;;  %v5307_v46 = vmax.f32 %v5275_v22, 0.0  ;;  %v3454_v57 = vadd.f32 %v9035_v52, %v7985_v38  ;;  %v9036_v22 = vld [vmem:[#allocation24_spill] sm:$0xff] }
 0x43d   : > { %v4646_v35 = vpack.c.b16 %v4630_v51, %v4629_v50 }
 0x43e   : > { %v5204_v7 = vadd.f32 %v8526_v59, %v4802_v45  ;;  %5382 = vrot.lane.b32.xlu2 %v5307_v46, %s6576_s10  ;;  %v4094_v63 = vpop.f32.mrf.mxu0 }
 0x43f   : > { %v3793_v55 = vpop.f32.mrf.mxu3 }
 0x440   : > { %v5240_v20 = vmul.f32 %v8293_v61, %v5204_v7  ;;  %v3854_v26 = vadd.f32 %v3793_v55, %v3452_v9  ;;  %v4742_v34 = vpop.f32.mrf.mxu1  ;;  %v9037_v9 = vld [vmem:[#allocation69_spill] sm:$0xff] }
 0x441   : > { %v5149_v19 = vpop.f32.mrf.mxu2 }
 0x442   : > { %v4145_v59 = vadd.f32 %v8497_v33, %v3854_v26  ;;  %v5276_v14 = vadd.f32 %v8299_v13, %v5240_v20 }
 0x444   : > { %v4803_v54 = vadd.f32 %v4742_v34, %v4145_v59  ;;  %5988 = vmatmul.msk.bf16.gmra.mxu3 %vm1773_vm10, %v3697_v56  ;;  %v5308_v53 = vmax.f32 %v5276_v14, 0.0  ;;  %v9038_v34 = vld [vmem:[#allocation16_spill] sm:$0xff] }
 0x446   : > { %v5205_v5 = vadd.f32 %v8547_v28, %v4803_v54  ;;  %5384 = vrot.lane.b32.xlu0 %v5308_v53, %s6576_s10  ;;  %v4097_v46 = vpop.f32.mrf.mxu0  ;;  %v9039_v53 = vld [vmem:[#allocation70_spill] sm:$0xff] }
 0x447   : > { %v3796_v41 = vpop.f32.mrf.mxu3 }
 0x448   : > { %v5241_v33 = vmul.f32 %v8293_v61, %v5205_v5  ;;  %v3855_v29 = vadd.f32 %v3796_v41, %v3453_v49  ;;  %v4745_v11 = vpop.f32.mrf.mxu1  ;;  %v3456_v5 = vadd.f32 %v9039_v53, %v8024_v10  ;;  %v9044_v53 = vld [vmem:[#allocation28_spill] sm:$0xff] }
 0x449   : > { %v5152_v28 = vpop.f32.mrf.mxu2 }
 0x44a   : > { %v4146_v15 = vadd.f32 %v8523_v31, %v3855_v29  ;;  %v5277_v27 = vadd.f32 %v8299_v13, %v5241_v33  ;;  %v6339_v29 = vld [vmem:[%s6736_s15 + $0x8] sm:$0xff] }
 0x44b   : > { %6092 = vmatmul.msk.bf16.gmra.mxu1 %vm1773_vm10, %v4646_v35  ;;  %v9040_v35 = vld [vmem:[#allocation17_spill] sm:$0xff] }
 0x44c   : > { %v4804_v39 = vadd.f32 %v4745_v11, %v4146_v15  ;;  %v5309_v12 = vmax.f32 %v5277_v27, 0.0 }
 0x44e   : > { %v5206_v43 = vadd.f32 %v5147_v3, %v4804_v39  ;;  %5386 = vrot.lane.b32.xlu1 %v5309_v12, %s6576_s10  ;;  %v4099_v51 = vpop.f32.mrf.mxu0 }
 0x44f   : > { %v3798_v17 = vpop.f32.mrf.mxu3 }
 0x450   : > { %v5242_v2 = vmul.f32 %v8293_v61, %v5206_v43  ;;  %v3856_v60 = vadd.f32 %v3798_v17, %v3454_v57  ;;  %v5365_v25 = vpop.permute.xlu2 %5364  ;;  %v4747_v31 = vpop.f32.mrf.mxu1 }
 0x451   : > { %v5458_v8 = vsel %vm1773_vm10, %v9036_v22, %v5365_v25  ;;  %v5154_v4 = vpop.f32.mrf.mxu2  ;;  %v9042_v25 = vld [vmem:[#allocation27_spill] sm:$0xff]  ;;  %v6341_v22 = vld [vmem:[%s6736_s15 + $0x28] sm:$0xff] }
 0x452   : > { %v5490_v42 = vadd.f32 %v6337_v40, %v5458_v8  ;;  %v4147_v45 = vadd.f32 %v8550_v18, %v3856_v60  ;;  %v5278_v3 = vadd.f32 %v8299_v13, %v5242_v2  ;;  %v3455_v18 = vadd.f32 %v9037_v9, %v8007_v0 }
 0x454   : > { %5522 = vst.msk [vmem:[%s8597_s13 + $0x10] sm:$0xff] %vm412_vm0, %v5490_v42  ;;  %v4805_v38 = vadd.f32 %v4747_v31, %v4147_v45  ;;  %v5310_v6 = vmax.f32 %v5278_v3, 0.0  ;;  %v8633_v42 = vld [vmem:[#allocation9] ss:$0 sm:$0xff] }
 0x456   : > { %v5207_v7 = vadd.f32 %v5149_v19, %v4805_v38  ;;  %5388 = vrot.lane.b32.xlu2 %v5310_v6, %s6576_s10  ;;  %v4102_v52 = vpop.f32.mrf.mxu0  ;;  %v3458_v6 = vadd.f32 %v8026_v47, %v8058_v16 }
 0x457   : > { %v3801_v62 = vpop.f32.mrf.mxu3 }
 0x458   : > { %v5243_v48 = vmul.f32 %v8293_v61, %v5207_v7  ;;  %v3857_v55 = vadd.f32 %v3801_v62, %v3455_v18  ;;  %v5361_v20 = vpop.permute.xlu0 %5360  ;;  %v4750_v26 = vpop.f32.mrf.mxu1 }
 0x459   : > { %v5456_v24 = vsel %vm1773_vm10, %v9038_v34, %v5361_v20  ;;  %v5157_v19 = vpop.f32.mrf.mxu2 }
 0x45a   : > { %v5488_v59 = vadd.f32 %v6338_v1, %v5456_v24  ;;  %v4148_v56 = vadd.f32 %v4092_v36, %v3857_v55  ;;  %v5279_v14 = vadd.f32 %v8299_v13, %v5243_v48  ;;  %v9043_v55 = vld [vmem:[#allocation22_spill] sm:$0xff] }
 0x45c   : > { %5520 = vst.msk [vmem:[%s8597_s13] sm:$0xff] %vm412_vm0, %v5488_v59  ;;  %v4806_v50 = vadd.f32 %v4750_v26, %v4148_v56  ;;  %v5311_v0 = vmax.f32 %v5279_v14, 0.0  ;;  %v6343_v26 = vld [vmem:[%s6736_s15 + $0x18] sm:$0xff]  ;;  %v3459_v14 = vadd.f32 %v8046_v30, %v8078_v58 }
 0x45e   : > { %v5208_v54 = vadd.f32 %v5152_v28, %v4806_v50  ;;  %5390 = vrot.lane.b32.xlu0 %v5311_v0, %s6576_s10  ;;  %v4104_v48 = vpop.f32.mrf.mxu0 }
 0x45f   : > { %v3803_v23 = vpop.f32.mrf.mxu3 }
 0x460   : > { %v5244_v37 = vmul.f32 %v8293_v61, %v5208_v54  ;;  %v3858_v36 = vadd.f32 %v3803_v23, %v3456_v5  ;;  %v5363_v49 = vpop.permute.xlu1 %5362  ;;  %v4752_v41 = vpop.f32.mrf.mxu1  ;;  %v9041_v61 = vld [vmem:[#allocation71_spill] sm:$0xff]  ;;  %v6344_v23 = vld [vmem:[%s6736_s15 + $0x20] sm:$0xff] }
 0x461   : > { %v5457_v33 = vsel %vm1773_vm10, %v9040_v35, %v5363_v49  ;;  %v5159_v28 = vpop.f32.mrf.mxu2  ;;  %v3457_v43 = vadd.f32 %v9041_v61, %v8042_v21 }
 0x462   : > { %v5489_v11 = vadd.f32 %v6339_v29, %v5457_v33  ;;  %v4149_v15 = vadd.f32 %v4094_v63, %v3858_v36  ;;  %v5280_v27 = vadd.f32 %v8299_v13, %v5244_v37  ;;  %v8627_v63 = vld [vmem:[%s8886_s5] ss:$0 sm:$0xff]  ;;  %v9045_v29 = vld [vmem:[#allocation72_spill] sm:$0xff] }
 0x464   : > { %5521 = vst.msk [vmem:[%s8597_s13 + $0x8] sm:$0xff] %vm412_vm0, %v5489_v11  ;;  %v4807_v39 = vadd.f32 %v4752_v41, %v4149_v15  ;;  %v5312_v10 = vmax.f32 %v5280_v27, 0.0  ;;  %v3460_v11 = vadd.f32 %v9045_v29, %v8090_v32  ;;  %v9054_v29 = vld [vmem:[#allocation39_spill] sm:$0xff] }
 0x466   : > { %v5209_v12 = vadd.f32 %v5154_v4, %v4807_v39  ;;  %5392 = vrot.lane.b32.xlu1 %v5312_v10, %s6576_s10  ;;  %v4107_v41 = vpop.f32.mrf.mxu0 }
 0x467   : > { %v3806_v57 = vpop.f32.mrf.mxu3 }
 0x468   : > { %v5245_v13 = vmul.f32 %v8627_v63, %v5209_v12  ;;  %v3859_v17 = vadd.f32 %v3806_v57, %v3457_v43  ;;  %v5371_v2 = vpop.permute.xlu2 %5370  ;;  %v4755_v60 = vpop.f32.mrf.mxu1  ;;  %v9046_v12 = vld [vmem:[#allocation36_spill] sm:$0xff] }
 0x469   : > { %v5461_v31 = vsel %vm1773_vm10, %v9042_v25, %v5371_v2  ;;  %v5162_v45 = vpop.f32.mrf.mxu2  ;;  %v6345_v43 = vld [vmem:[%s6736_s15 + $0x40] sm:$0xff] }
 0x46a   : > { %v5493_v8 = vadd.f32 %v6341_v22, %v5461_v31  ;;  %v4150_v40 = vadd.f32 %v4097_v46, %v3859_v17  ;;  %v5281_v21 = vadd.f32 %v8633_v42, %v5245_v13  ;;  %v9047_v25 = vld [vmem:[#allocation73_spill] sm:$0xff] }
 0x46b   : > { %v3461_v31 = vadd.f32 %v9047_v25, %v8112_v44 }
 0x46c   : > { %5525 = vst.msk [vmem:[%s8597_s13 + $0x28] sm:$0xff] %vm412_vm0, %v5493_v8  ;;  %v4808_v3 = vadd.f32 %v4755_v60, %v4150_v40  ;;  %v5313_v4 = vmax.f32 %v5281_v21, 0.0 }
 0x46e   : > { %v5210_v38 = vadd.f32 %v5157_v19, %v4808_v3  ;;  %5394 = vrot.lane.b32.xlu2 %v5313_v4, %s6576_s10  ;;  %v4109_v32 = vpop.f32.mrf.mxu0  ;;  %v9048_v4 = vld [vmem:[#allocation32_spill] sm:$0xff] }
 0x46f   : > { %v3808_v7 = vpop.f32.mrf.mxu3 }
 0x470   : > { %v5246_v46 = vmul.f32 %v8627_v63, %v5210_v38  ;;  %v3860_v9 = vadd.f32 %v3808_v7, %v3458_v6  ;;  %v5367_v18 = vpop.permute.xlu0 %5366  ;;  %v4757_v62 = vpop.f32.mrf.mxu1  ;;  %v6346_v6 = vld [vmem:[%s6736_s15 + $0x30] sm:$0xff] }
 0x471   : > { %v5459_v20 = vsel %vm1773_vm10, %v9043_v55, %v5367_v18  ;;  %v5164_v59 = vpop.f32.mrf.mxu2  ;;  %v9050_v55 = vld [vmem:[#allocation74_spill] sm:$0xff] }
 0x472   : > { %v5491_v34 = vadd.f32 %v6343_v26, %v5459_v20  ;;  %v4151_v24 = vadd.f32 %v4099_v51, %v3860_v9  ;;  %v5282_v1 = vadd.f32 %v8633_v42, %v5246_v46 }
 0x474   : > { %5523 = vst.msk [vmem:[%s8597_s13 + $0x18] sm:$0xff] %vm412_vm0, %v5491_v34  ;;  %v4809_v47 = vadd.f32 %v4757_v62, %v4151_v24  ;;  %v5314_v16 = vmax.f32 %v5282_v1, 0.0 }
 0x476   : > { %v5211_v56 = vadd.f32 %v5159_v28, %v4809_v47  ;;  %5396 = vrot.lane.b32.xlu0 %v5314_v16, %s6576_s10  ;;  %v4112_v26 = vpop.f32.mrf.mxu0 }
 0x477   : > { %v3811_v19 = vpop.f32.mrf.mxu3 }
 0x478   : > { %v5247_v50 = vmul.f32 %v8627_v63, %v5211_v56  ;;  %v3861_v0 = vadd.f32 %v3811_v19, %v3459_v14  ;;  %v5369_v54 = vpop.permute.xlu1 %5368  ;;  %v4760_v51 = vpop.f32.mrf.mxu1  ;;  %v9051_v56 = vld [vmem:[#allocation31_spill] sm:$0xff] }
 0x479   : > { %v5460_v5 = vsel %vm1773_vm10, %v9044_v53, %v5369_v54  ;;  %v5167_v58 = vpop.f32.mrf.mxu2  ;;  %v6347_v19 = vld [vmem:[%s6736_s15 + $0x38] sm:$0xff] }
 0x47a   : > { %v5492_v37 = vadd.f32 %v6344_v23, %v5460_v5  ;;  %v4152_v36 = vadd.f32 %v4102_v52, %v3861_v0  ;;  %v5283_v49 = vadd.f32 %v8633_v42, %v5247_v50  ;;  %v9052_v23 = vld [vmem:[#allocation78_spill] sm:$0xff] }
 0x47c   : > { %5524 = vst.msk [vmem:[%s8597_s13 + $0x20] sm:$0xff] %vm412_vm0, %v5492_v37  ;;  %v4810_v35 = vadd.f32 %v4760_v51, %v4152_v36  ;;  %v5315_v30 = vmax.f32 %v5283_v49, 0.0  ;;  %v9053_v37 = vld [vmem:[#allocation75_spill] sm:$0xff] }
 0x47d   : > { %v3463_v36 = vadd.f32 %v9053_v37, %v9052_v23 }
 0x47e   : > { %v5212_v33 = vadd.f32 %v5162_v45, %v4810_v35  ;;  %5398 = vrot.lane.b32.xlu1 %v5315_v30, %s6576_s10 }
 0x47f   : > { %v3813_v15 = vpop.f32.mrf.mxu3 }
 0x480   : > { %v5248_v27 = vmul.f32 %v8627_v63, %v5212_v33  ;;  %v3862_v28 = vadd.f32 %v3813_v15, %v3460_v11  ;;  %v5377_v39 = vpop.permute.xlu2 %5376  ;;  %v4762_v10 = vpop.f32.mrf.mxu1  ;;  %v6348_v15 = vld [vmem:[%s6736_s15 + $0x58] sm:$0xff] }
 0x481   : > { %v5464_v61 = vsel %vm1773_vm10, %v9046_v12, %v5377_v39  ;;  %v5169_v22 = vpop.f32.mrf.mxu2  ;;  %v4114_v33 = vpop.f32.mrf.mxu0 }
 0x482   : > { %v5496_v52 = vadd.f32 %v6345_v43, %v5464_v61  ;;  %v4153_v57 = vadd.f32 %v4104_v48, %v3862_v28  ;;  %v5284_v13 = vadd.f32 %v8633_v42, %v5248_v27  ;;  %v9049_v48 = vld [vmem:[#allocation76_spill] sm:$0xff] }
 0x483   : > { %v3462_v20 = vadd.f32 %v9050_v55, %v9049_v48 }
 0x484   : > { %5528 = vst.msk [vmem:[%s8597_s13 + $0x40] sm:$0xff] %vm412_vm0, %v5496_v52  ;;  %v4811_v17 = vadd.f32 %v4762_v10, %v4153_v57  ;;  %v5316_v2 = vmax.f32 %v5284_v13, 0.0  ;;  %v9055_v52 = vld [vmem:[#allocation80_spill] sm:$0xff]  ;;  %v9056_v57 = vld [vmem:[#allocation77_spill] sm:$0xff] }
 0x485   : > { %v3464_v13 = vadd.f32 %v9056_v57, %v9055_v52 }
 0x486   : > { %v5213_v60 = vadd.f32 %v5164_v59, %v4811_v17  ;;  %5400 = vrot.lane.b32.xlu2 %v5316_v2, %s6576_s10 }
 0x487   : > { %v3816_v8 = vpop.f32.mrf.mxu3 }
 0x488   : > { %v5249_v40 = vmul.f32 %v8627_v63, %v5213_v60  ;;  %v3863_v21 = vadd.f32 %v3816_v8, %v3461_v31  ;;  %v5373_v45 = vpop.permute.xlu0 %5372  ;;  %v4765_v3 = vpop.f32.mrf.mxu1  ;;  %v9057_v31 = vld [vmem:[#allocation35_spill] sm:$0xff]  ;;  %v6349_v8 = vld [vmem:[%s6736_s15 + $0x48] sm:$0xff] }
 0x489   : > { %v5462_v38 = vsel %vm1773_vm10, %v9048_v4, %v5373_v45  ;;  %v5172_v16 = vpop.f32.mrf.mxu2 }
 0x48a   : > { %v5494_v7 = vadd.f32 %v6346_v6, %v5462_v38  ;;  %v4154_v46 = vadd.f32 %v4107_v41, %v3863_v21  ;;  %v5285_v9 = vadd.f32 %v8633_v42, %v5249_v40 }
 0x48c   : > { %5526 = vst.msk [vmem:[%s8597_s13 + $0x30] sm:$0xff] %vm412_vm0, %v5494_v7  ;;  %v4812_v18 = vadd.f32 %v4765_v3, %v4154_v46  ;;  %v5317_v44 = vmax.f32 %v5285_v9, 0.0  ;;  %v4117_v3 = vpop.f32.mrf.mxu0  ;;  %v9058_v46 = vld [vmem:[#allocation82_spill] sm:$0xff]  ;;  %v9059_v9 = vld [vmem:[#allocation79_spill] sm:$0xff] }
 0x48e   : > { %v5214_v62 = vadd.f32 %v5167_v58, %v4812_v18  ;;  %5402 = vrot.lane.b32.xlu0 %v5317_v44, %s6576_s10  ;;  %v3465_v18 = vadd.f32 %v9059_v9, %v9058_v46 }
 0x48f   : > { %v3818_v34 = vpop.f32.mrf.mxu3 }
 0x490   : > { %v5250_v24 = vmul.f32 %v8627_v63, %v5214_v62  ;;  %v3864_v1 = vadd.f32 %v3818_v34, %v3462_v20  ;;  %v5375_v59 = vpop.permute.xlu1 %5374  ;;  %v4767_v47 = vpop.f32.mrf.mxu1 }
 0x491   : > { %v5463_v14 = vsel %vm1773_vm10, %v9051_v56, %v5375_v59  ;;  %v5174_v10 = vpop.f32.mrf.mxu2 }
 0x492   : > { %v5495_v50 = vadd.f32 %v6347_v19, %v5463_v14  ;;  %v4155_v0 = vadd.f32 %v4109_v32, %v3864_v1  ;;  %v5286_v54 = vadd.f32 %v8633_v42, %v5250_v24  ;;  %v6350_v24 = vld [vmem:[%s6736_s15 + $0x50] sm:$0xff] }
 0x494   : > { %5527 = vst.msk [vmem:[%s8597_s13 + $0x38] sm:$0xff] %vm412_vm0, %v5495_v50  ;;  %v4813_v51 = vadd.f32 %v4767_v47, %v4155_v0  ;;  %v5318_v53 = vmax.f32 %v5286_v54, 0.0  ;;  %v4119_v14 = vpop.f32.mrf.mxu0  ;;  %v9061_v50 = vld [vmem:[#allocation84_spill] sm:$0xff]  ;;  %v9062_v0 = vld [vmem:[#allocation81_spill] sm:$0xff] }
 0x495   : > { %v3466_v54 = vadd.f32 %v9062_v0, %v9061_v50 }
 0x496   : > { %v5215_v5 = vadd.f32 %v5169_v22, %v4813_v51  ;;  %5404 = vrot.lane.b32.xlu1 %v5318_v53, %s6576_s10 }
 0x497   : > { %v3821_v49 = vpop.f32.mrf.mxu3 }
 0x498   : > { %v5251_v41 = vmul.f32 %v8627_v63, %v5215_v5  ;;  %v3865_v35 = vadd.f32 %v3821_v49, %v3463_v36  ;;  %v5383_v30 = vpop.permute.xlu2 %5382  ;;  %v4770_v58 = vpop.f32.mrf.mxu1  ;;  %v9063_v49 = vld [vmem:[#allocation20_spill] sm:$0xff] }
 0x499   : > { %v5467_v11 = vsel %vm1773_vm10, %v9054_v29, %v5383_v30  ;;  %v5177_v6 = vpop.f32.mrf.mxu2 }
 0x49a   : > { %v5499_v27 = vadd.f32 %v6348_v15, %v5467_v11  ;;  %v4156_v28 = vadd.f32 %v4112_v26, %v3865_v35  ;;  %v5287_v39 = vadd.f32 %v8633_v42, %v5251_v41  ;;  %v9060_v26 = vld [vmem:[#allocation40_spill] sm:$0xff]  ;;  %v6351_v35 = vld [vmem:[%s6736_s15 + $0x70] sm:$0xff] }
 0x49c   : > { %5531 = vst.msk [vmem:[%s8597_s13 + $0x58] sm:$0xff] %vm412_vm0, %v5499_v27  ;;  %v4814_v12 = vadd.f32 %v4770_v58, %v4156_v28  ;;  %v5319_v61 = vmax.f32 %v5287_v39, 0.0  ;;  %v4122_v15 = vpop.f32.mrf.mxu0  ;;  %v9064_v28 = vld [vmem:[#allocation48_spill] sm:$0xff]  ;;  %v9065_v39 = vld [vmem:[#allocation83_spill] sm:$0xff] }
 0x49e   : > { %v5216_v43 = vadd.f32 %v5172_v16, %v4814_v12  ;;  %5406 = vrot.lane.b32.xlu2 %v5319_v61, %s6576_s10 }
 0x49f   : > { %v3823_v17 = vpop.f32.mrf.mxu3 }
 0x4a0   : > { %v5252_v2 = vmul.f32 %v8627_v63, %v5216_v43  ;;  %v3866_v32 = vadd.f32 %v3823_v17, %v3464_v13  ;;  %v5379_v60 = vpop.permute.xlu0 %5378  ;;  %v4772_v25 = vpop.f32.mrf.mxu1  ;;  %v9066_v17 = vld [vmem:[#allocation18_spill] sm:$0xff] }
 0x4a1   : > { %v5465_v22 = vsel %vm1773_vm10, %v9057_v31, %v5379_v60  ;;  %v5179_v51 = vpop.f32.mrf.mxu2 }
 0x4a2   : > { %v5497_v40 = vadd.f32 %v6349_v8, %v5465_v22  ;;  %v4157_v21 = vadd.f32 %v4114_v33, %v3866_v32  ;;  %v5288_v45 = vadd.f32 %v8633_v42, %v5252_v2  ;;  %v6352_v32 = vld [vmem:[%s6736_s15 + $0x60] sm:$0xff] }
 0x4a4   : > { %5529 = vst.msk [vmem:[%s8597_s13 + $0x48] sm:$0xff] %vm412_vm0, %v5497_v40  ;;  %v4815_v4 = vadd.f32 %v4772_v25, %v4157_v21  ;;  %v5320_v38 = vmax.f32 %v5288_v45, 0.0  ;;  %v9067_v21 = vld [vmem:[#allocation49_spill] sm:$0xff] }
 0x4a5   : > { %v9068_v45 = vld [vmem:[#allocation85_spill] sm:$0xff] }
 0x4a6   : > { %v5217_v7 = vadd.f32 %v5174_v10, %v4815_v4  ;;  %5408 = vrot.lane.b32.xlu0 %v5320_v38, %s6576_s10  ;;  %v3467_v10 = vadd.f32 %v9065_v39, %v9064_v28  ;;  %v4124_v4 = vpop.f32.mrf.mxu0 }
 0x4a7   : > { %v3826_v44 = vpop.f32.mrf.mxu3 }
 0x4a8   : > { %v5253_v62 = vmul.f32 %v8627_v63, %v5217_v7  ;;  %v3867_v48 = vadd.f32 %v3826_v44, %v3465_v18  ;;  %v5381_v55 = vpop.permute.xlu1 %5380  ;;  %v4775_v20 = vpop.f32.mrf.mxu1  ;;  %v9069_v18 = vld [vmem:[#allocation19_spill] sm:$0xff] }
 0x4a9   : > { %v5466_v34 = vsel %vm1773_vm10, %v9060_v26, %v5381_v55  ;;  %v5182_v13 = vpop.f32.mrf.mxu2 }
 0x4aa   : > { %v5498_v1 = vadd.f32 %v6350_v24, %v5466_v34  ;;  %v4158_v59 = vadd.f32 %v4117_v3, %v3867_v48  ;;  %v5289_v47 = vadd.f32 %v8633_v42, %v5253_v62  ;;  %v3468_v3 = vadd.f32 %v9068_v45, %v9067_v21  ;;  %v6353_v62 = vld [vmem:[%s6736_s15 + $0x68] sm:$0xff] }
 0x4ac   : > { %5530 = vst.msk [vmem:[%s8597_s13 + $0x50] sm:$0xff] %vm412_vm0, %v5498_v1  ;;  %v4816_v16 = vadd.f32 %v4775_v20, %v4158_v59  ;;  %v5321_v56 = vmax.f32 %v5289_v47, 0.0  ;;  %v9070_v59 = vld [vmem:[#allocation50_spill] sm:$0xff] }
 0x4ad   : > { %v9071_v47 = vld [vmem:[#allocation86_spill] sm:$0xff] }
 0x4ae   : > { %v5218_v19 = vadd.f32 %v5177_v6, %v4816_v16  ;;  %5410 = vrot.lane.b32.xlu1 %v5321_v56, %s6576_s10  ;;  %v3469_v16 = vadd.f32 %v9071_v47, %v9070_v59  ;;  %v4127_v56 = vpop.f32.mrf.mxu0  ;;  %v6360_v59 = vld [vmem:[%s6736_s15 + $0xb8] sm:$0xff] }
 0x4af   : > { %v3828_v53 = vpop.f32.mrf.mxu3 }
 0x4b0   : > { %v5254_v5 = vmul.f32 %v8627_v63, %v5218_v19  ;;  %v3868_v23 = vadd.f32 %v3828_v53, %v3466_v54  ;;  %v5389_v37 = vpop.permute.xlu2 %5388  ;;  %v4777_v36 = vpop.f32.mrf.mxu1  ;;  %v9072_v54 = vld [vmem:[#allocation25_spill] sm:$0xff] }
 0x4b1   : > { %v5470_v41 = vsel %vm1773_vm10, %v9063_v49, %v5389_v37  ;;  %v5184_v26 = vpop.f32.mrf.mxu2 }
 0x4b2   : > { %v5502_v30 = vadd.f32 %v6351_v35, %v5470_v41  ;;  %v4159_v58 = vadd.f32 %v4119_v14, %v3868_v23  ;;  %v5290_v33 = vadd.f32 %v8633_v42, %v5254_v5  ;;  %v6354_v5 = vld [vmem:[%s6736_s15 + $0x88] sm:$0xff] }
 0x4b4   : > { %5534 = vst.msk [vmem:[%s8597_s13 + $0x70] sm:$0xff] %vm412_vm0, %v5502_v30  ;;  %v4817_v29 = vadd.f32 %v4777_v36, %v4159_v58  ;;  %v5322_v11 = vmax.f32 %v5290_v33, 0.0  ;;  %v9073_v58 = vld [vmem:[#allocation52_spill] sm:$0xff]  ;;  %v9074_v33 = vld [vmem:[#allocation87_spill] sm:$0xff] }
 0x4b6   : > { %v5219_v27 = vadd.f32 %v5179_v51, %v4817_v29  ;;  %5412 = vrot.lane.b32.xlu2 %v5322_v11, %s6576_s10  ;;  %v3470_v29 = vadd.f32 %v9074_v33, %v9073_v58  ;;  %v4129_v39 = vpop.f32.mrf.mxu0  ;;  %v6364_v33 = vld [vmem:[%s6736_s15 + $0xc0] sm:$0xff] }
 0x4b7   : > { %v3831_v12 = vpop.f32.mrf.mxu3 }
 0x4b8   : > { %v5255_v61 = vmul.f32 %v8627_v63, %v5219_v27  ;;  %v3869_v43 = vadd.f32 %v3831_v12, %v3467_v10  ;;  %v5385_v52 = vpop.permute.xlu0 %5384  ;;  %v4780_v57 = vpop.f32.mrf.mxu1  ;;  %v9075_v10 = vld [vmem:[#allocation21_spill] sm:$0xff] }
 0x4b9   : > { %v5468_v2 = vsel %vm1773_vm10, %v9066_v17, %v5385_v52  ;;  %v5187_v49 = vpop.f32.mrf.mxu2 }
 0x4ba   : > { %v5500_v60 = vadd.f32 %v6352_v32, %v5468_v2  ;;  %v4160_v25 = vadd.f32 %v4122_v15, %v3869_v43  ;;  %v5291_v31 = vadd.f32 %v8633_v42, %v5255_v61  ;;  %v6355_v61 = vld [vmem:[%s6736_s15 + $0x78] sm:$0xff] }
 0x4bc   : > { %5532 = vst.msk [vmem:[%s8597_s13 + $0x60] sm:$0xff] %vm412_vm0, %v5500_v60  ;;  %v4818_v22 = vadd.f32 %v4780_v57, %v4160_v25  ;;  %v5323_v8 = vmax.f32 %v5291_v31, 0.0 }
 0x4be   : > { %v5220_v40 = vadd.f32 %v5182_v13, %v4818_v22  ;;  %5414 = vrot.lane.b32.xlu0 %v5323_v8, %s6576_s10  ;;  %v9076_v22 = vld [vmem:[#allocation23_spill] sm:$0xff] }
 0x4bf   : > { %v3833_v38 = vpop.f32.mrf.mxu3 }
 0x4c0   : > { %v5256_v6 = vmul.f32 %v8627_v63, %v5220_v40  ;;  %v3870_v7 = vadd.f32 %v3833_v38, %v3468_v3  ;;  %v5387_v46 = vpop.permute.xlu1 %5386  ;;  %v4782_v9 = vpop.f32.mrf.mxu1  ;;  %v6356_v40 = vld [vmem:[%s6736_s15 + $0x80] sm:$0xff]  ;;  %v9077_v38 = vld [vmem:[#allocation30_spill] sm:$0xff] }
 0x4c1   : > { %v5469_v44 = vsel %vm1773_vm10, %v9069_v18, %v5387_v46  ;;  %v5189_v32 = vpop.f32.mrf.mxu2  ;;  %v6358_v18 = vld [vmem:[%s6736_s15 + $0x90] sm:$0xff] }
 0x4c2   : > { %v5501_v48 = vadd.f32 %v6353_v62, %v5469_v44  ;;  %v4161_v55 = vadd.f32 %v4124_v4, %v3870_v7  ;;  %v5292_v20 = vadd.f32 %v8633_v42, %v5256_v6  ;;  %v6357_v6 = vld [vmem:[%s6736_s15 + $0xa0] sm:$0xff] }
 0x4c4   : > { %5533 = vst.msk [vmem:[%s8597_s13 + $0x68] sm:$0xff] %vm412_vm0, %v5501_v48  ;;  %v4819_v34 = vadd.f32 %v4782_v9, %v4161_v55  ;;  %v5324_v24 = vmax.f32 %v5292_v20, 0.0  ;;  %v9078_v9 = vld [vmem:[#allocation26_spill] sm:$0xff]  ;;  %v9079_v48 = vld [vmem:[#allocation29_spill] sm:$0xff]  ;;  %v6359_v20 = vld [vmem:[%s6736_s15 + $0x98] sm:$0xff] }
 0x4c6   : > { %v5221_v1 = vadd.f32 %v5184_v26, %v4819_v34  ;;  %5416 = vrot.lane.b32.xlu1 %v5324_v24, %s6576_s10  ;;  %v9080_v24 = vld [vmem:[#allocation37_spill] sm:$0xff] }
 0x4c7   : > { %v3836_v14 = vpop.f32.mrf.mxu3 }
 0x4c8   : > { %v5257_v19 = vmul.f32 %v8627_v63, %v5221_v1  ;;  %v3871_v50 = vadd.f32 %v3836_v14, %v3469_v16  ;;  %v5395_v0 = vpop.permute.xlu2 %5394  ;;  %v4785_v53 = vpop.f32.mrf.mxu1 }
 0x4c9   : > { %v5473_v51 = vsel %vm1773_vm10, %v9072_v54, %v5395_v0  ;;  %v9082_v54 = vld [vmem:[#allocation34_spill] sm:$0xff] }
 0x4ca   : > { %v5505_v23 = vadd.f32 %v6354_v5, %v5473_v51  ;;  %v4162_v37 = vadd.f32 %v4127_v56, %v3871_v50  ;;  %v5293_v36 = vadd.f32 %v8633_v42, %v5257_v19  ;;  %v9081_v56 = vld [vmem:[#allocation33_spill] sm:$0xff] }
 0x4cb   : > { %v6361_v19 = vld [vmem:[%s6736_s15 + $0xa8] sm:$0xff] }
 0x4cc   : > { %5537 = vst.msk [vmem:[%s8597_s13 + $0x88] sm:$0xff] %vm412_vm0, %v5505_v23  ;;  %v4820_v41 = vadd.f32 %v4785_v53, %v4162_v37  ;;  %v5325_v35 = vmax.f32 %v5293_v36, 0.0  ;;  %v6362_v53 = vld [vmem:[%s6736_s15 + $0xb0] sm:$0xff] }
 0x4cd   : > { %v9083_v37 = vld [vmem:[#allocation42_spill] sm:$0xff] }
 0x4ce   : > { %v5222_v30 = vadd.f32 %v5187_v49, %v4820_v41  ;;  %5418 = vrot.lane.b32.xlu2 %v5325_v35, %s6576_s10  ;;  %v6363_v49 = vld [vmem:[%s6736_s15 + $0xd0] sm:$0xff] }
 0x4cf   : > { %v3838_v11 = vpop.f32.mrf.mxu3 }
 0x4d0   : > { %v5258_v15 = vmul.f32 %v8627_v63, %v5222_v30  ;;  %v3872_v27 = vadd.f32 %v3838_v11, %v3470_v29  ;;  %v5391_v28 = vpop.permute.xlu0 %5390  ;;  %v4787_v13 = vpop.f32.mrf.mxu1  ;;  %v9084_v30 = vld [vmem:[#allocation38_spill] sm:$0xff] }
 0x4d1   : > { %v5471_v12 = vsel %vm1773_vm10, %v9075_v10, %v5391_v28  ;;  %v6365_v28 = vld [vmem:[%s6736_s15 + $0xc8] sm:$0xff] }
 0x4d2   : > { %v5503_v43 = vadd.f32 %v6355_v61, %v5471_v12  ;;  %v4163_v52 = vadd.f32 %v4129_v39, %v3872_v27  ;;  %v5294_v57 = vadd.f32 %v8633_v42, %v5258_v15  ;;  %v9085_v15 = vld [vmem:[#allocation41_spill] sm:$0xff] }
 0x4d3   : > { %v9086_v12 = vld [vmem:[#allocation45_spill] sm:$0xff] }
 0x4d4   : > { %5535 = vst.msk [vmem:[%s8597_s13 + $0x78] sm:$0xff] %vm412_vm0, %v5503_v43  ;;  %v4821_v17 = vadd.f32 %v4787_v13, %v4163_v52  ;;  %v5326_v2 = vmax.f32 %v5294_v57, 0.0  ;;  %v6366_v43 = vld [vmem:[%s6736_s15 + $0xe8] sm:$0xff]  ;;  %v9087_v13 = vld [vmem:[#allocation43_spill] sm:$0xff] }
 0x4d6   : > { %v5223_v60 = vadd.f32 %v5189_v32, %v4821_v17  ;;  %5420 = vrot.lane.b32.xlu0 %v5326_v2, %s6576_s10  ;;  %v6367_v2 = vld [vmem:[%s6736_s15 + $0xd8] sm:$0xff] }
 0x4d8   : > { %v5259_v25 = vmul.f32 %v8627_v63, %v5223_v60  ;;  %v5393_v31 = vpop.permute.xlu1 %5392 }
 0x4d9   : > { %v5472_v8 = vsel %vm1773_vm10, %v9076_v22, %v5393_v31  ;;  %v6368_v22 = vld [vmem:[%s6736_s15 + $0xe0] sm:$0xff] }
 0x4da   : > { %v5504_v21 = vadd.f32 %v6356_v40, %v5472_v8  ;;  %v5295_v45 = vadd.f32 %v8633_v42, %v5259_v25  ;;  %v9088_v25 = vld [vmem:[#allocation44_spill] sm:$0xff] }
 0x4dc   : > { %5536 = vst.msk [vmem:[%s8597_s13 + $0x80] sm:$0xff] %vm412_vm0, %v5504_v21  ;;  %v5327_v3 = vmax.f32 %v5295_v45, 0.0  ;;  %v9089_v21 = vld [vmem:[#allocation47_spill] sm:$0xff] }
 0x4de   : > { %5422 = vrot.lane.b32.xlu1 %v5327_v3, %s6576_s10  ;;  %v6369_v3 = vld [vmem:[%s6736_s15 + $0xf0] sm:$0xff] }
 0x4e0   : > { %v5401_v4 = vpop.permute.xlu2 %5400 }
 0x4e1   : > { %v5476_v63 = vsel %vm1773_vm10, %v9077_v38, %v5401_v4 }
 0x4e2   : > { %v5508_v7 = vadd.f32 %v6357_v6, %v5476_v63  ;;  %v9090_v63 = vld [vmem:[#allocation46_spill] sm:$0xff] }
 0x4e4   : > { %5540 = vst.msk [vmem:[%s8597_s13 + $0xa0] sm:$0xff] %vm412_vm0, %v5508_v7  ;;  %v6370_v7 = vld [vmem:[%s6736_s15 + $0xf8] sm:$0xff] }
 0x4e8   : > { %v5397_v46 = vpop.permute.xlu0 %5396 }
 0x4e9   : > { %v5474_v42 = vsel %vm1773_vm10, %v9078_v9, %v5397_v46 }
 0x4ea   : > { %v5506_v44 = vadd.f32 %v6358_v18, %v5474_v42 }
 0x4ec   : > { %5538 = vst.msk [vmem:[%s8597_s13 + $0x90] sm:$0xff] %vm412_vm0, %v5506_v44 }
 0x4f0   : > { %v5399_v62 = vpop.permute.xlu1 %5398 }
 0x4f1   : > { %v5475_v55 = vsel %vm1773_vm10, %v9079_v48, %v5399_v62 }
 0x4f2   : > { %v5507_v26 = vadd.f32 %v6359_v20, %v5475_v55 }
 0x4f4   : > { %5539 = vst.msk [vmem:[%s8597_s13 + $0x98] sm:$0xff] %vm412_vm0, %v5507_v26 }
 0x4f8   : > { %v5407_v34 = vpop.permute.xlu2 %5406 }
 0x4f9   : > { %v5479_v1 = vsel %vm1773_vm10, %v9080_v24, %v5407_v34 }
 0x4fa   : > { %v5511_v47 = vadd.f32 %v6360_v59, %v5479_v1 }
 0x4fc   : > { %5543 = vst.msk [vmem:[%s8597_s13 + $0xb8] sm:$0xff] %vm412_vm0, %v5511_v47 }
 0x500   : > { %v5403_v16 = vpop.permute.xlu0 %5402 }
 0x501   : > { %v5477_v14 = vsel %vm1773_vm10, %v9081_v56, %v5403_v16 }
 0x502   : > { %v5509_v50 = vadd.f32 %v6361_v19, %v5477_v14 }
 0x504   : > { %5541 = vst.msk [vmem:[%s8597_s13 + $0xa8] sm:$0xff] %vm412_vm0, %v5509_v50 }
 0x508   : > { %v5405_v0 = vpop.permute.xlu1 %5404 }
 0x509   : > { %v5478_v51 = vsel %vm1773_vm10, %v9082_v54, %v5405_v0 }
 0x50a   : > { %v5510_v5 = vadd.f32 %v6362_v53, %v5478_v51 }
 0x50c   : > { %5542 = vst.msk [vmem:[%s8597_s13 + $0xb0] sm:$0xff] %vm412_vm0, %v5510_v5 }
 0x510   : > { %v5413_v23 = vpop.permute.xlu2 %5412 }
 0x511   : > { %v5482_v36 = vsel %vm1773_vm10, %v9083_v37, %v5413_v23 }
 0x512   : > { %v5514_v41 = vadd.f32 %v6363_v49, %v5482_v36 }
 0x514   : > { %5546 = vst.msk [vmem:[%s8597_s13 + $0xd0] sm:$0xff] %vm412_vm0, %v5514_v41 }
 0x518   : > { %v5409_v35 = vpop.permute.xlu0 %5408 }
 0x519   : > { %v5480_v58 = vsel %vm1773_vm10, %v9084_v30, %v5409_v35 }
 0x51a   : > { %v5512_v29 = vadd.f32 %v6364_v33, %v5480_v58 }
 0x51c   : > { %5544 = vst.msk [vmem:[%s8597_s13 + $0xc0] sm:$0xff] %vm412_vm0, %v5512_v29 }
 0x520   : > { %v5411_v11 = vpop.permute.xlu1 %5410 }
 0x521   : > { %v5481_v27 = vsel %vm1773_vm10, %v9085_v15, %v5411_v11 }
 0x522   : > { %v5513_v39 = vadd.f32 %v6365_v28, %v5481_v27 }
 0x524   : > { %5545 = vst.msk [vmem:[%s8597_s13 + $0xc8] sm:$0xff] %vm412_vm0, %v5513_v39 }
 0x528   : > { %v5419_v10 = vpop.permute.xlu2 %5418 }
 0x529   : > { %v5485_v61 = vsel %vm1773_vm10, %v9086_v12, %v5419_v10 }
 0x52a   : > { %v5517_v52 = vadd.f32 %v6366_v43, %v5485_v61 }
 0x52c   : > { %5549 = vst.msk [vmem:[%s8597_s13 + $0xe8] sm:$0xff] %vm412_vm0, %v5517_v52 }
 0x530   : > { %v5415_v57 = vpop.permute.xlu0 %5414 }
 0x531   : > { %v5483_v17 = vsel %vm1773_vm10, %v9087_v13, %v5415_v57 }
 0x532   : > { %v5515_v32 = vadd.f32 %v6367_v2, %v5483_v17 }
 0x534   : > { %5547 = vst.msk [vmem:[%s8597_s13 + $0xd8] sm:$0xff] %vm412_vm0, %v5515_v32 }
 0x538   : > { %v5417_v60 = vpop.permute.xlu1 %5416 }
 0x539   : > { %v5484_v31 = vsel %vm1773_vm10, %v9088_v25, %v5417_v60 }
 0x53a   : > { %v5516_v8 = vadd.f32 %v6368_v22, %v5484_v31 }
 0x53c   : > { %5548 = vst.msk [vmem:[%s8597_s13 + $0xe0] sm:$0xff] %vm412_vm0, %v5516_v8 }
 0x548   : > { %v5421_v40 = vpop.permute.xlu0 %5420 }
 0x549   : > { %v5486_v45 = vsel %vm1773_vm10, %v9089_v21, %v5421_v40 }
 0x54a   : > { %v5518_v4 = vadd.f32 %v6369_v3, %v5486_v45 }
 0x54c   : > { %5550 = vst.msk [vmem:[%s8597_s13 + $0xf0] sm:$0xff] %vm412_vm0, %v5518_v4 }
 0x550   : > { %v5423_v38 = vpop.permute.xlu1 %5422 }
 0x551   : > { %v5487_v6 = vsel %vm1773_vm10, %v9090_v63, %v5423_v38 }
 0x552   : > { %v5519_v46 = vadd.f32 %v6370_v7, %v5487_v6 }
 0x554   : > { %5551 = vst.msk [vmem:[%s8597_s13 + $0xf8] sm:$0xff] %vm412_vm0, %v5519_v46 }
 0x555   : > { %6518 = shalt.err (!%p6515_p10)
}
 0x556   : > { %s6577_s20 = smov 128   ;;  %s6578_s15 = smov 8  }
 0x557   : > { %6211 = dma.vmem_to_hbm [thread:$0]  (%p6702_p7), %s5566_s9, 4096, %s5568_s1, %s5553_s28, %s6577_s20, %s6577_s20, %s6578_s15  }
 0x558 PF: > { %s5582_s13 = sand.u32 1, %s6553_s24   ;;  %p9091_p12 = scmp.ge.s32.totalorder %s6565_s27, 2 }
 0x559   : > { %s5583_s22 = scalar_lea.sflag [#allocation5], %s5582_s13 }
 0x55a   : > { %p6228_p13 = pnand %p9091_p12, %p6654_p6 }
 0x55c   : > { %p6229_p0 = pneg %p6228_p13 }
 0x55e   : > { %6548 = dma.done.wait (%p6229_p0), %s5583_s22, 4096  }
 0x55f   : > { %6550 = vsyncadd (%p6229_p0), %s5583_s22, 4294963200  ;;  %p22_p3 = scmp.ge.s32.totalorder %s6686_s11, 4   ;;  %s9092_s24 = smov %s6557_s25 }
 0x560   : > { %s9093_s25 = smov %s6561_s26  ;;  %s9094_s26 = smov %s6698_s17 }
 0x561   : > { %s9095_s27 = smov %s6686_s11  ;;  %24 = sbr.rel (!%p22_p3) target bundleno = 9 (0x9), region = 115 }
 0x566   :  { %5589 = vsyncpa [#allocation4], 1 }
 0x567   :  { %5591 = vsyncpa [#allocation4 + $0x1], 1 }
 0x568   :  { %5592 = vsyncpa [#allocation7], 1 }
 0x569   :  { %5593 = vsyncpa [#allocation10], 1 }
 0x56a   :  { %5594 = vsyncpa [#allocation5], 1 }
 0x56b   :  { %5596 = vsyncpa [#allocation5 + $0x1], 1 }

</bundles_post_ra>
